<compile_context>
chip_gen: v6e
topology: v6e:2x2x1
jax: 0.10.0
libtpu: 0.0.40
codegen_flags: <defaults>
</compile_context>

<pallas_src>
import jax
import jax.numpy as jnp
from jax import lax
from jax.experimental import pallas as pl
from jax.experimental.pallas import tpu as pltpu


LANES = 128
PAD_L = 8          # interior column offset in the padded scratch (sublane-aligned bulk store)


def _round_up_lanes(c):
    return ((c + LANES - 1) // LANES) * LANES


def _row_tile(h, w):
    """Rows per in-kernel matmul tile: ~256 output pixels (v6e/v7x MXU width), dividing H."""
    target = max(1, 256 // max(w, 1))
    for th in range(min(h, target), 0, -1):
        if h % th == 0:
            return th
    return h


def _pick_row_block(m):
    for tm in (2048, 1024, 512, 256, 128, 64, 32, 16, 8):
        if m % tm == 0:
            return tm
    return m


def _vmem_limit(nbytes):
    """Scoped-VMEM limit from actual block/scratch bytes, with headroom."""
    return int(min(max(int(nbytes * 1.5) + (4 << 20), 32 << 20), 100 << 20))


def _conv_vmem_bytes(H, W, CPI, CPO):
    in_b = H * W * CPI * 2 * 2            # bf16 input block, double-buffered
    w_b = 9 * CPI * CPO * 2 * 2           # bf16 weights
    out_b = H * W * CPO * 2 * 2           # bf16 output block
    st_b = 2 * CPO * 4 * 2                # f32 stats block
    xp_b = (H + 2) * (W + PAD_L + 1) * CPI * 2   # bf16 padded-activation scratch
    return in_b + w_b + out_b + st_b + xp_b


# ------------------- shared conv core (bf16 padded scratch + 9 matmuls + f32 stats) -------------------

def _conv_core(w_ref, o_ref, stats_ref, xp_ref):
    # w_ref    : (9, CPI, CPO) bf16   index k = dy*3 + dx
    # o_ref    : (H, W, CPO)   bf16   conv output
    # stats_ref: (2, CPO)      f32    [sum, sum_sq] over this image (from the f32 accumulator)
    # xp_ref   : (H+2, W+PAD_L+1, CPI) bf16  padded activation; interior already written by caller
    H, W, CPO = o_ref.shape
    CPI = xp_ref.shape[-1]
    TH = _row_tile(H, W)
    n_tiles = H // TH

    # Zero only the halo border strips (interior is fully overwritten every grid step).
    dt = xp_ref.dtype
    xp_ref[0:1, PAD_L - 1:PAD_L + W + 1, :] = jnp.zeros((1, W + 2, CPI), dt)
    xp_ref[H + 1:H + 2, PAD_L - 1:PAD_L + W + 1, :] = jnp.zeros((1, W + 2, CPI), dt)
    xp_ref[1:H + 1, PAD_L - 1:PAD_L, :] = jnp.zeros((H, 1, CPI), dt)
    xp_ref[1:H + 1, PAD_L + W:PAD_L + W + 1, :] = jnp.zeros((H, 1, CPI), dt)

    def tile(t, carry):
        s_tot, ss_tot = carry
        h0 = t * TH
        acc = jnp.zeros((TH * W, CPO), jnp.float32)
        for dy in range(3):
            for dx in range(3):
                patch = xp_ref[pl.ds(h0 + dy, TH), PAD_L - 1 + dx:PAD_L - 1 + dx + W, :]
                acc = acc + jnp.dot(patch.reshape(TH * W, CPI), w_ref[dy * 3 + dx],
                                    preferred_element_type=jnp.float32)       # MXU, f32 acc
        o_ref[pl.ds(h0, TH), :, :] = acc.astype(jnp.bfloat16).reshape(TH, W, CPO)
        s_tot = s_tot + jnp.sum(acc, axis=0, keepdims=True)
        ss_tot = ss_tot + jnp.sum(acc * acc, axis=0, keepdims=True)
        return s_tot, ss_tot

    init = (jnp.zeros((1, CPO), jnp.float32), jnp.zeros((1, CPO), jnp.float32))
    if n_tiles <= 4:
        s_tot, ss_tot = init
        for t in range(n_tiles):                       # small: unroll for LLO scheduling
            s_tot, ss_tot = tile(t, (s_tot, ss_tot))
    else:                                              # large H: keep code size / live ranges bounded
        s_tot, ss_tot = lax.fori_loop(0, n_tiles, tile, init)

    stats_ref[...] = jnp.concatenate([s_tot, ss_tot], axis=0)


def _conv1_kernel(x_ref, w_ref, o_ref, stats_ref, xp_ref):
    H, W, _ = o_ref.shape
    xp_ref[1:H + 1, PAD_L:PAD_L + W, :] = x_ref[...]           # bf16 -> bf16, aligned bulk store
    _conv_core(w_ref, o_ref, stats_ref, xp_ref)


def _conv2_kernel(y_ref, scale_ref, shift_ref, w_ref, o_ref, stats_ref, xp_ref):
    # fused BN1 + ReLU prologue (f32 math), stored bf16 into the padded scratch, then conv2
    H, W, _ = o_ref.shape
    a = jnp.maximum(y_ref[...].astype(jnp.float32) * scale_ref[...] + shift_ref[...], 0.0)
    xp_ref[1:H + 1, PAD_L:PAD_L + W, :] = a.astype(jnp.bfloat16)
    _conv_core(w_ref, o_ref, stats_ref, xp_ref)


def _bn_relu_out_kernel(y_ref, scale_ref, shift_ref, o_ref):
    c_out = o_ref.shape[-1]
    y = y_ref[...].astype(jnp.float32)
    z = jnp.maximum(y * scale_ref[...] + shift_ref[...], 0.0)
    o_ref[...] = z[:, :c_out]                                   # channel slice fused into the store


# ------------------------------------ pallas_call wrappers ------------------------------------

def _conv1(x, w, N, H, W, CPI, CPO):
    return pl.pallas_call(
        _conv1_kernel,
        out_shape=(
            jax.ShapeDtypeStruct((N, H, W, CPO), jnp.bfloat16),
            jax.ShapeDtypeStruct((N, 2, CPO), jnp.float32),
        ),
        grid_spec=pltpu.PrefetchScalarGridSpec(
            num_scalar_prefetch=0,
            grid=(N,),
            in_specs=[
                pl.BlockSpec((None, H, W, CPI), lambda n: (n, 0, 0, 0)),
                pl.BlockSpec((9, CPI, CPO), lambda n: (0, 0, 0)),
            ],
            out_specs=[
                pl.BlockSpec((None, H, W, CPO), lambda n: (n, 0, 0, 0)),
                pl.BlockSpec((None, 2, CPO), lambda n: (n, 0, 0)),
            ],
            scratch_shapes=[pltpu.VMEM((H + 2, W + PAD_L + 1, CPI), jnp.bfloat16)],
        ),
        compiler_params=pltpu.CompilerParams(
            dimension_semantics=("parallel",),
            vmem_limit_bytes=_vmem_limit(_conv_vmem_bytes(H, W, CPI, CPO))),
    )(x, w)


def _conv2(y1, scale1, shift1, w, N, H, W, CPO):
    return pl.pallas_call(
        _conv2_kernel,
        out_shape=(
            jax.ShapeDtypeStruct((N, H, W, CPO), jnp.bfloat16),
            jax.ShapeDtypeStruct((N, 2, CPO), jnp.float32),
        ),
        grid_spec=pltpu.PrefetchScalarGridSpec(
            num_scalar_prefetch=0,
            grid=(N,),
            in_specs=[
                pl.BlockSpec((None, H, W, CPO), lambda n: (n, 0, 0, 0)),
                pl.BlockSpec((1, CPO), lambda n: (0, 0)),
                pl.BlockSpec((1, CPO), lambda n: (0, 0)),
                pl.BlockSpec((9, CPO, CPO), lambda n: (0, 0, 0)),
            ],
            out_specs=[
                pl.BlockSpec((None, H, W, CPO), lambda n: (n, 0, 0, 0)),
                pl.BlockSpec((None, 2, CPO), lambda n: (n, 0, 0)),
            ],
            scratch_shapes=[pltpu.VMEM((H + 2, W + PAD_L + 1, CPO), jnp.bfloat16)],
        ),
        compiler_params=pltpu.CompilerParams(
            dimension_semantics=("parallel",),
            vmem_limit_bytes=_vmem_limit(_conv_vmem_bytes(H, W, CPO, CPO))),
    )(y1, scale1, shift1, w)


def _bn_relu_out(y_flat, scale, shift, c_out):
    M, CP = y_flat.shape
    TM = _pick_row_block(M)
    vmem = _vmem_limit(TM * CP * 2 * 2 + TM * c_out * 4 * 2 + 2 * CP * 4 * 2)
    return pl.pallas_call(
        _bn_relu_out_kernel,
        out_shape=jax.ShapeDtypeStruct((M, c_out), jnp.float32),
        grid_spec=pltpu.PrefetchScalarGridSpec(
            num_scalar_prefetch=0,
            grid=(M // TM,),
            in_specs=[
                pl.BlockSpec((TM, CP), lambda i: (i, 0)),
                pl.BlockSpec((1, CP), lambda i: (0, 0)),
                pl.BlockSpec((1, CP), lambda i: (0, 0)),
            ],
            out_specs=pl.BlockSpec((TM, c_out), lambda i: (i, 0)),
        ),
        compiler_params=pltpu.CompilerParams(
            dimension_semantics=("parallel",), vmem_limit_bytes=vmem),
    )(y_flat, scale, shift)


# ----------------------------------- parameter / stats helpers -----------------------------------

def _prep_weight(w_oihw, cpi, cpo):
    """(C_out, C_in, 3, 3) -> (9, CPI, CPO) bf16 with slab index k = dy*3 + dx."""
    co, ci, kh, kw = w_oihw.shape
    w = jnp.transpose(w_oihw, (2, 3, 1, 0))                            # (dy, dx, ci, co)
    w = jnp.pad(w, ((0, 0), (0, 0), (0, cpi - ci), (0, cpo - co)))
    return w.reshape(kh * kw, cpi, cpo).astype(jnp.bfloat16)


def _bn_affine(stats, gamma, beta, count, cp, eps=1e-5):
    """Reduce per-image (sum, sum_sq) partials and fold BN into a per-channel scale/shift."""
    s = jnp.sum(stats[:, 0, :], axis=0)
    ss = jnp.sum(stats[:, 1, :], axis=0)
    mean = s / count
    var = jnp.maximum(ss / count - mean * mean, 0.0)                   # biased batch variance
    g = jnp.pad(gamma.astype(jnp.float32), (0, cp - gamma.shape[0]))
    b = jnp.pad(beta.astype(jnp.float32), (0, cp - beta.shape[0]))
    scale = g * lax.rsqrt(var + eps)
    shift = b - mean * scale
    return scale.reshape(1, cp), shift.reshape(1, cp)


# ----------------------------------------- DoubleConv -----------------------------------------

def double_conv(x_nchw, params, eps=1e-5):
    N, C_in, H, W = x_nchw.shape
    C_out = params["w1"].shape[0]
    CPI = _round_up_lanes(C_in)
    CPO = _round_up_lanes(C_out)
    count = N * H * W

    # NCHW -> NHWC, lane-pad channels, bf16 activations in HBM
    x = jnp.transpose(x_nchw, (0, 2, 3, 1))
    x = jnp.pad(x, ((0, 0), (0, 0), (0, 0), (0, CPI - C_in))).astype(jnp.bfloat16)

    w1 = _prep_weight(params["w1"], CPI, CPO)
    w2 = _prep_weight(params["w2"], CPO, CPO)
    # NOTE: conv biases b1/b2 are *not* used: training-mode BatchNorm subtracts the batch mean
    # immediately after each conv, so a per-channel constant bias cancels exactly.

    y1, stats1 = _conv1(x, w1, N, H, W, CPI, CPO)
    scale1, shift1 = _bn_affine(stats1, params["g1"], params["beta1"], count, CPO, eps)

    y2, stats2 = _conv2(y1, scale1, shift1, w2, N, H, W, CPO)
    scale2, shift2 = _bn_affine(stats2, params["g2"], params["beta2"], count, CPO, eps)

    out = _bn_relu_out(y2.reshape(N * H * W, CPO), scale2, shift2, C_out)
    out = out.reshape(N, H, W, C_out)
    return jnp.transpose(out, (0, 3, 1, 2))                            # NHWC -> NCHW


def init_params(key, c_in, c_out):
    k1, k2, k3, k4 = jax.random.split(key, 4)
    fan1 = c_in * 9
    fan2 = c_out * 9
    lim1 = 1.0 / jnp.sqrt(fan1)
    lim2 = 1.0 / jnp.sqrt(fan2)
    return {
        "w1": jax.random.uniform(k1, (c_out, c_in, 3, 3), jnp.float32, -lim1, lim1),
        "b1": jax.random.uniform(k2, (c_out,), jnp.float32, -lim1, lim1),   # cancelled by BN (ref only)
        "g1": jnp.ones((c_out,), jnp.float32),
        "beta1": jnp.zeros((c_out,), jnp.float32),
        "w2": jax.random.uniform(k3, (c_out, c_out, 3, 3), jnp.float32, -lim2, lim2),
        "b2": jax.random.uniform(k4, (c_out,), jnp.float32, -lim2, lim2),   # cancelled by BN (ref only)
        "g2": jnp.ones((c_out,), jnp.float32),
        "beta2": jnp.zeros((c_out,), jnp.float32),
    }


# --------------------------------- pure-JAX f32 reference ---------------------------------

def _ref_double_conv(x, p):
    def conv(x, w, b):
        y = lax.conv_general_dilated(x, w, (1, 1), ((1, 1), (1, 1)),
                                     dimension_numbers=("NCHW", "OIHW", "NCHW"))
        return y + b[None, :, None, None]

    def bnr(x, g, be):
        mean = jnp.mean(x, axis=(0, 2, 3), keepdims=True)
        var = jnp.mean((x - mean) ** 2, axis=(0, 2, 3), keepdims=True)
        y = (x - mean) * lax.rsqrt(var + 1e-5) * g[None, :, None, None] + be[None, :, None, None]
        return jnp.maximum(y, 0.0)

    x = bnr(conv(x, p["w1"], p["b1"]), p["g1"], p["beta1"])
    x = bnr(conv(x, p["w2"], p["b2"]), p["g2"], p["beta2"])
    return x


if __name__ == "__main__":
    key = jax.random.PRNGKey(0)
    kx, kp = jax.random.split(key)

    N, C_IN, C_OUT, H, W = 2, 4, 8, 16, 16
    x = jax.random.normal(kx, (N, C_IN, H, W), jnp.float32)   # PyTorch-style NCHW input
    params = init_params(kp, C_IN, C_OUT)

    out = jax.block_until_ready(double_conv(x, params))
    ref = _ref_double_conv(x, params)

    assert out.shape == (N, C_OUT, H, W)
    # bf16 MXU operands + bf16 intermediates + two batch-norm renormalizations => bf16-level error
    max_err = float(jnp.max(jnp.abs(out - ref)))
    assert jnp.allclose(out, ref, atol=1e-1, rtol=1e-1), f"mismatch vs reference (max abs err {max_err})"

    print("KERNEL_OK")
</pallas_src>

<mosaic_0001>
module attributes {stable_mosaic.version = 11 : i64} {
  func.func @_conv1_kernel(%arg0: i32, %arg1: memref<1x16x16x128xbf16, #tpu.memory_space<vmem>>, %arg2: memref<9x128x128xbf16, #tpu.memory_space<vmem>>, %arg3: memref<1x16x16x128xbf16, #tpu.memory_space<vmem>>, %arg4: memref<1x2x128xf32, #tpu.memory_space<vmem>>, %arg5: memref<18x25x128xbf16, #tpu.memory_space<vmem>>) attributes {dimension_semantics = [#tpu.dimension_semantics<parallel>], iteration_bounds = array<i64: 2>, scalar_prefetch = 0 : i64, scratch_operands = 1 : i64, tpu.core_type = #tpu.core_type<tc>, window_params = [{transform_indices = @transform_0, window_bounds = array<i64: 1, 16, 16, 128>}, {pipeline_mode = #tpu.pipeline_mode<synchronous>, transform_indices = @transform_1, window_bounds = array<i64: 9, 128, 128>}, {transform_indices = @transform_2, window_bounds = array<i64: 1, 16, 16, 128>}, {transform_indices = @transform_3, window_bounds = array<i64: 1, 2, 128>}]} {
    %c0 = arith.constant 0 : index
    %c0_0 = arith.constant 0 : index
    %c0_1 = arith.constant 0 : index
    %c0_2 = arith.constant 0 : index
    %0 = vector.load %arg1[%c0, %c0_0, %c0_1, %c0_2] : memref<1x16x16x128xbf16, #tpu.memory_space<vmem>>, vector<1x16x16x128xbf16>
    %1 = vector.shape_cast %0 : vector<1x16x16x128xbf16> to vector<16x16x128xbf16>
    %c1 = arith.constant 1 : index
    %c8 = arith.constant 8 : index
    %c0_3 = arith.constant 0 : index
    %2 = vector.load %arg5[%c1, %c8, %c0_3] : memref<18x25x128xbf16, #tpu.memory_space<vmem>>, vector<16x16x128xbf16>
    tpu.vector_store %arg5[%c1, %c8, %c0_3], %1 {strides = array<i32>} : memref<18x25x128xbf16, #tpu.memory_space<vmem>>, vector<16x16x128xbf16>,
    %cst = arith.constant 0.000000e+00 : bf16
    %3 = vector.broadcast %cst : bf16 to vector<1x18x128xbf16>
    %c0_4 = arith.constant 0 : index
    %c7 = arith.constant 7 : index
    %c0_5 = arith.constant 0 : index
    %4 = vector.load %arg5[%c0_4, %c7, %c0_5] : memref<18x25x128xbf16, #tpu.memory_space<vmem>>, vector<1x18x128xbf16>
    tpu.vector_store %arg5[%c0_4, %c7, %c0_5], %3 {strides = array<i32>} : memref<18x25x128xbf16, #tpu.memory_space<vmem>>, vector<1x18x128xbf16>,
    %cst_6 = arith.constant 0.000000e+00 : bf16
    %5 = vector.broadcast %cst_6 : bf16 to vector<1x18x128xbf16>
    %c17 = arith.constant 17 : index
    %c7_7 = arith.constant 7 : index
    %c0_8 = arith.constant 0 : index
    %6 = vector.load %arg5[%c17, %c7_7, %c0_8] : memref<18x25x128xbf16, #tpu.memory_space<vmem>>, vector<1x18x128xbf16>
    tpu.vector_store %arg5[%c17, %c7_7, %c0_8], %5 {strides = array<i32>} : memref<18x25x128xbf16, #tpu.memory_space<vmem>>, vector<1x18x128xbf16>,
    %cst_9 = arith.constant 0.000000e+00 : bf16
    %7 = vector.broadcast %cst_9 : bf16 to vector<16x1x128xbf16>
    %c1_10 = arith.constant 1 : index
    %c7_11 = arith.constant 7 : index
    %c0_12 = arith.constant 0 : index
    %8 = vector.load %arg5[%c1_10, %c7_11, %c0_12] : memref<18x25x128xbf16, #tpu.memory_space<vmem>>, vector<16x1x128xbf16>
    tpu.vector_store %arg5[%c1_10, %c7_11, %c0_12], %7 {strides = array<i32>} : memref<18x25x128xbf16, #tpu.memory_space<vmem>>, vector<16x1x128xbf16>,
    %cst_13 = arith.constant 0.000000e+00 : bf16
    %9 = vector.broadcast %cst_13 : bf16 to vector<16x1x128xbf16>
    %c1_14 = arith.constant 1 : index
    %c24 = arith.constant 24 : index
    %c0_15 = arith.constant 0 : index
    %10 = vector.load %arg5[%c1_14, %c24, %c0_15] : memref<18x25x128xbf16, #tpu.memory_space<vmem>>, vector<16x1x128xbf16>
    tpu.vector_store %arg5[%c1_14, %c24, %c0_15], %9 {strides = array<i32>} : memref<18x25x128xbf16, #tpu.memory_space<vmem>>, vector<16x1x128xbf16>,
    %cst_16 = arith.constant 0.000000e+00 : f32
    %11 = vector.broadcast %cst_16 : f32 to vector<1x128xf32>
    %cst_17 = arith.constant 0.000000e+00 : f32
    %12 = vector.broadcast %cst_17 : f32 to vector<1x128xf32>
    %cst_18 = arith.constant 0.000000e+00 : f32
    %13 = vector.broadcast %cst_18 : f32 to vector<256x128xf32>
    %c0_19 = arith.constant 0 : index
    %c7_20 = arith.constant 7 : index
    %c0_21 = arith.constant 0 : index
    %14 = vector.load %arg5[%c0_19, %c7_20, %c0_21] : memref<18x25x128xbf16, #tpu.memory_space<vmem>>, vector<16x16x128xbf16>
    %15 = vector.shape_cast %14 : vector<16x16x128xbf16> to vector<256x128xbf16>
    %c0_22 = arith.constant 0 : index
    %c0_23 = arith.constant 0 : index
    %c0_24 = arith.constant 0 : index
    %16 = vector.load %arg2[%c0_22, %c0_23, %c0_24] : memref<9x128x128xbf16, #tpu.memory_space<vmem>>, vector<1x128x128xbf16>
    %17 = vector.shape_cast %16 : vector<1x128x128xbf16> to vector<128x128xbf16>
    %cst_25 = arith.constant dense<0.000000e+00> : vector<256x128xf32>
    %18 = tpu.matmul %15, %17, %cst_25 {dimension_numbers = #tpu.dot_dimension_numbers<[1], [0], [0], [1], [0, 0, 1, 1], [], []>} : vector<256x128xbf16>, vector<128x128xbf16>, vector<256x128xf32> -> vector<256x128xf32>
    %19 = arith.addf %13, %18 : vector<256x128xf32>
    %c0_26 = arith.constant 0 : index
    %c8_27 = arith.constant 8 : index
    %c0_28 = arith.constant 0 : index
    %20 = vector.load %arg5[%c0_26, %c8_27, %c0_28] : memref<18x25x128xbf16, #tpu.memory_space<vmem>>, vector<16x16x128xbf16>
    %21 = vector.shape_cast %20 : vector<16x16x128xbf16> to vector<256x128xbf16>
    %c1_29 = arith.constant 1 : index
    %c0_30 = arith.constant 0 : index
    %c0_31 = arith.constant 0 : index
    %22 = vector.load %arg2[%c1_29, %c0_30, %c0_31] : memref<9x128x128xbf16, #tpu.memory_space<vmem>>, vector<1x128x128xbf16>
    %23 = vector.shape_cast %22 : vector<1x128x128xbf16> to vector<128x128xbf16>
    %cst_32 = arith.constant dense<0.000000e+00> : vector<256x128xf32>
    %24 = tpu.matmul %21, %23, %cst_32 {dimension_numbers = #tpu.dot_dimension_numbers<[1], [0], [0], [1], [0, 0, 1, 1], [], []>} : vector<256x128xbf16>, vector<128x128xbf16>, vector<256x128xf32> -> vector<256x128xf32>
    %25 = arith.addf %19, %24 : vector<256x128xf32>
    %c0_33 = arith.constant 0 : index
    %c9 = arith.constant 9 : index
    %c0_34 = arith.constant 0 : index
    %26 = vector.load %arg5[%c0_33, %c9, %c0_34] : memref<18x25x128xbf16, #tpu.memory_space<vmem>>, vector<16x16x128xbf16>
    %27 = vector.shape_cast %26 : vector<16x16x128xbf16> to vector<256x128xbf16>
    %c2 = arith.constant 2 : index
    %c0_35 = arith.constant 0 : index
    %c0_36 = arith.constant 0 : index
    %28 = vector.load %arg2[%c2, %c0_35, %c0_36] : memref<9x128x128xbf16, #tpu.memory_space<vmem>>, vector<1x128x128xbf16>
    %29 = vector.shape_cast %28 : vector<1x128x128xbf16> to vector<128x128xbf16>
    %cst_37 = arith.constant dense<0.000000e+00> : vector<256x128xf32>
    %30 = tpu.matmul %27, %29, %cst_37 {dimension_numbers = #tpu.dot_dimension_numbers<[1], [0], [0], [1], [0, 0, 1, 1], [], []>} : vector<256x128xbf16>, vector<128x128xbf16>, vector<256x128xf32> -> vector<256x128xf32>
    %31 = arith.addf %25, %30 : vector<256x128xf32>
    %c1_38 = arith.constant 1 : index
    %c7_39 = arith.constant 7 : index
    %c0_40 = arith.constant 0 : index
    %32 = vector.load %arg5[%c1_38, %c7_39, %c0_40] : memref<18x25x128xbf16, #tpu.memory_space<vmem>>, vector<16x16x128xbf16>
    %33 = vector.shape_cast %32 : vector<16x16x128xbf16> to vector<256x128xbf16>
    %c3 = arith.constant 3 : index
    %c0_41 = arith.constant 0 : index
    %c0_42 = arith.constant 0 : index
    %34 = vector.load %arg2[%c3, %c0_41, %c0_42] : memref<9x128x128xbf16, #tpu.memory_space<vmem>>, vector<1x128x128xbf16>
    %35 = vector.shape_cast %34 : vector<1x128x128xbf16> to vector<128x128xbf16>
    %cst_43 = arith.constant dense<0.000000e+00> : vector<256x128xf32>
    %36 = tpu.matmul %33, %35, %cst_43 {dimension_numbers = #tpu.dot_dimension_numbers<[1], [0], [0], [1], [0, 0, 1, 1], [], []>} : vector<256x128xbf16>, vector<128x128xbf16>, vector<256x128xf32> -> vector<256x128xf32>
    %37 = arith.addf %31, %36 : vector<256x128xf32>
    %c1_44 = arith.constant 1 : index
    %c8_45 = arith.constant 8 : index
    %c0_46 = arith.constant 0 : index
    %38 = vector.load %arg5[%c1_44, %c8_45, %c0_46] : memref<18x25x128xbf16, #tpu.memory_space<vmem>>, vector<16x16x128xbf16>
    %39 = vector.shape_cast %38 : vector<16x16x128xbf16> to vector<256x128xbf16>
    %c4 = arith.constant 4 : index
    %c0_47 = arith.constant 0 : index
    %c0_48 = arith.constant 0 : index
    %40 = vector.load %arg2[%c4, %c0_47, %c0_48] : memref<9x128x128xbf16, #tpu.memory_space<vmem>>, vector<1x128x128xbf16>
    %41 = vector.shape_cast %40 : vector<1x128x128xbf16> to vector<128x128xbf16>
    %cst_49 = arith.constant dense<0.000000e+00> : vector<256x128xf32>
    %42 = tpu.matmul %39, %41, %cst_49 {dimension_numbers = #tpu.dot_dimension_numbers<[1], [0], [0], [1], [0, 0, 1, 1], [], []>} : vector<256x128xbf16>, vector<128x128xbf16>, vector<256x128xf32> -> vector<256x128xf32>
    %43 = arith.addf %37, %42 : vector<256x128xf32>
    %c1_50 = arith.constant 1 : index
    %c9_51 = arith.constant 9 : index
    %c0_52 = arith.constant 0 : index
    %44 = vector.load %arg5[%c1_50, %c9_51, %c0_52] : memref<18x25x128xbf16, #tpu.memory_space<vmem>>, vector<16x16x128xbf16>
    %45 = vector.shape_cast %44 : vector<16x16x128xbf16> to vector<256x128xbf16>
    %c5 = arith.constant 5 : index
    %c0_53 = arith.constant 0 : index
    %c0_54 = arith.constant 0 : index
    %46 = vector.load %arg2[%c5, %c0_53, %c0_54] : memref<9x128x128xbf16, #tpu.memory_space<vmem>>, vector<1x128x128xbf16>
    %47 = vector.shape_cast %46 : vector<1x128x128xbf16> to vector<128x128xbf16>
    %cst_55 = arith.constant dense<0.000000e+00> : vector<256x128xf32>
    %48 = tpu.matmul %45, %47, %cst_55 {dimension_numbers = #tpu.dot_dimension_numbers<[1], [0], [0], [1], [0, 0, 1, 1], [], []>} : vector<256x128xbf16>, vector<128x128xbf16>, vector<256x128xf32> -> vector<256x128xf32>
    %49 = arith.addf %43, %48 : vector<256x128xf32>
    %c2_56 = arith.constant 2 : index
    %c7_57 = arith.constant 7 : index
    %c0_58 = arith.constant 0 : index
    %50 = vector.load %arg5[%c2_56, %c7_57, %c0_58] : memref<18x25x128xbf16, #tpu.memory_space<vmem>>, vector<16x16x128xbf16>
    %51 = vector.shape_cast %50 : vector<16x16x128xbf16> to vector<256x128xbf16>
    %c6 = arith.constant 6 : index
    %c0_59 = arith.constant 0 : index
    %c0_60 = arith.constant 0 : index
    %52 = vector.load %arg2[%c6, %c0_59, %c0_60] : memref<9x128x128xbf16, #tpu.memory_space<vmem>>, vector<1x128x128xbf16>
    %53 = vector.shape_cast %52 : vector<1x128x128xbf16> to vector<128x128xbf16>
    %cst_61 = arith.constant dense<0.000000e+00> : vector<256x128xf32>
    %54 = tpu.matmul %51, %53, %cst_61 {dimension_numbers = #tpu.dot_dimension_numbers<[1], [0], [0], [1], [0, 0, 1, 1], [], []>} : vector<256x128xbf16>, vector<128x128xbf16>, vector<256x128xf32> -> vector<256x128xf32>
    %55 = arith.addf %49, %54 : vector<256x128xf32>
    %c2_62 = arith.constant 2 : index
    %c8_63 = arith.constant 8 : index
    %c0_64 = arith.constant 0 : index
    %56 = vector.load %arg5[%c2_62, %c8_63, %c0_64] : memref<18x25x128xbf16, #tpu.memory_space<vmem>>, vector<16x16x128xbf16>
    %57 = vector.shape_cast %56 : vector<16x16x128xbf16> to vector<256x128xbf16>
    %c7_65 = arith.constant 7 : index
    %c0_66 = arith.constant 0 : index
    %c0_67 = arith.constant 0 : index
    %58 = vector.load %arg2[%c7_65, %c0_66, %c0_67] : memref<9x128x128xbf16, #tpu.memory_space<vmem>>, vector<1x128x128xbf16>
    %59 = vector.shape_cast %58 : vector<1x128x128xbf16> to vector<128x128xbf16>
    %cst_68 = arith.constant dense<0.000000e+00> : vector<256x128xf32>
    %60 = tpu.matmul %57, %59, %cst_68 {dimension_numbers = #tpu.dot_dimension_numbers<[1], [0], [0], [1], [0, 0, 1, 1], [], []>} : vector<256x128xbf16>, vector<128x128xbf16>, vector<256x128xf32> -> vector<256x128xf32>
    %61 = arith.addf %55, %60 : vector<256x128xf32>
    %c2_69 = arith.constant 2 : index
    %c9_70 = arith.constant 9 : index
    %c0_71 = arith.constant 0 : index
    %62 = vector.load %arg5[%c2_69, %c9_70, %c0_71] : memref<18x25x128xbf16, #tpu.memory_space<vmem>>, vector<16x16x128xbf16>
    %63 = vector.shape_cast %62 : vector<16x16x128xbf16> to vector<256x128xbf16>
    %c8_72 = arith.constant 8 : index
    %c0_73 = arith.constant 0 : index
    %c0_74 = arith.constant 0 : index
    %64 = vector.load %arg2[%c8_72, %c0_73, %c0_74] : memref<9x128x128xbf16, #tpu.memory_space<vmem>>, vector<1x128x128xbf16>
    %65 = vector.shape_cast %64 : vector<1x128x128xbf16> to vector<128x128xbf16>
    %cst_75 = arith.constant dense<0.000000e+00> : vector<256x128xf32>
    %66 = tpu.matmul %63, %65, %cst_75 {dimension_numbers = #tpu.dot_dimension_numbers<[1], [0], [0], [1], [0, 0, 1, 1], [], []>} : vector<256x128xbf16>, vector<128x128xbf16>, vector<256x128xf32> -> vector<256x128xf32>
    %67 = arith.addf %61, %66 : vector<256x128xf32>
    %68 = arith.truncf %67 : vector<256x128xf32> to vector<256x128xbf16>
    %69 = vector.shape_cast %68 : vector<256x128xbf16> to vector<16x16x128xbf16>
    %c0_76 = arith.constant 0 : index
    %c0_77 = arith.constant 0 : index
    %c0_78 = arith.constant 0 : index
    %c0_79 = arith.constant 0 : index
    %70 = vector.load %arg3[%c0_76, %c0_77, %c0_78, %c0_79] : memref<1x16x16x128xbf16, #tpu.memory_space<vmem>>, vector<1x16x16x128xbf16>
    %71 = vector.shape_cast %70 : vector<1x16x16x128xbf16> to vector<16x16x128xbf16>
    %72 = vector.shape_cast %69 : vector<16x16x128xbf16> to vector<1x16x16x128xbf16>
    tpu.vector_store %arg3[%c0_76, %c0_77, %c0_78, %c0_79], %72 {strides = array<i32>} : memref<1x16x16x128xbf16, #tpu.memory_space<vmem>>, vector<1x16x16x128xbf16>,
    %cst_80 = arith.constant dense<0.000000e+00> : vector<128xf32>
    %73 = vector.multi_reduction <add>, %67, %cst_80 [0] : vector<256x128xf32> to vector<128xf32>
    %74 = vector.shape_cast %73 : vector<128xf32> to vector<1x128xf32>
    %75 = arith.addf %11, %74 : vector<1x128xf32>
    %76 = arith.mulf %67, %67 : vector<256x128xf32>
    %cst_81 = arith.constant dense<0.000000e+00> : vector<128xf32>
    %77 = vector.multi_reduction <add>, %76, %cst_81 [0] : vector<256x128xf32> to vector<128xf32>
    %78 = vector.shape_cast %77 : vector<128xf32> to vector<1x128xf32>
    %79 = arith.addf %12, %78 : vector<1x128xf32>
    %80 = tpu.concatenate %75, %79 in 0 : vector<1x128xf32>, vector<1x128xf32> -> vector<2x128xf32>
    %c0_82 = arith.constant 0 : index
    %c0_83 = arith.constant 0 : index
    %c0_84 = arith.constant 0 : index
    %81 = vector.load %arg4[%c0_82, %c0_83, %c0_84] : memref<1x2x128xf32, #tpu.memory_space<vmem>>, vector<1x2x128xf32>
    %82 = vector.shape_cast %81 : vector<1x2x128xf32> to vector<2x128xf32>
    %83 = vector.shape_cast %80 : vector<2x128xf32> to vector<1x2x128xf32>
    tpu.vector_store %arg4[%c0_82, %c0_83, %c0_84], %83 {strides = array<i32>} : memref<1x2x128xf32, #tpu.memory_space<vmem>>, vector<1x2x128xf32>,
    return
  }
  func.func @transform_0(%arg0: i32) -> (i32, i32, i32, i32) {
    %c0_i32 = arith.constant 0 : i32
    %c0_i32_0 = arith.constant 0 : i32
    %c0_i32_1 = arith.constant 0 : i32
    %c0_i32_2 = arith.constant 0 : i32
    return %arg0, %c0_i32, %c0_i32_0, %c0_i32_1 : i32, i32, i32, i32
  }
  func.func @transform_1(%arg0: i32) -> (i32, i32, i32) {
    %c0_i32 = arith.constant 0 : i32
    %c0_i32_0 = arith.constant 0 : i32
    %c0_i32_1 = arith.constant 0 : i32
    %c0_i32_2 = arith.constant 0 : i32
    return %c0_i32, %c0_i32_0, %c0_i32_1 : i32, i32, i32
  }
  func.func @transform_2(%arg0: i32) -> (i32, i32, i32, i32) {
    %c0_i32 = arith.constant 0 : i32
    %c0_i32_0 = arith.constant 0 : i32
    %c0_i32_1 = arith.constant 0 : i32
    %c0_i32_2 = arith.constant 0 : i32
    return %arg0, %c0_i32, %c0_i32_0, %c0_i32_1 : i32, i32, i32, i32
  }
  func.func @transform_3(%arg0: i32) -> (i32, i32, i32) {
    %c0_i32 = arith.constant 0 : i32
    %c0_i32_0 = arith.constant 0 : i32
    %c0_i32_1 = arith.constant 0 : i32
    return %arg0, %c0_i32, %c0_i32_0 : i32, i32, i32
  }
}

</mosaic_0001>

<bundles_post_ra>
// kernel: tpu_custom_call.1
= control target key start
LH: loop header
LB: loop body
LE: loop exit
PB: predicated region body
PF: predicated region fallthrough
CT: control target
= control target key end

     0   :  { %9 = vsyncpa [#allocation4], 0  ;;  %s9944_s0 = inlined_call_operand.hbm [shape: bf16[2,16,16,128], index: 0, kind: input, shape index: {}]   ;;  %s9945_s1 = inlined_call_operand.hbm [shape: bf16[9,128,128], index: 1, kind: input, shape index: {}]   ;;  %s9946_s2 = inlined_call_operand.hbm [shape: bf16[2,16,16,128], index: 2, kind: output, shape index: {0}]   ;;  %s9947_s3 = inlined_call_operand.hbm [shape: f32[2,2,128], index: 3, kind: output, shape index: {1}]  }
   0x1   :  { %11 = vsyncpa [#allocation4 + $0x1], 0 }
   0x2   :  { %12 = vsyncpa [#allocation7], 0 }
   0x3   :  { %13 = vsyncpa [#allocation5], 0 }
   0x4   :  { %15 = vsyncpa [#allocation5 + $0x1], 0 }
   0x5   :  { %16 = vsyncpa [#allocation10], 0 }
   0x6   :  { %18 = vsyncpa [#allocation10 + $0x1], 0  ;;  %s7758_s12 = smov 0   ;;  %s7760_s13 = smov 0  }
   0x7   :  { %s7762_s14 = smov 0   ;;  %s7764_s15 = smov 0  }
   0x8 LB: > { %s7779_s16 = sadd.s32 4294967295, %s7727_s15   ;;  %s6249_s17 = sadd.s32 4294967294, %s7727_s15   ;;  %s7727_s15 = sphi %s7764_s15, %s10216_s15   ;;  %s7723_s14 = sphi %s7762_s14, %s10215_s14   ;;  %s7719_s13 = sphi %s7760_s13, %s10214_s13   ;;  %s7715_s12 = sphi %s7758_s12, %s10213_s12  }
   0x9   : > { %p44_p0 = scmp.ne.s32.totalorder %s7719_s13, %s7715_s12  ;;  %p9948_p1 = scmp.eq.s32.totalorder %s7779_s16, 0 }
   0xa   : > { %p95_p3 = scmp.eq.s32.totalorder %s6249_s17, 1  ;;  %p6250_p5 = scmp.ge.s32.totalorder %s7727_s15, 1 }
   0xb   : > { %p7788_p4 = por %p9948_p1, %p44_p0  ;;  %p128_p7 = scmp.lt.s32.totalorder %s7727_s15, 3 }
   0xc   : > { %p7793_p6 = por %p95_p3, %p44_p0  ;;  %s7729_s21 = smov [#allocation6]  }
   0xd   : > { %s9955_s18 = scalar_select %p7788_p4, 1, 0 }
   0xe   : > { %s9956_s19 = scalar_select %p7793_p6, 1, 0 }
   0xf   : > { %p7798_p8 = pnand %p6250_p5, %p128_p7  ;;  %s140_s22 = sshll.u32 %s7729_s21, 4  ;;  %s141_s22 = int_to_ptr.vmem [resolvable:$true] %s140_s22 }
  0x10   : > { %s7812_s24 = sadd.s32 1, %s7727_s15   ;;  %s31_s25 = sadd.s32 1, %s7723_s14 }
  0x11   : > { %s9957_s20 = scalar_select %p7798_p8, 1, 0 }
  0x12   : > { %p7367_p9 = pneg %p7798_p8  ;;  %s28_s26 = ssub.s32 %s7727_s15, %s7812_s24 }
  0x13   : > { %s7586_s27 = scalar_lea.vmem %s141_s22, 9216  ;;  %p7594_p5 = scmp.lt.s32.totalorder %s141_s22, %s141_s22 }
  0x14   : > { %p7807_p11 = pnand %p7367_p9, %p9948_p1  ;;  %p7587_p13 = scmp.ne.s32.totalorder %s141_s22, %s7586_s27 }
  0x15   : > { %p7595_p7 = scmp.lt.s32.totalorder %s7586_s27, %s7586_s27 }
  0x16   : > { %p7577_p12 = pneg %p7807_p11 }
  0x17   : > { %p7596_p10 = por %p7595_p7, %p7594_p5 }
  0x18   : > { %p7589_p0 = pnand %p7587_p13, %p7577_p12 }
  0x1a   : > { %p7590_p3 = pneg %p7589_p0 }
  0x1c   : > { %p7597_p2 = pnand %p7596_p10, %p7590_p3 }
  0x1e   : > { %7600 = shalt.err (!%p7597_p2)
}
  0x1f   : > { %s7730_s28 = smov 64   ;;  %s7731_s29 = smov 4  }
  0x20   : > { %7370 = dma.hbm_to_vmem [thread:$0]  (!%p7807_p11), %s9945_s1, 9216, %s141_s22, [#allocation7], %s7730_s28, %s7730_s28, %s7731_s29  }
  0x21   : > { %p29_p2 = scmp.eq.s32.totalorder %s28_s26, 0  ;;  %p38_p9 = scmp.ne.s32.totalorder %s7723_s14, %s7719_s13 }
  0x22   : > { %p39_p10 = scmp.eq.s32.totalorder %s7727_s15, 0  ;;  %p7383_p12 = scmp.lt.s32.totalorder %s7727_s15, 2 }
  0x23   : > { %s7832_s5 = scalar_select %p29_p2, %s7723_s14, %s31_s25  }
  0x24   : > { %p40_p13 = por %p39_p10, %p38_p9  ;;  %p9959_p0 = scmp.eq.s32.totalorder %s7779_s16, 1 }
  0x25   : > { %s154_s7 = sand.u32 1, %s7723_s14   ;;  %s6564_s8 = sshll.u32 %s7727_s15, 11 }
  0x26   : > { %p7836_p3 = por %p9959_p0, %p38_p9  ;;  %s6253_s9 = sshll.u32 %s154_s7, 7 }
  0x27   : > { %s7845_s17 = scalar_lea.hbm %s9944_s0, %s6564_s8  ;;  %s158_s21 = scalar_lea.vmem [#allocation3], %s6253_s9 }
  0x28   : > { %s9960_s6 = scalar_select %p7836_p3, 1, 0 }
  0x29   : > { %s165_s22 = sshll.u32 %s158_s21, 4  ;;  %p7847_p11 = pnand %p7383_p12, %p40_p13  ;;  %s7851_s22 = int_to_ptr.vmem [resolvable:$true] %s165_s22 }
  0x2a   : > { %s7853_s25 = scalar_lea.sflag [#allocation4], %s154_s7  ;;  %s7601_s26 = scalar_lea.hbm %s7845_s17, 2048 }
  0x2b   : > { %p7602_p5 = scmp.ne.s32.totalorder %s7845_s17, %s7601_s26  ;;  %p7603_p7 = pneg %p7847_p11 }
  0x2c   : > { %s7606_s4 = scalar_lea.hbm %s9944_s0, 4096  ;;  %p7607_p10 = scmp.lt.s32.totalorder %s7845_s17, %s9944_s0 }
  0x2d   : > { %p7604_p2 = pnand %p7603_p7, %p7602_p5  ;;  %p7608_p12 = scmp.lt.s32.totalorder %s7606_s4, %s7601_s26 }
  0x2f   : > { %p7605_p9 = pneg %p7604_p2  ;;  %p7609_p13 = por %p7608_p12, %p7607_p10 }
  0x31   : > { %p7610_p0 = pnand %p7609_p13, %p7605_p9 }
  0x33   : > { %7613 = shalt.err (!%p7610_p0)
}
  0x34   : > { %s7614_s7 = scalar_lea.vmem %s7851_s22, 2048  ;;  %s7732_s10 = smov [#allocation3]  }
  0x35   : > { %p7615_p1 = scmp.ne.s32.totalorder %s7851_s22, %s7614_s7  ;;  %s7619_s11 = sshll.u32 %s7732_s10, 4  ;;  %s7620_s11 = int_to_ptr.vmem [resolvable:$false] %s7619_s11 }
  0x36   : > { %s7621_s21 = scalar_lea.vmem %s7620_s11, 4096  ;;  %p7622_p2 = scmp.lt.s32.totalorder %s7851_s22, %s7620_s11 }
  0x37   : > { %p7617_p6 = pnand %p7615_p1, %p7603_p7  ;;  %p7623_p3 = scmp.lt.s32.totalorder %s7621_s21, %s7614_s7 }
  0x39   : > { %p7618_p5 = pneg %p7617_p6  ;;  %p7624_p4 = por %p7623_p3, %p7622_p2 }
  0x3b   : > { %p7625_p8 = pnand %p7624_p4, %p7618_p5 }
  0x3d   : > { %7628 = shalt.err (!%p7625_p8)
}
  0x3e   : > { %7374 = dma.hbm_to_vmem [thread:$0]  (!%p7847_p11), %s7845_s17, 2048, %s7851_s22, %s7853_s25, %s7730_s28, %s7730_s28, %s7731_s29  }
  0x3f   : > { %p9962_p1 = scmp.ne.s32.totalorder %s9957_s20, 0 }
  0x41   : > { %177 = sbr.rel (%p9962_p1) target bundleno = 760 (0x2f8), region = 28 }
  0x46   : > { %s7880_s26 = sand.u32 1, %s7719_s13   ;;  %p9963_p4 = scmp.ne.s32.totalorder %s9955_s18, 0 }
  0x47   : > { %s6257_s27 = sshll.u32 %s7880_s26, 7  ;;  %s180_s30 = scalar_lea.sflag [#allocation4], %s7880_s26 }
  0x48   : > { %s7886_s23 = scalar_lea.vmem [#allocation3], %s6257_s27 }
  0x49   : > { %7698 = dma.done.wait (%p9963_p4), %s180_s30, 2048  }
  0x4a   : > { %7700 = vsyncadd (%p9963_p4), %s180_s30, 4294965248  ;;  %p9964_p6 = scmp.eq.s32.totalorder %s7779_s16, 0 }
  0x4c   : > { %7702 = dma.done.wait (%p9964_p6), [#allocation7], 9216   ;;  %p9965_p8 = pmov %p9964_p6 }
  0x4d   : > { %v7733_v0 = vmov 0   ;;  %v7424_v1 = vld [vmem:[#allocation6 + $0x78] sm:$0xff]   ;;  %v7425_v2 = vld [vmem:[#allocation6 + $0x70] sm:$0xff]   ;;  %v7426_v3 = vld [vmem:[#allocation6 + $0x68] sm:$0xff]   ;;  %vm290_vm0 = vsmask.f32 256 }
  0x4e   : > { %7704 = vsyncadd (%p9965_p8), [#allocation7], 4294958080  ;;  %287 = vst [vmem:[#allocation2 + $0x4] sm:$0xf] %v7733_v0  ;;  %6909 = vmatprep.subr.bf16.mxu0 %v7424_v1  ;;  %7341 = vmatprep.subr.bf16.mxu1 %v7424_v1  ;;  %v7427_v4 = vld [vmem:[#allocation6 + $0x60] sm:$0xff]   ;;  %v230_v7 = vld [vmem:[%s7886_s23 + $0x38] sm:$0xff]  }
  0x4f   : > { %288 = vst [vmem:[#allocation2 + $0x8] sm:$0xf] %v7733_v0  ;;  %299 = vst [vmem:[#allocation2 + $0x114] sm:$0xf] %v7733_v0  ;;  %6910 = vmatpush3.bf16.msra.mxu0 %v7424_v1  ;;  %7349 = vmatpush3.bf16.msra.mxu1 %v7424_v1  ;;  %v216_v8 = vld [vmem:[%s7886_s23] sm:$0xff]   ;;  %v7428_v12 = vld [vmem:[#allocation6 + $0x58] sm:$0xff]  }
  0x50   : > { %300 = vst [vmem:[#allocation2 + $0x118] sm:$0xf] %v7733_v0  ;;  %6911 = vmatprep.subr.bf16.mxu0 %v7425_v2  ;;  %7342 = vmatprep.subr.bf16.mxu1 %v7425_v2  ;;  %263 = vst [vmem:[#allocation2 + $0x84] sm:$0xff] %v230_v7   ;;  %v232_v9 = vld [vmem:[%s7886_s23 + $0x40] sm:$0xff]   ;;  %v7429_v14 = vld [vmem:[#allocation6 + $0x50] sm:$0xff]   ;;  %vm281_vm3 = vcmask 1043459  }
  0x51   : > { %249 = vst [vmem:[#allocation2 + $0x14] sm:$0xff] %v216_v8   ;;  %265 = vst [vmem:[#allocation2 + $0x94] sm:$0xff] %v232_v9   ;;  %v218_v15 = vld [vmem:[%s7886_s23 + $0x8] sm:$0xff]   ;;  %vm448_vm1 = vsmask.f32 4368  ;;  %v220_v18 = vld [vmem:[%s7886_s23 + $0x10] sm:$0xff]  }
  0x52   : > { %v234_v16 = vld [vmem:[%s7886_s23 + $0x48] sm:$0xff]   ;;  %251 = vst [vmem:[#allocation2 + $0x24] sm:$0xff] %v218_v15   ;;  %v236_v19 = vld [vmem:[%s7886_s23 + $0x50] sm:$0xff]   ;;  %253 = vst [vmem:[#allocation2 + $0x34] sm:$0xff] %v220_v18   ;;  %vm282_vm4 = vsmask.f32 7950 }
  0x53   : > { %6912 = vmatpush3.bf16.msra.mxu0 %v7425_v2  ;;  %7350 = vmatpush3.bf16.msra.mxu1 %v7425_v2  ;;  %267 = vst [vmem:[#allocation2 + $0xa4] sm:$0xff] %v234_v16   ;;  %269 = vst [vmem:[#allocation2 + $0xb4] sm:$0xff] %v236_v19   ;;  %v7430_v27 = vld [vmem:[#allocation6 + $0x48] sm:$0xff]   ;;  %v7933_v45 = vld [vmem:[#allocation6 + $0x40] sm:$0xff]   ;;  %vm289_vm5 = vcmask 1040384   ;;  %s9823_s18 = scalar_lea.vmem [#allocation8], %s6257_s27 }
  0x54   : > { %6913 = vmatprep.subr.bf16.mxu0 %v7426_v3  ;;  %7343 = vmatprep.subr.bf16.mxu1 %v7426_v3  ;;  %vm7949_vm2 = vmor %vm290_vm0, %vm448_vm1  ;;  %v222_v2 = vld [vmem:[%s7886_s23 + $0x18] sm:$0xff]   ;;  %vm1461_vm7 = vsmask.f32 3328  ;;  %vm1462_vm8 = vsmask.f32 7440  ;;  %s6597_s20 = sshll.u32 %s7779_s16, 11 }
  0x55   : > { %v7896_v5 = vld [vmem:[#allocation2 + $0x4] sm:$0xf]  ;;  %255 = vst [vmem:[#allocation2 + $0x44] sm:$0xff] %v222_v2   ;;  %vm8233_vm6 = vmand %vm281_vm3, %vm282_vm4  ;;  %s6121_s28 = sshll.u32 %s9823_s18, 4  ;;  %s9872_s22 = scalar_lea.hbm %s9946_s2, %s6597_s20  ;;  %s9874_s28 = int_to_ptr.vmem [resolvable:$true] %s6121_s28 }
  0x56   : > { %v402_v6 = vld [vmem:[#allocation2 + $0x8] sm:$0xf]  ;;  %v456_v11 = vshrl.u32 %v7896_v5, 16  ;;  %v459_v28 = vshll.u32 %v7896_v5, 16  ;;  %vm8255_vm9 = vmand %vm289_vm5, %vm290_vm0  ;;  %s6103_s25 = scalar_lea.sflag [#allocation5], %s7880_s26  ;;  %s7629_s4 = scalar_lea.vmem %s9874_s28, 2048 }
  0x57   : > { %v6277_v10 = vcombine.low %v7896_v5, %v402_v6  ;;  %6914 = vmatpush3.bf16.msra.mxu0 %v7426_v3  ;;  %7351 = vmatpush3.bf16.msra.mxu1 %v7426_v3  ;;  %v465_v13 = vshrl.u32 %v402_v6, 16  ;;  %v7909_v20 = vld [vmem:[#allocation2 + $0x84] sm:$0xf]  ;;  %v426_v21 = vld [vmem:[#allocation2 + $0x88] sm:$0xf]  ;;  %v468_v23 = vshll.u32 %v402_v6, 16  ;;  %vm8315_vm10 = vmor %vm1461_vm7, %vm1462_vm8  ;;  %p7630_p3 = scmp.ne.s32.totalorder %s9874_s28, %s7629_s4 }
  0x58   : > { %6915 = vmatprep.subr.bf16.mxu0 %v7427_v4  ;;  %7344 = vmatprep.subr.bf16.mxu1 %v7427_v4  ;;  %v7905_v17 = vrot.slane %v456_v11, 7  ;;  %v632_v24 = vshrl.u32 %v7909_v20, 16  ;;  %v641_v25 = vshrl.u32 %v426_v21, 16  ;;  %v7912_v26 = vld [vmem:[#allocation2 + $0x14] sm:$0xf]  ;;  %v6285_v29 = vcombine.low %v7909_v20, %v426_v21  ;;  %v7970_v5 = vld [vmem:[#allocation6 + $0x38] sm:$0xff]  }
  0x59   : > { %6925 = vmatprep.mubr.bf16.mxu0 %v6277_v10  ;;  %v467_v22 = vrot.slane %v465_v13, 7  ;;  %v7916_v30 = vld [vmem:[#allocation2 + $0x18] sm:$0xf]  ;;  %v478_v31 = vshrl.u32 %v7912_v26, 16  ;;  %v635_v34 = vshll.u32 %v7909_v20, 16  ;;  %v644_v37 = vshll.u32 %v426_v21, 16 }
  0x5a   : > { %v463_v32 = vrot.slane %v7905_v17, 4  ;;  %v7920_v33 = vrot.slane %v632_v24, 7  ;;  %v487_v35 = vshrl.u32 %v7916_v30, 16  ;;  %v7924_v36 = vld [vmem:[#allocation2 + $0x94] sm:$0xf]  ;;  %v481_v39 = vshll.u32 %v7912_v26, 16  ;;  %6941 = vmatprep.mubr.bf16.mxu1 %v6285_v29 }
  0x5b   : > { %6916 = vmatpush3.bf16.msra.mxu0 %v7427_v4  ;;  %7352 = vmatpush3.bf16.msra.mxu1 %v7427_v4  ;;  %v7926_v38 = vrot.slane %v478_v31, 7  ;;  %v654_v40 = vshrl.u32 %v7924_v36, 16  ;;  %v470_v41 = vor.u32 %v468_v23, %v467_v22  ;;  %v643_v42 = vrot.slane %v641_v25, 7  ;;  %v7931_v44 = vld [vmem:[#allocation2 + $0x98] sm:$0xf]  ;;  %v224_v23 = vld [vmem:[%s7886_s23 + $0x20] sm:$0xff]  }
  0x5c   : > { %6917 = vmatprep.subr.bf16.mxu0 %v7428_v12  ;;  %7345 = vmatprep.subr.bf16.mxu1 %v7428_v12  ;;  %v490_v43 = vshll.u32 %v7916_v30, 16  ;;  %v639_v46 = vrot.slane %v7920_v33, 4  ;;  %v489_v47 = vrot.slane %v487_v35, 7  ;;  %v657_v48 = vshll.u32 %v7924_v36, 16  ;;  %v7938_v50 = vld [vmem:[#allocation2 + $0x24] sm:$0xf] }
  0x5d   : > { %v663_v49 = vshrl.u32 %v7931_v44, 16  ;;  %v485_v51 = vrot.slane %v7926_v38, 4  ;;  %v7941_v52 = vrot.slane %v654_v40, 7  ;;  %v666_v53 = vshll.u32 %v7931_v44, 16  ;;  %v7944_v54 = vld [vmem:[#allocation2 + $0x28] sm:$0xf] }
  0x5e   : > { %v500_v55 = vshrl.u32 %v7938_v50, 16  ;;  %v503_v58 = vshll.u32 %v7938_v50, 16  ;;  %v509_v59 = vshrl.u32 %v7944_v54, 16  ;;  %v512_v60 = vshll.u32 %v7944_v54, 16  ;;  %v7958_v61 = vld [vmem:[#allocation2 + $0xa4] sm:$0xf] }
  0x5f   : > { %6918 = vmatpush3.bf16.msra.mxu0 %v7428_v12  ;;  %7353 = vmatpush3.bf16.msra.mxu1 %v7428_v12  ;;  %v7953_v57 = vrot.slane %v663_v49, 7  ;;  %v7962_v63 = vld [vmem:[#allocation2 + $0xa8] sm:$0xf]  ;;  %v676_v0 = vshrl.u32 %v7958_v61, 16  ;;  %v679_v1 = vshll.u32 %v7958_v61, 16  ;;  %v7968_v3 = vor.u32 %v459_v28, %v7905_v17  ;;  %v7437_v6 = vld [vmem:[#allocation6 + $0xb8] sm:$0xff]  }
  0x60   : > { %6919 = vmatprep.subr.bf16.mxu0 %v7429_v14  ;;  %7346 = vmatprep.subr.bf16.mxu1 %v7429_v14  ;;  %v7960_v62 = vrot.slane %v500_v55, 7  ;;  %v646_v4 = vor.u32 %v644_v37, %v643_v42  ;;  %v685_v7 = vshrl.u32 %v7962_v63, 16  ;;  %v7973_v8 = vld [vmem:[#allocation2 + $0x34] sm:$0xf]  ;;  %v7975_v9 = vld [vmem:[#allocation2 + $0x38] sm:$0xf]  ;;  %v7980_v11 = vsel %vm7949_vm2, %v463_v32, %v470_v41 }
  0x61   : > { %v238_v10 = vld [vmem:[%s7886_s23 + $0x58] sm:$0xff]   ;;  %v511_v12 = vrot.slane %v509_v59, 7  ;;  %v688_v13 = vshll.u32 %v7962_v63, 16  ;;  %v531_v15 = vshrl.u32 %v7975_v9, 16  ;;  %v7985_v16 = vld [vmem:[#allocation2 + $0xb4] sm:$0xf]  ;;  %v492_v17 = vor.u32 %v490_v43, %v489_v47 }
  0x62   : > { %271 = vst [vmem:[#allocation2 + $0xc4] sm:$0xff] %v238_v10   ;;  %v7989_v18 = vrot.slane %v676_v0, 7  ;;  %v525_v19 = vshll.u32 %v7973_v8, 16  ;;  %v7992_v21 = vld [vmem:[#allocation2 + $0xb8] sm:$0xf]  ;;  %v698_v22 = vshrl.u32 %v7985_v16, 16  ;;  %v6278_v29 = vcombine.low %v7912_v26, %v7916_v30 }
  0x63   : > { %6920 = vmatpush3.bf16.msra.mxu0 %v7429_v14  ;;  %7354 = vmatpush3.bf16.msra.mxu1 %v7429_v14  ;;  %v522_v14 = vshrl.u32 %v7973_v8, 16  ;;  %v7996_v24 = vrot.slane %v685_v7, 7  ;;  %v707_v28 = vshrl.u32 %v7992_v21, 16  ;;  %257 = vst [vmem:[#allocation2 + $0x54] sm:$0xff] %v224_v23   ;;  %v6286_v31 = vcombine.low %v7924_v36, %v7931_v44  ;;  %v8006_v32 = vld [vmem:[#allocation6 + $0x30] sm:$0xff]   ;;  %v240_v47 = vld [vmem:[%s7886_s23 + $0x60] sm:$0xff]  }
  0x64   : > { %6921 = vmatprep.subr.bf16.mxu0 %v7430_v27  ;;  %7347 = vmatprep.subr.bf16.mxu1 %v7430_v27  ;;  %v7439_v35 = vld [vmem:[#allocation6 + $0xb0] sm:$0xff]   ;;  %v533_v37 = vrot.slane %v531_v15, 7  ;;  %v701_v40 = vshll.u32 %v7985_v16, 16  ;;  %v8014_v41 = vor.u32 %v635_v34, %v7920_v33  ;;  %v8019_v30 = vor.u32 %v481_v39, %v7926_v38  ;;  %273 = vst [vmem:[#allocation2 + $0xd4] sm:$0xff] %v240_v47   ;;  %v8042_v55 = vld [vmem:[#allocation2 + $0x44] sm:$0xf] }
  0x65   : > { %v7998_v25 = vrot.slane %v522_v14, 7  ;;  %v6279_v42 = vcombine.low %v7938_v50, %v7944_v54  ;;  %v8023_v43 = vrot.slane %v698_v22, 7  ;;  %v8029_v20 = vrot.slane %v707_v28, 7  ;;  %v8044_v59 = vld [vmem:[#allocation2 + $0x48] sm:$0xf]  ;;  %v8092_v28 = vld [vmem:[#allocation6 + $0x20] sm:$0xff]  }
  0x66   : > { %v710_v34 = vshll.u32 %v7992_v21, 16  ;;  %v8036_v26 = vsel %vm7949_vm2, %v639_v46, %v646_v4  ;;  %v6280_v39 = vcombine.low %v7973_v8, %v7975_v9  ;;  %v6288_v49 = vcombine.low %v7985_v16, %v7992_v21  ;;  %v8057_v46 = vld [vmem:[#allocation6 + $0x28] sm:$0xff]   ;;  %p10210_p11 = scmp.ne.s32.totalorder %s9960_s6, 0  ;;  %s7734_s8 = smov [#allocation8]  }
  0x67   : > { %6922 = vmatpush3.bf16.msra.mxu0 %v7430_v27  ;;  %7355 = vmatpush3.bf16.msra.mxu1 %v7430_v27  ;;  %v534_v27 = vshll.u32 %v7975_v9, 16  ;;  %v8050_v0 = vsel %vm7949_vm2, %v485_v51, %v492_v17  ;;  %v8055_v33 = vor.u32 %v503_v58, %v7960_v62  ;;  %v544_v2 = vshrl.u32 %v8042_v55, 16  ;;  %v7445_v50 = vld [vmem:[#allocation6 + $0xa8] sm:$0xff]   ;;  %s7633_s9 = sshll.u32 %s7734_s8, 4  ;;  %s7634_s9 = int_to_ptr.vmem [resolvable:$false] %s7633_s9 }
  0x68   : > { %6923 = vmatprep.subr.bf16.mxu0 %v7933_v45  ;;  %7348 = vmatprep.subr.bf16.mxu1 %v7933_v45  ;;  %v553_v4 = vshrl.u32 %v8044_v59, 16  ;;  %v8065_v38 = vor.u32 %v512_v60, %v511_v12  ;;  %v8068_v51 = vor.u32 %v525_v19, %v7998_v25  ;;  %v547_v58 = vshll.u32 %v8042_v55, 16  ;;  %v226_v47 = vld [vmem:[%s7886_s23 + $0x28] sm:$0xff]   ;;  %p7631_p7 = pnand %p7630_p3, %p10210_p11  ;;  %s7635_s7 = scalar_lea.vmem %s7634_s9, 4096 }
  0x69   : > { %v8061_v7 = vld [vmem:[#allocation2 + $0xc4] sm:$0xf]  ;;  %v8072_v10 = vld [vmem:[#allocation2 + $0xc8] sm:$0xf]  ;;  %v507_v15 = vrot.slane %v7960_v62, 4  ;;  %v8076_v17 = vor.u32 %v534_v27, %v533_v37  ;;  %v8079_v54 = vrot.slane %v544_v2, 7  ;;  %v8119_v36 = vor.u32 %v679_v1, %v7989_v18  ;;  %p7636_p10 = scmp.lt.s32.totalorder %s9874_s28, %s7634_s9  ;;  %p7637_p12 = scmp.lt.s32.totalorder %s7635_s7, %s7629_s4 }
  0x6a   : > { %v720_v14 = vshrl.u32 %v8061_v7, 16  ;;  %v556_v60 = vshll.u32 %v8044_v59, 16  ;;  %v8084_v12 = vld [vmem:[#allocation2 + $0x54] sm:$0xf]  ;;  %v555_v19 = vrot.slane %v553_v4, 7  ;;  %v732_v22 = vshll.u32 %v8072_v10, 16  ;;  %p7632_p9 = pneg %p7631_p7 }
  0x6b   : > { %6924 = vmatpush3.bf16.msra.mxu0 %v7933_v45  ;;  %7356 = vmatpush3.bf16.msra.mxu1 %v7933_v45  ;;  %v6287_v45 = vcombine.low %v7958_v61, %v7962_v63  ;;  %v8089_v23 = vld [vmem:[#allocation2 + $0x58] sm:$0xf]  ;;  %v566_v27 = vshrl.u32 %v8084_v12, 16  ;;  %v569_v37 = vshll.u32 %v8084_v12, 16  ;;  %v8106_v4 = vld [vmem:[#allocation2 + $0xd4] sm:$0xf]  ;;  %v6289_v61 = vcombine.low %v8061_v7, %v8072_v10  ;;  %p7638_p13 = por %p7637_p12, %p7636_p10 }
  0x6c   : > { %6957 = vmatprep.subr.bf16.mxu1 %v7970_v5  ;;  %7005 = vmatprep.subr.bf16.mxu0 %v7437_v6  ;;  %v8086_v62 = vrot.slane %v720_v14, 7  ;;  %v578_v2 = vshll.u32 %v8089_v23, 16  ;;  %v8108_v14 = vld [vmem:[#allocation2 + $0xd8] sm:$0xf]  ;;  %259 = vst [vmem:[#allocation2 + $0x64] sm:$0xff] %v226_v47   ;;  %v742_v44 = vshrl.u32 %v8106_v4, 16  ;;  %v6282_v8 = vcombine.low %v8084_v12, %v8089_v23 }
  0x6d   : > { %v745_v63 = vshll.u32 %v8106_v4, 16  ;;  %v228_v1 = vld [vmem:[%s7886_s23 + $0x30] sm:$0xff]   ;;  %v8163_v9 = vor.u32 %v547_v58, %v8079_v54  ;;  %v558_v16 = vor.u32 %v556_v60, %v555_v19  ;;  %p7639_p0 = pnand %p7638_p13, %p7632_p9 }
  0x6e   : > { %6926 = vmatmul.mubr.bf16.vlgmr.msra.gmra.mxu0 %v6278_v29  ;;  %6942 = vmatmul.mubr.bf16.vlgmr.msra.gmra.mxu1 %v6286_v31  ;;  %v8094_v29 = vld [vmem:[#allocation6 + $0xa0] sm:$0xff]   ;;  %261 = vst [vmem:[#allocation2 + $0x74] sm:$0xff] %v228_v1   ;;  %v8188_v12 = vld [vmem:[#allocation6 + $0x10] sm:$0xff]  }
  0x6f   : > { %6958 = vmatpush3.bf16.msra.mxu1 %v7970_v5  ;;  %7006 = vmatpush3.bf16.msra.mxu0 %v7437_v6  ;;  %v729_v6 = vshrl.u32 %v8072_v10, 16  ;;  %v8114_v5 = vor.u32 %v666_v53, %v7953_v57  ;;  %v751_v53 = vshrl.u32 %v8108_v14, 16  ;;  %v6281_v57 = vcombine.low %v8042_v55, %v8044_v59  ;;  %v8190_v19 = vld [vmem:[#allocation6 + $0x90] sm:$0xff]  }
  0x70   : > { %6959 = vmatprep.subr.bf16.mxu1 %v8006_v32  ;;  %7007 = vmatprep.subr.bf16.mxu0 %v7439_v35  ;;  %v754_v10 = vshll.u32 %v8108_v14, 16  ;;  %v8176_v55 = vor.u32 %v710_v34, %v8029_v20 }
  0x71   : > { %6929 = vmatprep.mubr.bf16.mxu0 %v6279_v42  ;;  %6945 = vmatprep.mubr.bf16.mxu1 %v6287_v45  ;;  %v731_v31 = vrot.slane %v729_v6, 7  ;;  %v575_v42 = vshrl.u32 %v8089_v23, 16  ;;  %v8102_v45 = vor.u32 %v657_v48, %v7941_v52  ;;  %v242_v6 = vld [vmem:[%s7886_s23 + $0x68] sm:$0xff]   ;;  %v8124_v48 = vor.u32 %v688_v13, %v7996_v24 }
  0x72   : > { %275 = vst [vmem:[#allocation2 + $0xe4] sm:$0xff] %v242_v6   ;;  %v8140_v13 = vor.u32 %v701_v40, %v8023_v43  ;;  %v8148_v24 = vrot.slane %v742_v44, 7  ;;  %v753_v59 = vrot.slane %v751_v53, 7  ;;  %v8155_v40 = vsel %vm7949_vm2, %v507_v15, %v8065_v38 }
  0x73   : > { %6960 = vmatpush3.bf16.msra.mxu1 %v8006_v32  ;;  %7008 = vmatpush3.bf16.msra.mxu0 %v7439_v35  ;;  %v8127_v32 = vrot.slane %v566_v27, 7  ;;  %v577_v35 = vrot.slane %v575_v42, 7  ;;  %v7452_v27 = vld [vmem:[#allocation6 + $0x18] sm:$0xff]   ;;  %v244_v42 = vld [vmem:[%s7886_s23 + $0x70] sm:$0xff]   ;;  %v9970_v15 = vshll.u32 %v8061_v7, 16 }
  0x74   : > { %6961 = vmatprep.subr.bf16.mxu1 %v8057_v46  ;;  %7009 = vmatprep.subr.bf16.mxu0 %v7445_v50  ;;  %9968 = vst [vmem:[#allocation15_spill] sm:$0xff] %v8140_v13  ;;  %9969 = vst [vmem:[#allocation16_spill] sm:$0xff] %v8148_v24  ;;  %v8192_v21 = vld [vmem:[#allocation2 + $0x64] sm:$0xf]  ;;  %v8194_v20 = vld [vmem:[#allocation2 + $0x68] sm:$0xf]  ;;  %v8203_v7 = vor.u32 %v745_v63, %v8148_v24 }
  0x75   : > { %277 = vst [vmem:[#allocation2 + $0xf4] sm:$0xff] %v244_v42   ;;  %v8171_v38 = vor.u32 %v569_v37, %v8127_v32  ;;  %v8179_v58 = vor.u32 %v578_v2, %v577_v35  ;;  %v8184_v60 = vor.u32 %v9970_v15, %v8086_v62  ;;  %v588_v23 = vshrl.u32 %v8192_v21, 16 }
  0x76   : > { %6930 = vmatmul.mubr.bf16.gmra.mxu0 %v6280_v39  ;;  %6946 = vmatmul.mubr.bf16.gmra.mxu1 %v6288_v49  ;;  %v6290_v39 = vcombine.low %v8106_v4, %v8108_v14  ;;  %v7453_v49 = vld [vmem:[#allocation6 + $0x98] sm:$0xff]   ;;  %9972 = vst [vmem:[#allocation18_spill] sm:$0xff] %v8203_v7  ;;  %v597_v37 = vshrl.u32 %v8194_v20, 16  ;;  %v6283_v2 = vcombine.low %v8192_v21, %v8194_v20  ;;  %v284_v14 = vld [vmem:[#allocation2] sm:$0x8]  ;;  %v9982_v24 = vshll.u32 %v8194_v20, 16 }
  0x77   : > { %6962 = vmatpush3.bf16.msra.mxu1 %v8057_v46  ;;  %7010 = vmatpush3.bf16.msra.mxu0 %v7445_v50  ;;  %v529_v46 = vrot.slane %v7998_v25, 4  ;;  %v551_v50 = vrot.slane %v8079_v54, 4  ;;  %9971 = vst [vmem:[#allocation17_spill] sm:$0xff] %v8184_v60  ;;  %v8186_v25 = vor.u32 %v732_v22, %v731_v31  ;;  %v8205_v22 = vor.u32 %v754_v10, %v753_v59  ;;  %v8241_v10 = vld [vmem:[#allocation2 + $0x78] sm:$0xf]  ;;  %v7462_v7 = vld [vmem:[#allocation6] sm:$0xff]  }
  0x78   : > { %6963 = vmatprep.subr.bf16.mxu1 %v8092_v28  ;;  %7011 = vmatprep.subr.bf16.mxu0 %v8094_v29  ;;  %v591_v31 = vshll.u32 %v8192_v21, 16  ;;  %v8225_v35 = vrot.slane %v588_v23, 7  ;;  %v599_v44 = vrot.slane %v597_v37, 7  ;;  %v619_v15 = vshrl.u32 %v8241_v10, 16  ;;  %v7461_v23 = vld [vmem:[#allocation6 + $0x88] sm:$0xff]   ;;  %v7463_v60 = vld [vmem:[#allocation6 + $0x80] sm:$0xff]  }
  0x79   : > { %6933 = vmatprep.mubr.bf16.mxu0 %v6281_v57  ;;  %6949 = vmatprep.mubr.bf16.mxu1 %v6289_v61  ;;  %v8199_v34 = vsel %vm7949_vm2, %v529_v46, %v8076_v17  ;;  %9973 = vst [vmem:[#allocation19_spill] sm:$0xff] %v8205_v22  ;;  %v8213_v47 = vld [vmem:[#allocation2 + $0xe4] sm:$0xf]  ;;  %v8217_v4 = vld [vmem:[#allocation2 + $0xe8] sm:$0xf]  ;;  %v8223_v6 = vsel %vm7949_vm2, %v551_v50, %v558_v16  ;;  %v9976_v37 = vmov 0 }
  0x7a   : > { %v773_v53 = vshrl.u32 %v8217_v4, 16  ;;  %v8229_v61 = vld [vmem:[#allocation2 + $0x74] sm:$0xf]  ;;  %v6291_v59 = vcombine.low %v8213_v47, %v8217_v4  ;;  %v7460_v46 = vld [vmem:[#allocation6 + $0x8] sm:$0xff]   ;;  %v9977_v37 = vsel %vm8255_vm9, 4294967295, %v9976_v37 }
  0x7b   : > { %6964 = vmatpush3.bf16.msra.mxu1 %v8092_v28  ;;  %7012 = vmatpush3.bf16.msra.mxu0 %v8094_v29  ;;  %v764_v28 = vshrl.u32 %v8213_v47, 16  ;;  %v610_v42 = vshrl.u32 %v8229_v61, 16  ;;  %v613_v16 = vshll.u32 %v8229_v61, 16  ;;  %9978 = vst [vmem:[#allocation20_spill] sm:$0xff] %v9977_v37  ;;  %v292_v17 = vld [vmem:[#allocation2 + $0xc] sm:$0x1]  ;;  %v8285_v29 = vor.u32 %v591_v31, %v8225_v35 }
  0x7c   : > { %6965 = vmatprep.subr.bf16.mxu1 %v7452_v27  ;;  %7013 = vmatprep.subr.bf16.mxu0 %v7453_v49  ;;  %v8245_v50 = vrot.slane %v773_v53, 7  ;;  %v8251_v21 = vld [vmem:[#allocation2 + $0xf4] sm:$0xf]  ;;  %v293_v53 = vsel %vm8255_vm9, 0, %v292_v17  ;;  %v304_v22 = vld [vmem:[#allocation2 + $0x10] sm:$0x8] }
  0x7d   : > { %v8237_v1 = vrot.slane %v764_v28, 7  ;;  %v786_v28 = vshrl.u32 %v8251_v21, 16  ;;  %294 = vst [vmem:[#allocation2 + $0xc] sm:$0x1] %v293_v53  ;;  %v1416_v31 = vld [vmem:[#allocation2 + $0x14] sm:$0xf] }
  0x7e   : > { %6934 = vmatmul.mubr.bf16.gmra.mxu0 %v6282_v8  ;;  %6950 = vmatmul.mubr.bf16.gmra.mxu1 %v6290_v39  ;;  %v622_v8 = vshll.u32 %v8241_v10, 16  ;;  %v6284_v39 = vcombine.low %v8229_v61, %v8241_v10  ;;  %v285_v61 = vsel %vm8233_vm6, 0, %v284_v14  ;;  %v621_v10 = vrot.slane %v619_v15, 7  ;;  %v1413_v14 = vld [vmem:[#allocation2 + $0x4] sm:$0xf] }
  0x7f   : > { %6966 = vmatpush3.bf16.msra.mxu1 %v7452_v27  ;;  %7014 = vmatpush3.bf16.msra.mxu0 %v7453_v49  ;;  %v8261_v27 = vrot.slane %v610_v42, 7  ;;  %v8263_v49 = vld [vmem:[#allocation2 + $0xf8] sm:$0xf]  ;;  %286 = vst [vmem:[#allocation2] sm:$0x8] %v285_v61  ;;  %v8273_v54 = vrot.slane %v786_v28, 7 }
  0x80   : > { %6967 = vmatprep.subr.bf16.mxu1 %v8188_v12  ;;  %7015 = vmatprep.subr.bf16.mxu0 %v8190_v19  ;;  %9979 = vst [vmem:[#allocation21_spill] sm:$0xff] %v8263_v49  ;;  %v795_v57 = vshrl.u32 %v8263_v49, 16  ;;  %v6292_v42 = vcombine.low %v8251_v21, %v8263_v49  ;;  %v1465_v17 = vshrl.u32 %v1413_v14, 16  ;;  %v1468_v61 = vshll.u32 %v1413_v14, 16 }
  0x81   : > { %6937 = vmatprep.mubr.bf16.mxu0 %v6283_v2  ;;  %6953 = vmatprep.mubr.bf16.mxu1 %v6291_v59  ;;  %v1414_v2 = vld [vmem:[#allocation2 + $0x8] sm:$0xf]  ;;  %v9980_v59 = vrot.slane %v8127_v32, 4  ;;  %v1489_v13 = vshrl.u32 %v1416_v31, 16  ;;  %v1492_v20 = vshll.u32 %v1416_v31, 16  ;;  %v9987_v31 = vshll.u32 %v8217_v4, 16 }
  0x82   : > { %v8289_v28 = vrot.slane %v795_v57, 7  ;;  %v1474_v49 = vshll.u32 %v1414_v2, 16  ;;  %v1478_v32 = vshrl.u32 %v1414_v2, 16  ;;  %v1467_v57 = vrot.slane %v1465_v17, 4  ;;  %v8304_v17 = vld [vmem:[#allocation6 + $0xf8] sm:$0xff]  }
  0x83   : > { %v8282_v15 = vsel %vm7949_vm2, %v9980_v59, %v8179_v58  ;;  %6968 = vmatpush3.bf16.msra.mxu1 %v8188_v12  ;;  %7016 = vmatpush3.bf16.msra.mxu0 %v8190_v19  ;;  %v305_v58 = vsel %vm8233_vm6, 0, %v304_v22  ;;  %v352_v59 = vld [vmem:[#allocation2 + $0x1c] sm:$0x1]  ;;  %v8295_v12 = vor.u32 %v9982_v24, %v599_v44  ;;  %v8298_v19 = vor.u32 %v613_v16, %v8261_v27 }
  0x84   : > { %9981 = vst [vmem:[#allocation22_spill] sm:$0xff] %v8289_v28  ;;  %6969 = vmatprep.subr.bf16.mxu1 %v7460_v46  ;;  %7017 = vmatprep.subr.bf16.mxu0 %v7461_v23  ;;  %v1470_v53 = vrot.slane %v1468_v61, 5  ;;  %v8300_v14 = vrot.slane %v1474_v49, 5  ;;  %306 = vst [vmem:[#allocation2 + $0x10] sm:$0x8] %v305_v58  ;;  %v353_v2 = vsel %vm8255_vm9, 0, %v352_v59  ;;  %v8306_v49 = vor.u32 %v622_v8, %v621_v10 }
  0x85   : > { %v1417_v28 = vld [vmem:[#allocation2 + $0x18] sm:$0xf]  ;;  %v1480_v22 = vrot.slane %v1478_v32, 4  ;;  %354 = vst [vmem:[#allocation2 + $0x1c] sm:$0x1] %v353_v2  ;;  %v9983_v61 = vshll.u32 %v8213_v47, 16 }
  0x86   : > { %6938 = vmatmul.mubr.bf16.gmra.mxu0 %v6284_v39  ;;  %6954 = vmatmul.mubr.bf16.gmra.mxu1 %v6292_v42  ;;  %v1498_v24 = vshll.u32 %v1417_v28, 16  ;;  %v1471_v44 = vor.u32 %v1470_v53, %v1467_v57  ;;  %v1502_v16 = vshrl.u32 %v1417_v28, 16  ;;  %v400_v39 = vld [vmem:[#allocation2] sm:$0x8]  ;;  %v1494_v28 = vrot.slane %v1492_v20, 5  ;;  %v8322_v10 = vld [vmem:[#allocation6 + $0x138] sm:$0xff]  }
  0x87   : > { %6970 = vmatpush3.bf16.msra.mxu1 %v7460_v46  ;;  %7018 = vmatpush3.bf16.msra.mxu0 %v7461_v23  ;;  %v8311_v58 = vor.u32 %v9983_v61, %v8237_v1  ;;  %v1481_v46 = vor.u32 %v1480_v22, %v8300_v14  ;;  %v1491_v23 = vrot.slane %v1489_v13, 4  ;;  %v451_v47 = vshrl.u32 %v400_v39, 16  ;;  %v1415_v53 = vld [vmem:[#allocation2 + $0xc] sm:$0x1]  ;;  %v1419_v39 = vld [vmem:[#allocation2 + $0x24] sm:$0xf] }
  0x88   : > { %6971 = vmatprep.subr.bf16.mxu1 %v7462_v7  ;;  %7019 = vmatprep.subr.bf16.mxu0 %v7463_v60  ;;  %v8320_v8 = vrot.slane %v1498_v24, 5  ;;  %v1472_v32 = vrot.slane %v1471_v44, 4  ;;  %v1504_v59 = vrot.slane %v1502_v16, 4  ;;  %v8327_v57 = vor.u32 %v9987_v31, %v8245_v50  ;;  %v355_v16 = vld [vmem:[#allocation2 + $0x2c] sm:$0x1] }
  0x89   : > { %9984 = vst [vmem:[#allocation23_spill] sm:$0xff] %v8311_v58  ;;  %v1482_v2 = vrot.slane %v1481_v46, 4  ;;  %v1495_v61 = vor.u32 %v1494_v28, %v1491_v23  ;;  %v307_v58 = vld [vmem:[#allocation2 + $0x20] sm:$0x8]  ;;  %v9988_v13 = vshll.u32 %v8251_v21, 16  ;;  %v6261_v24 = vrot.slane %v451_v47, 11 }
  0x8a   : > { %v1477_v4 = vsel %vm8315_vm10, %v1472_v32, %v8300_v14  ;;  %v1484_v50 = vshll.u32 %v1415_v53, 16  ;;  %v1505_v44 = vor.u32 %v1504_v59, %v8320_v8  ;;  %v1513_v21 = vshrl.u32 %v1419_v39, 16 }
  0x8b   : > { %v8333_v20 = vor.u32 %v9988_v13, %v8273_v54  ;;  %6972 = vmatpush3.bf16.msra.mxu1 %v7462_v7  ;;  %7020 = vmatpush3.bf16.msra.mxu0 %v7463_v60  ;;  %v403_v46 = vld [vmem:[#allocation2 + $0x10] sm:$0x8]  ;;  %v1496_v23 = vrot.slane %v1495_v61, 4  ;;  %v308_v7 = vsel %vm8233_vm6, 0, %v307_v58  ;;  %v356_v60 = vsel %vm8255_vm9, 0, %v355_v16 }
  0x8c   : > { %7053 = vmatprep.subr.bf16.mxu1 %v8304_v17  ;;  %7101 = vmatprep.subr.bf16.mxu0 %v8322_v10  ;;  %v462_v14 = vsel %vm7949_vm2, %v6261_v24, %v7968_v3  ;;  %v1486_v28 = vrot.slane %v1484_v50, 5  ;;  %v473_v47 = vshrl.u32 %v403_v46, 16  ;;  %v1418_v32 = vld [vmem:[#allocation2 + $0x1c] sm:$0x1]  ;;  %v1506_v59 = vrot.slane %v1505_v44, 4 }
  0x8d   : > { %9989 = vst [vmem:[#allocation24_spill] sm:$0xff] %v8333_v20  ;;  %309 = vst [vmem:[#allocation2 + $0x20] sm:$0x8] %v308_v7  ;;  %v6301_v31 = vcombine.low %v462_v14, %v7980_v11  ;;  %v1501_v58 = vsel %vm8315_vm10, %v1496_v23, %v8320_v8  ;;  %v1508_v53 = vshll.u32 %v1418_v32, 16  ;;  %v1420_v61 = vld [vmem:[#allocation2 + $0x28] sm:$0xf] }
  0x8e   : > { %357 = vst [vmem:[#allocation2 + $0x2c] sm:$0x1] %v356_v60  ;;  %v1515_v13 = vrot.slane %v1513_v21, 4  ;;  %v310_v16 = vld [vmem:[#allocation2 + $0x30] sm:$0x8]  ;;  %v1487_v22 = vsel %vm8315_vm10, %v1482_v2, %v1486_v28  ;;  %v6262_v3 = vrot.slane %v473_v47, 11 }
  0x8f   : > { %v1516_v24 = vshll.u32 %v1419_v39, 16  ;;  %v1522_v50 = vshll.u32 %v1420_v61, 16  ;;  %v358_v46 = vld [vmem:[#allocation2 + $0x3c] sm:$0x1]  ;;  %6973 = vmatprep.mubr.bf16.mxu1 %v6301_v31  ;;  %v6325_v44 = vcombine.low %v1477_v4, %v1487_v22  ;;  %v1510_v7 = vrot.slane %v1508_v53, 5  ;;  %v7466_v8 = vld [vmem:[#allocation6 + $0xf0] sm:$0xff]  }
  0x90   : > { %v1526_v60 = vshrl.u32 %v1420_v61, 16  ;;  %v311_v11 = vsel %vm8233_vm6, 0, %v310_v16  ;;  %v1422_v14 = vld [vmem:[#allocation2 + $0x34] sm:$0xf]  ;;  %v484_v23 = vsel %vm7949_vm2, %v6262_v3, %v8019_v30  ;;  %v359_v2 = vsel %vm8255_vm9, 0, %v358_v46  ;;  %v8364_v20 = vld [vmem:[#allocation6 + $0xe8] sm:$0xff]  }
  0x91   : > { %v1518_v21 = vrot.slane %v1516_v24, 5  ;;  %v1524_v32 = vrot.slane %v1522_v50, 5  ;;  %312 = vst [vmem:[#allocation2 + $0x30] sm:$0x8] %v311_v11  ;;  %v1423_v39 = vld [vmem:[#allocation2 + $0x38] sm:$0xf]  ;;  %7021 = vmatprep.mubr.bf16.mxu0 %v6325_v44  ;;  %v6302_v22 = vcombine.low %v484_v23, %v8050_v0  ;;  %v1511_v4 = vsel %vm8315_vm10, %v1506_v59, %v1510_v7 }
  0x92   : > { %v7467_v28 = vld [vmem:[#allocation6 + $0x130] sm:$0xff]   ;;  %v1528_v47 = vrot.slane %v1526_v60, 4  ;;  %360 = vst [vmem:[#allocation2 + $0x3c] sm:$0x1] %v359_v2  ;;  %v1537_v31 = vshrl.u32 %v1422_v14, 16  ;;  %v6326_v53 = vcombine.low %v1501_v58, %v1511_v4  ;;  %v1540_v30 = vshll.u32 %v1422_v14, 16 }
  0x93   : > { %v1519_v61 = vor.u32 %v1518_v21, %v1515_v13  ;;  %v1546_v16 = vshll.u32 %v1423_v39, 16  ;;  %6974 = vmatmul.mubr.bf16.vlgmr.msra.gmra.mxu1 %v6302_v22  ;;  %v1550_v11 = vshrl.u32 %v1423_v39, 16  ;;  %v9990_v0 = vrot.slane %v8225_v35, 4  ;;  %v313_v60 = vld [vmem:[#allocation2 + $0x40] sm:$0x8]  ;;  %v8374_v14 = vld [vmem:[#allocation6 + $0x128] sm:$0xff]  }
  0x94   : > { %v406_v3 = vld [vmem:[#allocation2 + $0x20] sm:$0x8]  ;;  %v1529_v50 = vor.u32 %v1528_v47, %v1524_v32  ;;  %v1539_v46 = vrot.slane %v1537_v31, 4  ;;  %7022 = vmatmul.mubr.bf16.vlgmr.msra.gmra.mxu0 %v6326_v53  ;;  %7054 = vmatpush3.bf16.msra.mxu1 %v8304_v17  ;;  %v1542_v7 = vrot.slane %v1540_v30, 5  ;;  %v361_v2 = vld [vmem:[#allocation2 + $0x4c] sm:$0x1] }
  0x95   : > { %v1421_v24 = vld [vmem:[#allocation2 + $0x2c] sm:$0x1]  ;;  %v8371_v59 = vsel %vm7949_vm2, %v9990_v0, %v8295_v12  ;;  %v495_v58 = vshrl.u32 %v406_v3, 16  ;;  %v1520_v13 = vrot.slane %v1519_v61, 4  ;;  %7102 = vmatpush3.bf16.msra.mxu0 %v8322_v10  ;;  %v8377_v21 = vrot.slane %v1546_v16, 5  ;;  %7055 = vmatprep.subr.bf16.mxu1 %v7466_v8  ;;  %v8386_v3 = vld [vmem:[#allocation6 + $0xe0] sm:$0xff]  }
  0x96   : > { %v1532_v44 = vshll.u32 %v1421_v24, 16  ;;  %v1530_v23 = vrot.slane %v1529_v50, 4  ;;  %v1552_v35 = vrot.slane %v1550_v11, 4  ;;  %v314_v12 = vsel %vm8233_vm6, 0, %v313_v60  ;;  %7103 = vmatprep.subr.bf16.mxu0 %v7467_v28  ;;  %v1425_v47 = vld [vmem:[#allocation2 + $0x44] sm:$0xf] }
  0x97   : > { %v6263_v39 = vrot.slane %v495_v58, 11  ;;  %v1525_v17 = vsel %vm8315_vm10, %v1520_v13, %v1524_v32  ;;  %v1543_v4 = vor.u32 %v1542_v7, %v1539_v46  ;;  %315 = vst [vmem:[#allocation2 + $0x40] sm:$0x8] %v314_v12  ;;  %v1426_v31 = vld [vmem:[#allocation2 + $0x48] sm:$0xf]  ;;  %v362_v61 = vsel %vm8255_vm9, 0, %v361_v2 }
  0x98   : > { %v1534_v22 = vrot.slane %v1532_v44, 5  ;;  %v409_v10 = vld [vmem:[#allocation2 + $0x30] sm:$0x8]  ;;  %v1553_v53 = vor.u32 %v1552_v35, %v8377_v21  ;;  %v1561_v30 = vshrl.u32 %v1425_v47, 16  ;;  %v1564_v16 = vshll.u32 %v1425_v47, 16  ;;  %7056 = vmatpush3.bf16.msra.mxu1 %v7466_v8 }
  0x99   : > { %v506_v32 = vsel %vm7949_vm2, %v6263_v39, %v8055_v33  ;;  %v517_v50 = vshrl.u32 %v409_v10, 16  ;;  %v1424_v46 = vld [vmem:[#allocation2 + $0x3c] sm:$0x1]  ;;  %v1544_v11 = vrot.slane %v1543_v4, 4  ;;  %363 = vst [vmem:[#allocation2 + $0x4c] sm:$0x1] %v362_v61  ;;  %7104 = vmatpush3.bf16.msra.mxu0 %v7467_v28  ;;  %7057 = vmatprep.subr.bf16.mxu1 %v8364_v20 }
  0x9a   : > { %v1535_v24 = vsel %vm8315_vm10, %v1530_v23, %v1534_v22  ;;  %v316_v0 = vld [vmem:[#allocation2 + $0x50] sm:$0x8]  ;;  %v6303_v58 = vcombine.low %v506_v32, %v8155_v40  ;;  %v1554_v44 = vrot.slane %v1553_v53, 4  ;;  %v1556_v7 = vshll.u32 %v1424_v46, 16  ;;  %v364_v60 = vld [vmem:[#allocation2 + $0x5c] sm:$0x1]  ;;  %7105 = vmatprep.subr.bf16.mxu0 %v8374_v14 }
  0x9b   : > { %v6327_v13 = vcombine.low %v1525_v17, %v1535_v24  ;;  %v1428_v35 = vld [vmem:[#allocation2 + $0x54] sm:$0xf]  ;;  %v6264_v33 = vrot.slane %v517_v50, 11  ;;  %v1549_v23 = vsel %vm8315_vm10, %v1544_v11, %v8377_v21  ;;  %v1563_v12 = vrot.slane %v1561_v30, 4  ;;  %v1429_v8 = vld [vmem:[#allocation2 + $0x58] sm:$0xf] }
  0x9c   : > { %v1566_v2 = vrot.slane %v1564_v16, 5  ;;  %v7471_v39 = vld [vmem:[#allocation6 + $0x120] sm:$0xff]   ;;  %6977 = vmatprep.mubr.bf16.mxu1 %v6303_v58  ;;  %v1558_v40 = vrot.slane %v1556_v7, 5  ;;  %v1570_v17 = vshll.u32 %v1426_v31, 16  ;;  %v1574_v28 = vshrl.u32 %v1426_v31, 16  ;;  %v7472_v4 = vld [vmem:[#allocation6 + $0xd8] sm:$0xff]   ;;  %7058 = vmatpush3.bf16.msra.mxu1 %v8364_v20 }
  0x9d   : > { %7025 = vmatprep.mubr.bf16.mxu0 %v6327_v13  ;;  %v317_v22 = vsel %vm8233_vm6, 0, %v316_v0  ;;  %v528_v47 = vsel %vm7949_vm2, %v6264_v33, %v8068_v51  ;;  %v365_v10 = vsel %vm8255_vm9, 0, %v364_v60  ;;  %v1585_v53 = vshrl.u32 %v1428_v35, 16  ;;  %7106 = vmatpush3.bf16.msra.mxu0 %v8374_v14  ;;  %v319_v11 = vld [vmem:[#allocation2 + $0x60] sm:$0x8]  ;;  %v7473_v20 = vld [vmem:[#allocation6 + $0x118] sm:$0xff]  }
  0x9e   : > { %v1567_v21 = vor.u32 %v1566_v2, %v1563_v12  ;;  %318 = vst [vmem:[#allocation2 + $0x50] sm:$0x8] %v317_v22  ;;  %v6304_v61 = vcombine.low %v528_v47, %v8199_v34  ;;  %v1559_v31 = vsel %vm8315_vm10, %v1554_v44, %v1558_v40  ;;  %v412_v30 = vld [vmem:[#allocation2 + $0x40] sm:$0x8]  ;;  %v1572_v16 = vrot.slane %v1570_v17, 5  ;;  %7059 = vmatprep.subr.bf16.mxu1 %v8386_v3  ;;  %v7474_v12 = vld [vmem:[#allocation6 + $0xd0] sm:$0xff]  }
  0x9f   : > { %v1576_v32 = vrot.slane %v1574_v28, 4  ;;  %366 = vst [vmem:[#allocation2 + $0x5c] sm:$0x1] %v365_v10  ;;  %v6328_v51 = vcombine.low %v1549_v23, %v1559_v31  ;;  %v539_v24 = vshrl.u32 %v412_v30, 16  ;;  %v1587_v46 = vrot.slane %v1585_v53, 4  ;;  %7107 = vmatprep.subr.bf16.mxu0 %v7471_v39  ;;  %v7475_v10 = vld [vmem:[#allocation6 + $0x110] sm:$0xff]  }
  0xa0   : > { %v1568_v50 = vrot.slane %v1567_v21, 4  ;;  %6978 = vmatmul.mubr.bf16.gmra.mxu1 %v6304_v61  ;;  %v1427_v34 = vld [vmem:[#allocation2 + $0x4c] sm:$0x1]  ;;  %v1588_v58 = vshll.u32 %v1428_v35, 16  ;;  %v1594_v13 = vshll.u32 %v1429_v8, 16  ;;  %v1598_v44 = vshrl.u32 %v1429_v8, 16 }
  0xa1   : > { %v1577_v0 = vor.u32 %v1576_v32, %v1572_v16  ;;  %7026 = vmatmul.mubr.bf16.gmra.mxu0 %v6328_v51  ;;  %v6265_v7 = vrot.slane %v539_v24, 11  ;;  %v1580_v60 = vshll.u32 %v1427_v34, 16  ;;  %v320_v33 = vsel %vm8233_vm6, 0, %v319_v11  ;;  %v367_v23 = vld [vmem:[#allocation2 + $0x6c] sm:$0x1]  ;;  %7060 = vmatpush3.bf16.msra.mxu1 %v8386_v3 }
  0xa2   : > { %v1573_v14 = vsel %vm8315_vm10, %v1568_v50, %v1572_v16  ;;  %v1590_v40 = vrot.slane %v1588_v58, 5  ;;  %v8417_v17 = vrot.slane %v1594_v13, 5  ;;  %v1600_v35 = vrot.slane %v1598_v44, 4  ;;  %321 = vst [vmem:[#allocation2 + $0x60] sm:$0x8] %v320_v33  ;;  %7108 = vmatpush3.bf16.msra.mxu0 %v7471_v39  ;;  %7061 = vmatprep.subr.bf16.mxu1 %v7472_v4  ;;  %v7476_v11 = vld [vmem:[#allocation6 + $0xc8] sm:$0xff]  }
  0xa3   : > { %v1578_v2 = vrot.slane %v1577_v0, 4  ;;  %v1431_v8 = vld [vmem:[#allocation2 + $0x64] sm:$0xf]  ;;  %v550_v28 = vsel %vm7949_vm2, %v6265_v7, %v8163_v9  ;;  %v1582_v22 = vrot.slane %v1580_v60, 5  ;;  %v368_v47 = vsel %vm8255_vm9, 0, %v367_v23  ;;  %7109 = vmatprep.subr.bf16.mxu0 %v7473_v20  ;;  %v7477_v13 = vld [vmem:[#allocation6 + $0x108] sm:$0xff]  }
  0xa4   : > { %v1432_v21 = vld [vmem:[#allocation2 + $0x68] sm:$0xf]  ;;  %v1609_v3 = vshrl.u32 %v1431_v8, 16  ;;  %v6305_v53 = vcombine.low %v550_v28, %v8223_v6  ;;  %v1591_v31 = vor.u32 %v1590_v40, %v1587_v46  ;;  %v1601_v30 = vor.u32 %v1600_v35, %v8417_v17  ;;  %369 = vst [vmem:[#allocation2 + $0x6c] sm:$0x1] %v368_v47  ;;  %v8436_v35 = vld [vmem:[#allocation6 + $0xc0] sm:$0xff]  }
  0xa5   : > { %v415_v61 = vld [vmem:[#allocation2 + $0x50] sm:$0x8]  ;;  %v1612_v39 = vshll.u32 %v1431_v8, 16  ;;  %v1583_v9 = vsel %vm8315_vm10, %v1578_v2, %v1582_v22  ;;  %v1618_v50 = vshll.u32 %v1432_v21, 16  ;;  %7062 = vmatpush3.bf16.msra.mxu1 %v7472_v4  ;;  %v370_v46 = vld [vmem:[#allocation2 + $0x7c] sm:$0x1] }
  0xa6   : > { %v322_v16 = vld [vmem:[#allocation2 + $0x70] sm:$0x8]  ;;  %v561_v32 = vshrl.u32 %v415_v61, 16  ;;  %v1430_v51 = vld [vmem:[#allocation2 + $0x5c] sm:$0x1]  ;;  %v1611_v24 = vrot.slane %v1609_v3, 4  ;;  %6981 = vmatprep.mubr.bf16.mxu1 %v6305_v53  ;;  %v6329_v34 = vcombine.low %v1573_v14, %v1583_v9  ;;  %7110 = vmatpush3.bf16.msra.mxu0 %v7473_v20 }
  0xa7   : > { %v1592_v0 = vrot.slane %v1591_v31, 4  ;;  %v1602_v6 = vrot.slane %v1601_v30, 4  ;;  %v1604_v58 = vshll.u32 %v1430_v51, 16  ;;  %v1614_v7 = vrot.slane %v1612_v39, 5  ;;  %v1434_v23 = vld [vmem:[#allocation2 + $0x74] sm:$0xf]  ;;  %7063 = vmatprep.subr.bf16.mxu1 %v7474_v12  ;;  %7111 = vmatprep.subr.bf16.mxu0 %v7475_v10 }
  0xa8   : > { %v6266_v44 = vrot.slane %v561_v32, 11  ;;  %v8428_v60 = vrot.slane %v1618_v50, 5  ;;  %v1622_v33 = vshrl.u32 %v1432_v21, 16  ;;  %7029 = vmatprep.mubr.bf16.mxu0 %v6329_v34  ;;  %v323_v2 = vsel %vm8233_vm6, 0, %v322_v16  ;;  %v1435_v40 = vld [vmem:[#allocation2 + $0x78] sm:$0xf] }
  0xa9   : > { %v1597_v4 = vsel %vm8315_vm10, %v1592_v0, %v8417_v17  ;;  %v1606_v14 = vrot.slane %v1604_v58, 5  ;;  %v617_v20 = vrot.slane %v8261_v27, 4  ;;  %v418_v28 = vld [vmem:[#allocation2 + $0x60] sm:$0x8]  ;;  %v1615_v22 = vor.u32 %v1614_v7, %v1611_v24  ;;  %324 = vst [vmem:[#allocation2 + $0x70] sm:$0x8] %v323_v2  ;;  %7064 = vmatpush3.bf16.msra.mxu1 %v7474_v12 }
  0xaa   : > { %v572_v8 = vsel %vm7949_vm2, %v6266_v44, %v8171_v38  ;;  %v1624_v47 = vrot.slane %v1622_v33, 4  ;;  %v371_v17 = vsel %vm8255_vm9, 0, %v370_v46  ;;  %v583_v3 = vshrl.u32 %v418_v28, 16  ;;  %7112 = vmatpush3.bf16.msra.mxu0 %v7475_v10  ;;  %7065 = vmatprep.subr.bf16.mxu1 %v7476_v11  ;;  %v7479_v38 = vld [vmem:[#allocation6 + $0x100] sm:$0xff]   ;;  %v373_v34 = vld [vmem:[#allocation2 + $0x8c] sm:$0x1] }
  0xab   : > { %v6306_v21 = vcombine.low %v572_v8, %v8282_v15  ;;  %v1607_v27 = vsel %vm8315_vm10, %v1602_v6, %v1606_v14  ;;  %v8449_v53 = vsel %vm7949_vm2, %v617_v20, %v8306_v49  ;;  %372 = vst [vmem:[#allocation2 + $0x7c] sm:$0x1] %v371_v17  ;;  %v1433_v31 = vld [vmem:[#allocation2 + $0x6c] sm:$0x1]  ;;  %v1616_v30 = vrot.slane %v1615_v22, 4  ;;  %7113 = vmatprep.subr.bf16.mxu0 %v7477_v13  ;;  %v8459_v7 = vld [vmem:[#allocation6 + $0x178] sm:$0xff]  }
  0xac   : > { %v6330_v61 = vcombine.low %v1597_v4, %v1607_v27  ;;  %v1625_v12 = vor.u32 %v1624_v47, %v8428_v60  ;;  %v1633_v39 = vshrl.u32 %v1434_v23, 16  ;;  %v6267_v15 = vrot.slane %v583_v3, 11  ;;  %v325_v51 = vld [vmem:[#allocation2 + $0x80] sm:$0x8]  ;;  %v1437_v44 = vld [vmem:[#allocation2 + $0x84] sm:$0xf] }
  0xad   : > { %6982 = vmatmul.mubr.bf16.gmra.mxu1 %v6306_v21  ;;  %v1628_v16 = vshll.u32 %v1433_v31, 16  ;;  %v1636_v9 = vshll.u32 %v1434_v23, 16  ;;  %v1642_v32 = vshll.u32 %v1435_v40, 16  ;;  %v1621_v49 = vsel %vm8315_vm10, %v1616_v30, %v8428_v60  ;;  %v1438_v4 = vld [vmem:[#allocation2 + $0x88] sm:$0xf] }
  0xae   : > { %7030 = vmatmul.mubr.bf16.gmra.mxu0 %v6330_v61  ;;  %v1626_v10 = vrot.slane %v1625_v12, 4  ;;  %v1635_v24 = vrot.slane %v1633_v39, 4  ;;  %v1646_v50 = vshrl.u32 %v1435_v40, 16  ;;  %7066 = vmatpush3.bf16.msra.mxu1 %v7476_v11  ;;  %v594_v0 = vsel %vm7949_vm2, %v6267_v15, %v8285_v29  ;;  %v8466_v29 = vld [vmem:[#allocation6 + $0x1b8] sm:$0xff]   ;;  %v328_v17 = vld [vmem:[#allocation2 + $0x90] sm:$0x8] }
  0xaf   : > { %v1630_v6 = vrot.slane %v1628_v16, 5  ;;  %v1638_v58 = vrot.slane %v1636_v9, 5  ;;  %v1644_v46 = vrot.slane %v1642_v32, 5  ;;  %7114 = vmatpush3.bf16.msra.mxu0 %v7477_v13  ;;  %7067 = vmatprep.subr.bf16.mxu1 %v8436_v35  ;;  %v6307_v60 = vcombine.low %v594_v0, %v8371_v59  ;;  %v376_v31 = vld [vmem:[#allocation2 + $0x9c] sm:$0x1] }
  0xb0   : > { %v1648_v33 = vrot.slane %v1646_v50, 4  ;;  %v326_v23 = vsel %vm8233_vm6, 0, %v325_v51  ;;  %v374_v11 = vsel %vm8255_vm9, 0, %v373_v34  ;;  %7115 = vmatprep.subr.bf16.mxu0 %v7479_v38  ;;  %v421_v14 = vld [vmem:[#allocation2 + $0x70] sm:$0x8]  ;;  %v1657_v20 = vshrl.u32 %v1437_v44, 16 }
  0xb1   : > { %v1631_v13 = vsel %vm8315_vm10, %v1626_v10, %v1630_v6  ;;  %v1639_v2 = vor.u32 %v1638_v58, %v1635_v24  ;;  %327 = vst [vmem:[#allocation2 + $0x80] sm:$0x8] %v326_v23  ;;  %375 = vst [vmem:[#allocation2 + $0x8c] sm:$0x1] %v374_v11  ;;  %v1660_v59 = vshll.u32 %v1437_v44, 16  ;;  %6985 = vmatprep.mubr.bf16.mxu1 %v6307_v60  ;;  %v605_v8 = vshrl.u32 %v421_v14, 16 }
  0xb2   : > { %v6331_v40 = vcombine.low %v1621_v49, %v1631_v13  ;;  %v1436_v28 = vld [vmem:[#allocation2 + $0x7c] sm:$0x1]  ;;  %v1649_v22 = vor.u32 %v1648_v33, %v1644_v46  ;;  %v1666_v47 = vshll.u32 %v1438_v4, 16  ;;  %7068 = vmatpush3.bf16.msra.mxu1 %v8436_v35  ;;  %v1659_v3 = vrot.slane %v1657_v20, 4  ;;  %v1440_v16 = vld [vmem:[#allocation2 + $0x94] sm:$0xf] }
  0xb3   : > { %v1640_v21 = vrot.slane %v1639_v2, 4  ;;  %v1652_v27 = vshll.u32 %v1436_v28, 16  ;;  %v1662_v61 = vrot.slane %v1660_v59, 5  ;;  %7116 = vmatpush3.bf16.msra.mxu0 %v7479_v38  ;;  %7149 = vmatprep.subr.bf16.mxu1 %v8459_v7  ;;  %v6268_v30 = vrot.slane %v605_v8, 11  ;;  %v1441_v49 = vld [vmem:[#allocation2 + $0x98] sm:$0xf] }
  0xb4   : > { %7033 = vmatprep.mubr.bf16.mxu0 %v6331_v40  ;;  %v1650_v12 = vrot.slane %v1649_v22, 4  ;;  %v1668_v39 = vrot.slane %v1666_v47, 5  ;;  %v1670_v15 = vshrl.u32 %v1438_v4, 16  ;;  %7197 = vmatprep.subr.bf16.mxu0 %v8466_v29  ;;  %v329_v51 = vsel %vm8233_vm6, 0, %v328_v17  ;;  %v379_v14 = vld [vmem:[#allocation2 + $0xac] sm:$0x1] }
  0xb5   : > { %v1645_v9 = vsel %vm8315_vm10, %v1640_v21, %v1644_v46  ;;  %v1654_v35 = vrot.slane %v1652_v27, 5  ;;  %v1663_v32 = vor.u32 %v1662_v61, %v1659_v3  ;;  %v616_v38 = vsel %vm7949_vm2, %v6268_v30, %v8298_v19  ;;  %330 = vst [vmem:[#allocation2 + $0x90] sm:$0x8] %v329_v51  ;;  %v331_v46 = vld [vmem:[#allocation2 + $0xa0] sm:$0x8] }
  0xb6   : > { %v1672_v10 = vrot.slane %v1670_v15, 4  ;;  %v661_v24 = vrot.slane %v7941_v52, 4  ;;  %v377_v50 = vsel %vm8255_vm9, 0, %v376_v31  ;;  %v6308_v34 = vcombine.low %v616_v38, %v8449_v53  ;;  %v1443_v8 = vld [vmem:[#allocation2 + $0xa4] sm:$0xf] }
  0xb7   : > { %v1655_v0 = vsel %vm8315_vm10, %v1650_v12, %v1654_v35  ;;  %v1664_v6 = vrot.slane %v1663_v32, 4  ;;  %378 = vst [vmem:[#allocation2 + $0x9c] sm:$0x1] %v377_v50  ;;  %v1681_v58 = vshrl.u32 %v1440_v16, 16  ;;  %v1684_v23 = vshll.u32 %v1440_v16, 16 }
  0xb8   : > { %v6332_v44 = vcombine.low %v1645_v9, %v1655_v0  ;;  %v424_v60 = vld [vmem:[#allocation2 + $0x80] sm:$0x8]  ;;  %v1439_v33 = vld [vmem:[#allocation2 + $0x8c] sm:$0x1]  ;;  %v1673_v19 = vor.u32 %v1672_v10, %v1668_v39  ;;  %v669_v52 = vsel %vm7949_vm2, %v661_v24, %v8114_v5  ;;  %6986 = vmatmul.mubr.bf16.gmra.mxu1 %v6308_v34  ;;  %v1690_v59 = vshll.u32 %v1441_v49, 16 }
  0xb9   : > { %v627_v11 = vshrl.u32 %v424_v60, 16  ;;  %v1669_v53 = vsel %vm8315_vm10, %v1664_v6, %v1668_v39  ;;  %v1676_v4 = vshll.u32 %v1439_v33, 16  ;;  %v1683_v13 = vrot.slane %v1681_v58, 4  ;;  %v382_v24 = vld [vmem:[#allocation2 + $0xbc] sm:$0x1] }
  0xba   : > { %7034 = vmatmul.mubr.bf16.gmra.mxu0 %v6332_v44  ;;  %v1674_v2 = vrot.slane %v1673_v19, 4  ;;  %v1686_v20 = vrot.slane %v1684_v23, 5  ;;  %v1694_v40 = vshrl.u32 %v1441_v49, 16  ;;  %v332_v5 = vsel %vm8233_vm6, 0, %v331_v46  ;;  %v246_v6 = vld [vmem:[%s7886_s23 + $0x78] sm:$0xff]  }
  0xbb   : > { %v6269_v28 = vrot.slane %v627_v11, 11  ;;  %v1678_v22 = vrot.slane %v1676_v4, 5  ;;  %v683_v47 = vrot.slane %v7989_v18, 4  ;;  %v1692_v21 = vrot.slane %v1690_v59, 5  ;;  %333 = vst [vmem:[#allocation2 + $0xa0] sm:$0x8] %v332_v5 }
  0xbc   : > { %v1687_v17 = vor.u32 %v1686_v20, %v1683_v13  ;;  %v1696_v27 = vrot.slane %v1694_v40, 4  ;;  %v380_v3 = vsel %vm8255_vm9, 0, %v379_v14  ;;  %v427_v30 = vld [vmem:[#allocation2 + $0x90] sm:$0x8]  ;;  %v1444_v18 = vld [vmem:[#allocation2 + $0xa8] sm:$0xf] }
  0xbd   : > { %v638_v61 = vsel %vm7949_vm2, %v6269_v28, %v8014_v41  ;;  %v1679_v31 = vsel %vm8315_vm10, %v1674_v2, %v1678_v22  ;;  %v8504_v12 = vsel %vm7949_vm2, %v683_v47, %v8124_v48  ;;  %381 = vst [vmem:[#allocation2 + $0xac] sm:$0x1] %v380_v3  ;;  %v1705_v39 = vshrl.u32 %v1443_v8, 16  ;;  %v334_v41 = vld [vmem:[#allocation2 + $0xb0] sm:$0x8]  ;;  %279 = vst [vmem:[#allocation2 + $0x104] sm:$0xff] %v246_v6  }
  0xbe   : > { %v6309_v15 = vcombine.low %v638_v61, %v8036_v26  ;;  %v6333_v16 = vcombine.low %v1669_v53, %v1679_v31  ;;  %v649_v9 = vshrl.u32 %v427_v30, 16  ;;  %v1442_v35 = vld [vmem:[#allocation2 + $0x9c] sm:$0x1]  ;;  %v1688_v32 = vrot.slane %v1687_v17, 4  ;;  %v1446_v26 = vld [vmem:[#allocation2 + $0xb4] sm:$0xf] }
  0xbf   : > { %v1697_v51 = vor.u32 %v1696_v27, %v1692_v21  ;;  %v1700_v49 = vshll.u32 %v1442_v35, 16  ;;  %v1707_v38 = vrot.slane %v1705_v39, 4  ;;  %v1708_v10 = vshll.u32 %v1443_v8, 16  ;;  %v1447_v33 = vld [vmem:[#allocation2 + $0xb8] sm:$0xf] }
  0xc0   : > { %6989 = vmatprep.mubr.bf16.mxu1 %v6309_v15  ;;  %7037 = vmatprep.mubr.bf16.mxu0 %v6333_v16  ;;  %v6270_v48 = vrot.slane %v649_v9, 11  ;;  %v1693_v50 = vsel %vm8315_vm10, %v1688_v32, %v1692_v21  ;;  %v1714_v34 = vshll.u32 %v1444_v18, 16  ;;  %v1718_v0 = vshrl.u32 %v1444_v18, 16  ;;  %v337_v47 = vld [vmem:[#allocation2 + $0xc0] sm:$0x8] }
  0xc1   : > { %v1698_v58 = vrot.slane %v1697_v51, 4  ;;  %v1702_v46 = vrot.slane %v1700_v49, 5  ;;  %v1710_v44 = vrot.slane %v1708_v10, 5  ;;  %v335_v60 = vsel %vm8233_vm6, 0, %v334_v41  ;;  %v385_v39 = vld [vmem:[#allocation2 + $0xcc] sm:$0x1] }
  0xc2   : > { %v660_v19 = vsel %vm7949_vm2, %v6270_v48, %v8102_v45  ;;  %v1716_v23 = vrot.slane %v1714_v34, 5  ;;  %v1720_v11 = vrot.slane %v1718_v0, 4  ;;  %336 = vst [vmem:[#allocation2 + $0xb0] sm:$0x8] %v335_v60  ;;  %v705_v53 = vrot.slane %v8023_v43, 4 }
  0xc3   : > { %v6310_v4 = vcombine.low %v660_v19, %v669_v52  ;;  %v1703_v13 = vsel %vm8315_vm10, %v1698_v58, %v1702_v46  ;;  %v430_v14 = vld [vmem:[#allocation2 + $0xa0] sm:$0x8]  ;;  %v1711_v2 = vor.u32 %v1710_v44, %v1707_v38  ;;  %v383_v20 = vsel %vm8255_vm9, 0, %v382_v24  ;;  %v1449_v35 = vld [vmem:[#allocation2 + $0xc4] sm:$0xf] }
  0xc4   : > { %v6334_v59 = vcombine.low %v1693_v50, %v1703_v13  ;;  %v671_v40 = vshrl.u32 %v430_v14, 16  ;;  %v1445_v8 = vld [vmem:[#allocation2 + $0xac] sm:$0x1]  ;;  %v1721_v28 = vor.u32 %v1720_v11, %v1716_v23  ;;  %v713_v45 = vsel %vm7949_vm2, %v705_v53, %v8176_v55  ;;  %384 = vst [vmem:[#allocation2 + $0xbc] sm:$0x1] %v383_v20  ;;  %v9991_v13 = vld [vmem:[#allocation15_spill] sm:$0xff] }
  0xc5   : > { %6990 = vmatmul.mubr.bf16.gmra.mxu1 %v6310_v4  ;;  %v1712_v43 = vrot.slane %v1711_v2, 4  ;;  %v1724_v52 = vshll.u32 %v1445_v8, 16  ;;  %v1729_v22 = vshrl.u32 %v1446_v26, 16  ;;  %v1732_v5 = vshll.u32 %v1446_v26, 16  ;;  %v1450_v10 = vld [vmem:[#allocation2 + $0xc8] sm:$0xf] }
  0xc6   : > { %7038 = vmatmul.mubr.bf16.gmra.mxu0 %v6334_v59  ;;  %v6271_v17 = vrot.slane %v671_v40, 11  ;;  %v1722_v21 = vrot.slane %v1721_v28, 4  ;;  %v1738_v27 = vshll.u32 %v1447_v33, 16  ;;  %v1742_v3 = vshrl.u32 %v1447_v33, 16  ;;  %v340_v34 = vld [vmem:[#allocation2 + $0xd0] sm:$0x8] }
  0xc7   : > { %v1717_v61 = vsel %vm8315_vm10, %v1712_v43, %v1716_v23  ;;  %v1726_v31 = vrot.slane %v1724_v52, 5  ;;  %v1731_v30 = vrot.slane %v1729_v22, 4  ;;  %v1734_v18 = vrot.slane %v1732_v5, 5  ;;  %v388_v46 = vld [vmem:[#allocation2 + $0xdc] sm:$0x1]  ;;  %v9992_v28 = vld [vmem:[#allocation16_spill] sm:$0xff] }
  0xc8   : > { %v682_v55 = vsel %vm7949_vm2, %v6271_v17, %v8119_v36  ;;  %v1740_v15 = vrot.slane %v1738_v27, 5  ;;  %v1744_v16 = vrot.slane %v1742_v3, 4  ;;  %v338_v9 = vsel %vm8233_vm6, 0, %v337_v47  ;;  %v1453_v52 = vld [vmem:[#allocation2 + $0xd8] sm:$0xf] }
  0xc9   : > { %v6311_v32 = vcombine.low %v682_v55, %v8504_v12  ;;  %v1727_v41 = vsel %vm8315_vm10, %v1722_v21, %v1726_v31  ;;  %v433_v51 = vld [vmem:[#allocation2 + $0xb0] sm:$0x8]  ;;  %v1735_v49 = vor.u32 %v1734_v18, %v1731_v30  ;;  %339 = vst [vmem:[#allocation2 + $0xc0] sm:$0x8] %v338_v9  ;;  %v727_v38 = vrot.slane %v8086_v62, 4 }
  0xca   : > { %v6335_v24 = vcombine.low %v1717_v61, %v1727_v41  ;;  %v693_v48 = vshrl.u32 %v433_v51, 16  ;;  %v1745_v36 = vor.u32 %v1744_v16, %v1740_v15  ;;  %v386_v50 = vsel %vm8255_vm9, 0, %v385_v39  ;;  %v1452_v62 = vld [vmem:[#allocation2 + $0xd4] sm:$0xf]  ;;  %v343_v31 = vld [vmem:[#allocation2 + $0xe0] sm:$0x8] }
  0xcb   : > { %6993 = vmatprep.mubr.bf16.mxu1 %v6311_v32  ;;  %v1448_v0 = vld [vmem:[#allocation2 + $0xbc] sm:$0x1]  ;;  %v1736_v26 = vrot.slane %v1735_v49, 4  ;;  %v735_v12 = vsel %vm7949_vm2, %v727_v38, %v8186_v25  ;;  %387 = vst [vmem:[#allocation2 + $0xcc] sm:$0x1] %v386_v50  ;;  %v1753_v6 = vshrl.u32 %v1449_v35, 16 }
  0xcc   : > { %v1756_v58 = vshll.u32 %v1449_v35, 16  ;;  %7041 = vmatprep.mubr.bf16.mxu0 %v6335_v24  ;;  %v6272_v44 = vrot.slane %v693_v48, 11  ;;  %v1746_v60 = vrot.slane %v1745_v36, 4  ;;  %v1748_v33 = vshll.u32 %v1448_v0, 16  ;;  %v391_v30 = vld [vmem:[#allocation2 + $0xec] sm:$0x1] }
  0xcd   : > { %v1762_v19 = vshll.u32 %v1450_v10, 16  ;;  %v1741_v23 = vsel %vm8315_vm10, %v1736_v26, %v1740_v15  ;;  %v1755_v11 = vrot.slane %v1753_v6, 4  ;;  %v1766_v4 = vshrl.u32 %v1450_v10, 16  ;;  %v9993_v39 = vld [vmem:[#allocation19_spill] sm:$0xff]  ;;  %v9994_v36 = vld [vmem:[#allocation17_spill] sm:$0xff] }
  0xce   : > { %v1758_v53 = vrot.slane %v1756_v58, 5  ;;  %v704_v25 = vsel %vm7949_vm2, %v6272_v44, %v9991_v13  ;;  %v1750_v14 = vrot.slane %v1748_v33, 5  ;;  %v341_v20 = vsel %vm8233_vm6, 0, %v340_v34  ;;  %v1455_v49 = vld [vmem:[#allocation2 + $0xe4] sm:$0xf] }
  0xcf   : > { %v1764_v2 = vrot.slane %v1762_v19, 5  ;;  %v6312_v59 = vcombine.low %v704_v25, %v713_v45  ;;  %v1768_v8 = vrot.slane %v1766_v4, 4  ;;  %342 = vst [vmem:[#allocation2 + $0xd0] sm:$0x8] %v341_v20  ;;  %v749_v43 = vrot.slane %v9992_v28, 4 }
  0xd0   : > { %v1759_v40 = vor.u32 %v1758_v53, %v1755_v11  ;;  %v1751_v22 = vsel %vm8315_vm10, %v1746_v60, %v1750_v14  ;;  %v436_v5 = vld [vmem:[#allocation2 + $0xc0] sm:$0x8]  ;;  %v389_v47 = vsel %vm8255_vm9, 0, %v388_v46  ;;  %v1777_v17 = vshrl.u32 %v1452_v62, 16  ;;  %v1456_v6 = vld [vmem:[#allocation2 + $0xe8] sm:$0xf] }
  0xd1   : > { %v1780_v21 = vshll.u32 %v1452_v62, 16  ;;  %6994 = vmatmul.mubr.bf16.gmra.mxu1 %v6312_v59  ;;  %v6336_v27 = vcombine.low %v1741_v23, %v1751_v22  ;;  %v715_v3 = vshrl.u32 %v436_v5, 16  ;;  %v1769_v45 = vor.u32 %v1768_v8, %v1764_v2  ;;  %390 = vst [vmem:[#allocation2 + $0xdc] sm:$0x1] %v389_v47  ;;  %v394_v53 = vld [vmem:[#allocation2 + $0xfc] sm:$0x1] }
  0xd2   : > { %v1760_v61 = vrot.slane %v1759_v40, 4  ;;  %v1451_v18 = vld [vmem:[#allocation2 + $0xcc] sm:$0x1]  ;;  %v757_v55 = vsel %vm7949_vm2, %v749_v43, %v9993_v39  ;;  %v1779_v15 = vrot.slane %v1777_v17, 4  ;;  %v1786_v9 = vshll.u32 %v1453_v52, 16  ;;  %v9995_v22 = vld [vmem:[#allocation18_spill] sm:$0xff] }
  0xd3   : > { %v1782_v16 = vrot.slane %v1780_v21, 5  ;;  %7042 = vmatmul.mubr.bf16.gmra.mxu0 %v6336_v27  ;;  %v6273_v35 = vrot.slane %v715_v3, 11  ;;  %v1770_v41 = vrot.slane %v1769_v45, 4  ;;  %v1772_v51 = vshll.u32 %v1451_v18, 16  ;;  %v9996_v45 = vld [vmem:[#allocation22_spill] sm:$0xff] }
  0xd4   : > { %v1765_v32 = vsel %vm8315_vm10, %v1760_v61, %v1764_v2  ;;  %v1788_v10 = vrot.slane %v1786_v9, 5  ;;  %v1790_v24 = vshrl.u32 %v1453_v52, 16  ;;  %v344_v48 = vsel %vm8233_vm6, 0, %v343_v31  ;;  %v1458_v2 = vld [vmem:[#allocation2 + $0xf4] sm:$0xf] }
  0xd5   : > { %v1783_v38 = vor.u32 %v1782_v16, %v1779_v15  ;;  %v726_v50 = vsel %vm7949_vm2, %v6273_v35, %v9994_v36  ;;  %v1774_v34 = vrot.slane %v1772_v51, 5  ;;  %345 = vst [vmem:[#allocation2 + $0xe0] sm:$0x8] %v344_v48  ;;  %v771_v0 = vrot.slane %v8237_v1, 4  ;;  %v346_v1 = vld [vmem:[#allocation2 + $0xf0] sm:$0x8] }
  0xd6   : > { %v392_v26 = vsel %vm8255_vm9, 0, %v391_v30  ;;  %v6313_v58 = vcombine.low %v726_v50, %v735_v12  ;;  %v439_v46 = vld [vmem:[#allocation2 + $0xd0] sm:$0x8]  ;;  %v1792_v44 = vrot.slane %v1790_v24, 4  ;;  %v1801_v60 = vshrl.u32 %v1455_v49, 16  ;;  %v9997_v31 = vld [vmem:[#allocation21_spill] sm:$0xff] }
  0xd7   : > { %v1784_v62 = vrot.slane %v1783_v38, 4  ;;  %393 = vst [vmem:[#allocation2 + $0xec] sm:$0x1] %v392_v26  ;;  %v1775_v33 = vsel %vm8315_vm10, %v1770_v41, %v1774_v34  ;;  %v737_v19 = vshrl.u32 %v439_v46, 16  ;;  %v779_v23 = vsel %vm7949_vm2, %v771_v0, %v8327_v57  ;;  %v1459_v15 = vld [vmem:[#allocation2 + $0xf8] sm:$0xf] }
  0xd8   : > { %v1804_v11 = vshll.u32 %v1455_v49, 16  ;;  %6997 = vmatprep.mubr.bf16.mxu1 %v6313_v58  ;;  %v6337_v4 = vcombine.low %v1765_v32, %v1775_v33  ;;  %v1454_v13 = vld [vmem:[#allocation2 + $0xdc] sm:$0x1]  ;;  %v1793_v25 = vor.u32 %v1792_v44, %v1788_v10  ;;  %v1803_v14 = vrot.slane %v1801_v60, 4  ;;  %v2170_v38 = vld [vmem:[#allocation2 + $0x10] sm:$0x8] }
  0xd9   : > { %v1789_v12 = vsel %vm8315_vm10, %v1784_v62, %v1788_v10  ;;  %v6274_v20 = vrot.slane %v737_v19, 11  ;;  %v1796_v59 = vshll.u32 %v1454_v13, 16  ;;  %v1810_v8 = vshll.u32 %v1456_v6, 16  ;;  %v8586_v10 = vld [vmem:[#allocation2 + $0x14] sm:$0xf]  ;;  %v9999_v46 = vld [vmem:[#allocation23_spill] sm:$0xff] }
  0xda   : > { %v1806_v40 = vrot.slane %v1804_v11, 5  ;;  %7045 = vmatprep.mubr.bf16.mxu0 %v6337_v4  ;;  %v1794_v28 = vrot.slane %v1793_v25, 4  ;;  %v1814_v43 = vshrl.u32 %v1456_v6, 16  ;;  %v347_v57 = vsel %vm8233_vm6, 0, %v346_v1  ;;  %v8590_v58 = vld [vmem:[#allocation2 + $0x18] sm:$0xf] }
  0xdb   : > { %v793_v52 = vrot.slane %v8273_v54, 4  ;;  %v748_v5 = vsel %vm7949_vm2, %v6274_v20, %v9995_v22  ;;  %v1798_v47 = vrot.slane %v1796_v59, 5  ;;  %v1812_v21 = vrot.slane %v1810_v8, 5  ;;  %348 = vst [vmem:[#allocation2 + $0xf0] sm:$0x8] %v347_v57 }
  0xdc   : > { %v1807_v17 = vor.u32 %v1806_v40, %v1803_v14  ;;  %v6314_v27 = vcombine.low %v748_v5, %v757_v55  ;;  %v442_v3 = vld [vmem:[#allocation2 + $0xe0] sm:$0x8]  ;;  %v1816_v61 = vrot.slane %v1814_v43, 4  ;;  %v9998_v30 = vshll.u32 %v9997_v31, 16  ;;  %v8601_v22 = vld [vmem:[#allocation2 + $0x24] sm:$0xf] }
  0xdd   : > { %v395_v39 = vsel %vm8255_vm9, 0, %v394_v53  ;;  %v1799_v54 = vsel %vm8315_vm10, %v1794_v28, %v1798_v47  ;;  %v759_v16 = vshrl.u32 %v442_v3, 16  ;;  %v1825_v32 = vshrl.u32 %v1458_v2, 16  ;;  %v10000_v3 = vld [vmem:[#allocation24_spill] sm:$0xff] }
  0xde   : > { %v800_v18 = vor.u32 %v9998_v30, %v9996_v45  ;;  %v1457_v9 = vld [vmem:[#allocation2 + $0xec] sm:$0x1]  ;;  %v1808_v35 = vrot.slane %v1807_v17, 4  ;;  %396 = vst [vmem:[#allocation2 + $0xfc] sm:$0x1] %v395_v39  ;;  %6998 = vmatmul.mubr.bf16.gmra.mxu1 %v6314_v27  ;;  %v6338_v55 = vcombine.low %v1789_v12, %v1799_v54  ;;  %v1817_v41 = vor.u32 %v1816_v61, %v1812_v21 }
  0xdf   : > { %v1820_v51 = vshll.u32 %v1457_v9, 16  ;;  %v6275_v24 = vrot.slane %v759_v16, 11  ;;  %v1827_v36 = vrot.slane %v1825_v32, 4  ;;  %v1828_v50 = vshll.u32 %v1458_v2, 16  ;;  %v2173_v2 = vld [vmem:[#allocation2 + $0x20] sm:$0x8] }
  0xe0   : > { %v801_v49 = vsel %vm7949_vm2, %v793_v52, %v800_v18  ;;  %v1813_v48 = vsel %vm8315_vm10, %v1808_v35, %v1812_v21  ;;  %7046 = vmatmul.mubr.bf16.gmra.mxu0 %v6338_v55  ;;  %v1818_v34 = vrot.slane %v1817_v41, 4  ;;  %v1834_v26 = vshll.u32 %v1459_v15, 16  ;;  %v8603_v27 = vld [vmem:[#allocation2 + $0x28] sm:$0xf]  ;;  %v2176_v18 = vld [vmem:[#allocation2 + $0x30] sm:$0x8] }
  0xe1   : > { %v1822_v0 = vrot.slane %v1820_v51, 5  ;;  %v1838_v6 = vshrl.u32 %v1459_v15, 16  ;;  %v770_v62 = vsel %vm7949_vm2, %v6275_v24, %v9999_v46  ;;  %v1830_v44 = vrot.slane %v1828_v50, 5  ;;  %v8614_v9 = vld [vmem:[#allocation2 + $0x34] sm:$0xf] }
  0xe2   : > { %v2219_v60 = vshrl.u32 %v2170_v38, 16  ;;  %v2224_v33 = vshrl.u32 %v8586_v10, 16  ;;  %v6315_v19 = vcombine.low %v770_v62, %v779_v23  ;;  %v445_v1 = vld [vmem:[#allocation2 + $0xf0] sm:$0x8]  ;;  %v1836_v53 = vrot.slane %v1834_v26, 5 }
  0xe3   : > { %v1823_v11 = vsel %vm8315_vm10, %v1818_v34, %v1822_v0  ;;  %v1840_v4 = vrot.slane %v1838_v6, 4  ;;  %v781_v12 = vshrl.u32 %v445_v1, 16  ;;  %v1831_v25 = vor.u32 %v1830_v44, %v1827_v36  ;;  %v8616_v35 = vld [vmem:[#allocation2 + $0x38] sm:$0xf]  ;;  %v2179_v0 = vld [vmem:[#allocation2 + $0x40] sm:$0x8] }
  0xe4   : > { %v6339_v13 = vcombine.low %v1813_v48, %v1823_v11  ;;  %v6349_v14 = vrot.slane %v2219_v60, 11  ;;  %7001 = vmatprep.mubr.bf16.mxu1 %v6315_v19  ;;  %v2226_v40 = vrot.slane %v2224_v33, 7  ;;  %v2227_v8 = vshll.u32 %v8586_v10, 16  ;;  %v8631_v62 = vld [vmem:[#allocation2 + $0x44] sm:$0xf] }
  0xe5   : > { %v1460_v20 = vld [vmem:[#allocation2 + $0xfc] sm:$0x1]  ;;  %v1841_v59 = vor.u32 %v1840_v4, %v1836_v53  ;;  %v2233_v28 = vshrl.u32 %v8590_v58, 16  ;;  %v6276_v23 = vrot.slane %v781_v12, 11  ;;  %v1832_v43 = vrot.slane %v1831_v25, 4 }
  0xe6   : > { %7049 = vmatprep.mubr.bf16.mxu0 %v6339_v13  ;;  %v1844_v57 = vshll.u32 %v1460_v20, 16  ;;  %v2236_v52 = vshll.u32 %v8590_v58, 16  ;;  %v2229_v47 = vor.u32 %v2227_v8, %v2226_v40  ;;  %v2231_v17 = vrot.slane %v2226_v40, 4  ;;  %v8636_v13 = vld [vmem:[#allocation2 + $0x48] sm:$0xf] }
  0xe7   : > { %v1842_v5 = vrot.slane %v1841_v59, 4  ;;  %v2235_v21 = vrot.slane %v2233_v28, 7  ;;  %v792_v61 = vsel %vm7949_vm2, %v6276_v23, %v10000_v3  ;;  %v1837_v45 = vsel %vm8315_vm10, %v1832_v43, %v1836_v53  ;;  %v2182_v20 = vld [vmem:[#allocation2 + $0x50] sm:$0x8]  ;;  %v8643_v59 = vld [vmem:[#allocation2 + $0x54] sm:$0xf] }
  0xe8   : > { %v1846_v31 = vrot.slane %v1844_v57, 5  ;;  %v6389_v30 = vcombine.low %v8586_v10, %v8590_v58  ;;  %v6316_v39 = vcombine.low %v792_v61, %v801_v49  ;;  %v2230_v15 = vsel %vm7949_vm2, %v6349_v14, %v2229_v47  ;;  %v8645_v40 = vld [vmem:[#allocation2 + $0x58] sm:$0xf]  ;;  %v7486_v57 = vld [vmem:[#allocation6 + $0x170] sm:$0xff]  }
  0xe9   : > { %v2238_v54 = vor.u32 %v2236_v52, %v2235_v21  ;;  %v2241_v16 = vshrl.u32 %v2173_v2, 16  ;;  %v2246_v55 = vshrl.u32 %v8601_v22, 16  ;;  %v2249_v41 = vshll.u32 %v8601_v22, 16  ;;  %v7487_v61 = vld [vmem:[#allocation6 + $0x1b0] sm:$0xff]  }
  0xea   : > { %v1847_v32 = vsel %vm8315_vm10, %v1842_v5, %v1846_v31  ;;  %v2255_v51 = vshrl.u32 %v8603_v27, 16  ;;  %7002 = vmatmul.mubr.bf16.gmra.mxu1 %v6316_v39  ;;  %v2258_v24 = vshll.u32 %v8603_v27, 16  ;;  %v6390_v34 = vcombine.low %v8601_v22, %v8603_v27 }
  0xeb   : > { %v6340_v49 = vcombine.low %v1837_v45, %v1847_v32  ;;  %v2239_v38 = vsel %vm7949_vm2, %v2231_v17, %v2238_v54  ;;  %v6350_v10 = vrot.slane %v2241_v16, 11  ;;  %v2248_v36 = vrot.slane %v2246_v55, 7  ;;  %v7490_v45 = vld [vmem:[#allocation6 + $0x168] sm:$0xff]   ;;  %v8657_v54 = vld [vmem:[#allocation2 + $0x64] sm:$0xf] }
  0xec   : > { %v6365_v48 = vcombine.low %v2230_v15, %v2239_v38  ;;  %v2257_v50 = vrot.slane %v2255_v51, 7  ;;  %v2263_v26 = vshrl.u32 %v2176_v18, 16  ;;  %v2268_v6 = vshrl.u32 %v8614_v9, 16  ;;  %v2185_v15 = vld [vmem:[#allocation2 + $0x60] sm:$0x8]  ;;  %v7491_v38 = vld [vmem:[#allocation6 + $0x1a8] sm:$0xff]  }
  0xed   : > { %7050 = vmatmul.mubr.bf16.gmra.mxu0 %v6340_v49  ;;  %v2271_v58 = vshll.u32 %v8614_v9, 16  ;;  %v2277_v46 = vshrl.u32 %v8616_v35, 16  ;;  %v2251_v44 = vor.u32 %v2249_v41, %v2248_v36  ;;  %v2253_v60 = vrot.slane %v2248_v36, 4  ;;  %v8662_v55 = vld [vmem:[#allocation2 + $0x68] sm:$0xf] }
  0xee   : > { %7069 = vmatprep.mubr.bf16.mxu1 %v6365_v48  ;;  %7117 = vmatprep.mubr.bf16.mxu0 %v6389_v30  ;;  %v2260_v33 = vor.u32 %v2258_v24, %v2257_v50  ;;  %v2280_v19 = vshll.u32 %v8616_v35, 16  ;;  %v6351_v11 = vrot.slane %v2263_v26, 11  ;;  %v2270_v1 = vrot.slane %v2268_v6, 7 }
  0xef   : > { %v2279_v53 = vrot.slane %v2277_v46, 7  ;;  %v6391_v4 = vcombine.low %v8614_v9, %v8616_v35  ;;  %v2252_v12 = vsel %vm7949_vm2, %v6350_v10, %v2251_v44  ;;  %v2285_v14 = vshrl.u32 %v2179_v0, 16  ;;  %v2188_v10 = vld [vmem:[#allocation2 + $0x70] sm:$0x8] }
  0xf0   : > { %v2261_v25 = vsel %vm7949_vm2, %v2253_v60, %v2260_v33  ;;  %v2290_v2 = vshrl.u32 %v8631_v62, 16  ;;  %v2273_v28 = vor.u32 %v2271_v58, %v2270_v1  ;;  %v2275_v23 = vrot.slane %v2270_v1, 4  ;;  %v8675_v60 = vld [vmem:[#allocation2 + $0x74] sm:$0xf]  ;;  %v7494_v33 = vld [vmem:[#allocation6 + $0x160] sm:$0xff]  }
  0xf1   : > { %v6366_v8 = vcombine.low %v2252_v12, %v2261_v25  ;;  %v2282_v43 = vor.u32 %v2280_v19, %v2279_v53  ;;  %v6352_v52 = vrot.slane %v2285_v14, 11  ;;  %v2293_v5 = vshll.u32 %v8631_v62, 16 }
  0xf2   : > { %v2292_v22 = vrot.slane %v2290_v2, 7  ;;  %v2299_v47 = vshrl.u32 %v8636_v13, 16  ;;  %v2274_v17 = vsel %vm7949_vm2, %v6351_v11, %v2273_v28  ;;  %v2302_v27 = vshll.u32 %v8636_v13, 16 }
  0xf3   : > { %7070 = vmatmul.mubr.bf16.vlgmr.msra.gmra.mxu1 %v6366_v8  ;;  %v2283_v21 = vsel %vm7949_vm2, %v2275_v23, %v2282_v43  ;;  %v6392_v3 = vcombine.low %v8631_v62, %v8636_v13  ;;  %v2307_v16 = vshrl.u32 %v2182_v20, 16  ;;  %v2312_v9 = vshrl.u32 %v8643_v59, 16  ;;  %v2191_v20 = vld [vmem:[#allocation2 + $0x80] sm:$0x8]  ;;  %v8686_v43 = vld [vmem:[#allocation2 + $0x84] sm:$0xf] }
  0xf4   : > { %7150 = vmatpush3.bf16.msra.mxu1 %v8459_v7  ;;  %v6367_v31 = vcombine.low %v2274_v17, %v2283_v21  ;;  %v2295_v30 = vor.u32 %v2293_v5, %v2292_v22  ;;  %v2297_v18 = vrot.slane %v2292_v22, 4  ;;  %v2301_v39 = vrot.slane %v2299_v47, 7  ;;  %v2194_v21 = vld [vmem:[#allocation2 + $0x90] sm:$0x8] }
  0xf5   : > { %7118 = vmatmul.mubr.bf16.vlgmr.msra.gmra.mxu0 %v6390_v34  ;;  %7151 = vmatprep.subr.bf16.mxu1 %v7486_v57  ;;  %v2315_v35 = vshll.u32 %v8643_v59, 16  ;;  %v2321_v32 = vshrl.u32 %v8645_v40, 16  ;;  %v2324_v51 = vshll.u32 %v8645_v40, 16  ;;  %v6393_v49 = vcombine.low %v8643_v59, %v8645_v40  ;;  %v7495_v59 = vld [vmem:[#allocation6 + $0x1a0] sm:$0xff]  }
  0xf6   : > { %7198 = vmatpush3.bf16.msra.mxu0 %v8466_v29  ;;  %7073 = vmatprep.mubr.bf16.mxu1 %v6367_v31  ;;  %v2296_v7 = vsel %vm7949_vm2, %v6352_v52, %v2295_v30  ;;  %v2304_v41 = vor.u32 %v2302_v27, %v2301_v39  ;;  %v6353_v24 = vrot.slane %v2307_v16, 11  ;;  %v2314_v48 = vrot.slane %v2312_v9, 7  ;;  %v7498_v52 = vld [vmem:[#allocation6 + $0x158] sm:$0xff]  }
  0xf7   : > { %7121 = vmatprep.mubr.bf16.mxu0 %v6391_v4  ;;  %7199 = vmatprep.subr.bf16.mxu0 %v7487_v61  ;;  %v2323_v36 = vrot.slane %v2321_v32, 7  ;;  %v2329_v50 = vshrl.u32 %v2185_v15, 16  ;;  %v2334_v34 = vshrl.u32 %v8657_v54, 16  ;;  %v2337_v0 = vshll.u32 %v8657_v54, 16  ;;  %v8678_v4 = vld [vmem:[#allocation2 + $0x78] sm:$0xf] }
  0xf8   : > { %v2305_v29 = vsel %vm7949_vm2, %v2297_v18, %v2304_v41  ;;  %7152 = vmatpush3.bf16.msra.mxu1 %v7486_v57  ;;  %v2343_v26 = vshrl.u32 %v8662_v55, 16  ;;  %v2317_v58 = vor.u32 %v2315_v35, %v2314_v48  ;;  %v2319_v46 = vrot.slane %v2314_v48, 4  ;;  %v8688_v57 = vld [vmem:[#allocation2 + $0x88] sm:$0xf]  ;;  %v7499_v18 = vld [vmem:[#allocation6 + $0x198] sm:$0xff]  }
  0xf9   : > { %v6368_v6 = vcombine.low %v2296_v7, %v2305_v29  ;;  %v2326_v44 = vor.u32 %v2324_v51, %v2323_v36  ;;  %7153 = vmatprep.subr.bf16.mxu1 %v7490_v45  ;;  %v6354_v19 = vrot.slane %v2329_v50, 11  ;;  %v2336_v11 = vrot.slane %v2334_v34, 7  ;;  %v8707_v35 = vld [vmem:[#allocation2 + $0x94] sm:$0xf]  ;;  %v2197_v50 = vld [vmem:[#allocation2 + $0xa0] sm:$0x8] }
  0xfa   : > { %7200 = vmatpush3.bf16.msra.mxu0 %v7487_v61  ;;  %v2345_v1 = vrot.slane %v2343_v26, 7  ;;  %v2346_v53 = vshll.u32 %v8662_v55, 16  ;;  %v2318_v12 = vsel %vm7949_vm2, %v6353_v24, %v2317_v58  ;;  %v6394_v14 = vcombine.low %v8657_v54, %v8662_v55  ;;  %v7503_v29 = vld [vmem:[#allocation6 + $0x190] sm:$0xff]   ;;  %v8719_v58 = vld [vmem:[#allocation2 + $0xa4] sm:$0xf]  ;;  %v7507_v55 = vld [vmem:[#allocation6 + $0x188] sm:$0xff]  }
  0xfb   : > { %7074 = vmatmul.mubr.bf16.gmra.mxu1 %v6368_v6  ;;  %v2327_v25 = vsel %vm7949_vm2, %v2319_v46, %v2326_v44  ;;  %7201 = vmatprep.subr.bf16.mxu0 %v7491_v38  ;;  %v2351_v2 = vshrl.u32 %v2188_v10, 16  ;;  %v2339_v8 = vor.u32 %v2337_v0, %v2336_v11  ;;  %v2341_v28 = vrot.slane %v2336_v11, 4  ;;  %v8721_v46 = vld [vmem:[#allocation2 + $0xa8] sm:$0xf] }
  0xfc   : > { %v6369_v40 = vcombine.low %v2318_v12, %v2327_v25  ;;  %v2348_v23 = vor.u32 %v2346_v53, %v2345_v1  ;;  %7154 = vmatpush3.bf16.msra.mxu1 %v7490_v45  ;;  %v2356_v5 = vshrl.u32 %v8675_v60, 16  ;;  %v2359_v47 = vshll.u32 %v8675_v60, 16  ;;  %v7506_v11 = vld [vmem:[#allocation6 + $0x148] sm:$0xff]  }
  0xfd   : > { %7122 = vmatmul.mubr.bf16.gmra.mxu0 %v6392_v3  ;;  %v6355_v22 = vrot.slane %v2351_v2, 11  ;;  %v2365_v17 = vshrl.u32 %v8678_v4, 16  ;;  %7155 = vmatprep.subr.bf16.mxu1 %v7494_v33  ;;  %v2340_v27 = vsel %vm7949_vm2, %v6354_v19, %v2339_v8  ;;  %v2368_v62 = vshll.u32 %v8678_v4, 16 }
  0xfe   : > { %7077 = vmatprep.mubr.bf16.mxu1 %v6369_v40  ;;  %7125 = vmatprep.mubr.bf16.mxu0 %v6393_v49  ;;  %v2349_v61 = vsel %vm7949_vm2, %v2341_v28, %v2348_v23  ;;  %v6395_v13 = vcombine.low %v8675_v60, %v8678_v4  ;;  %v2358_v45 = vrot.slane %v2356_v5, 7  ;;  %v2373_v30 = vshrl.u32 %v2191_v20, 16  ;;  %v8709_v49 = vld [vmem:[#allocation2 + $0x98] sm:$0xf]  ;;  %v2200_v28 = vld [vmem:[#allocation2 + $0xb0] sm:$0x8] }
  0xff   : > { %v6370_v3 = vcombine.low %v2340_v27, %v2349_v61  ;;  %7202 = vmatpush3.bf16.msra.mxu0 %v7491_v38  ;;  %v2367_v31 = vrot.slane %v2365_v17, 7  ;;  %v2378_v39 = vshrl.u32 %v8686_v43, 16  ;;  %v2381_v15 = vshll.u32 %v8686_v43, 16  ;;  %v7502_v38 = vld [vmem:[#allocation6 + $0x150] sm:$0xff]   ;;  %v8739_v17 = vld [vmem:[#allocation2 + $0xb8] sm:$0xf] }
 0x100   : > { %v2387_v16 = vshrl.u32 %v8688_v57, 16  ;;  %v2390_v9 = vshll.u32 %v8688_v57, 16  ;;  %7156 = vmatpush3.bf16.msra.mxu1 %v7494_v33  ;;  %7203 = vmatprep.subr.bf16.mxu0 %v7495_v59  ;;  %v2361_v32 = vor.u32 %v2359_v47, %v2358_v45  ;;  %v2363_v7 = vrot.slane %v2358_v45, 4  ;;  %v8734_v23 = vld [vmem:[#allocation2 + $0xb4] sm:$0xf]  ;;  %v7510_v45 = vld [vmem:[#allocation6 + $0x140] sm:$0xff]  }
 0x101   : > { %v2370_v41 = vor.u32 %v2368_v62, %v2367_v31  ;;  %v6356_v51 = vrot.slane %v2373_v30, 11  ;;  %7157 = vmatprep.subr.bf16.mxu1 %v7498_v52  ;;  %v2380_v10 = vrot.slane %v2378_v39, 7  ;;  %v6396_v48 = vcombine.low %v8686_v43, %v8688_v57 }
 0x102   : > { %v2389_v24 = vrot.slane %v2387_v16, 7  ;;  %v2395_v36 = vshrl.u32 %v2194_v21, 16  ;;  %v2362_v34 = vsel %vm7949_vm2, %v6355_v22, %v2361_v32  ;;  %v2400_v26 = vshrl.u32 %v8707_v35, 16 }
 0x103   : > { %7078 = vmatmul.mubr.bf16.gmra.mxu1 %v6370_v3  ;;  %v2371_v0 = vsel %vm7949_vm2, %v2363_v7, %v2370_v41  ;;  %7204 = vmatpush3.bf16.msra.mxu0 %v7495_v59  ;;  %v2403_v6 = vshll.u32 %v8707_v35, 16  ;;  %v2383_v60 = vor.u32 %v2381_v15, %v2380_v10  ;;  %v2385_v33 = vrot.slane %v2380_v10, 4  ;;  %v8746_v3 = vld [vmem:[#allocation2 + $0xc4] sm:$0xf] }
 0x104   : > { %v6371_v44 = vcombine.low %v2362_v34, %v2371_v0  ;;  %v2392_v19 = vor.u32 %v2390_v9, %v2389_v24  ;;  %7158 = vmatpush3.bf16.msra.mxu1 %v7498_v52  ;;  %7205 = vmatprep.subr.bf16.mxu0 %v7499_v18  ;;  %v6357_v1 = vrot.slane %v2395_v36, 11  ;;  %v2402_v53 = vrot.slane %v2400_v26, 7  ;;  %v2206_v0 = vld [vmem:[#allocation2 + $0xd0] sm:$0x8] }
 0x105   : > { %7126 = vmatmul.mubr.bf16.gmra.mxu0 %v6394_v14  ;;  %v2409_v4 = vshrl.u32 %v8709_v49, 16  ;;  %v2412_v12 = vshll.u32 %v8709_v49, 16  ;;  %7159 = vmatprep.subr.bf16.mxu1 %v7502_v38  ;;  %v2384_v25 = vsel %vm7949_vm2, %v6356_v51, %v2383_v60  ;;  %v6397_v20 = vcombine.low %v8707_v35, %v8709_v49  ;;  %v7511_v49 = vld [vmem:[#allocation6 + $0x180] sm:$0xff]  }
 0x106   : > { %7081 = vmatprep.mubr.bf16.mxu1 %v6371_v44  ;;  %7129 = vmatprep.mubr.bf16.mxu0 %v6395_v13  ;;  %v2393_v2 = vsel %vm7949_vm2, %v2385_v33, %v2392_v19  ;;  %v2417_v54 = vshrl.u32 %v2197_v50, 16  ;;  %v2405_v59 = vor.u32 %v2403_v6, %v2402_v53  ;;  %v2407_v40 = vrot.slane %v2402_v53, 4  ;;  %v2203_v13 = vld [vmem:[#allocation2 + $0xc0] sm:$0x8]  ;;  %v8759_v50 = vld [vmem:[#allocation2 + $0xc8] sm:$0xf] }
 0x107   : > { %v6372_v14 = vcombine.low %v2384_v25, %v2393_v2  ;;  %v2411_v8 = vrot.slane %v2409_v4, 7  ;;  %7206 = vmatpush3.bf16.msra.mxu0 %v7499_v18  ;;  %v2422_v22 = vshrl.u32 %v8719_v58, 16  ;;  %v2425_v5 = vshll.u32 %v8719_v58, 16  ;;  %v8768_v33 = vld [vmem:[#allocation2 + $0xd4] sm:$0xf] }
 0x108   : > { %v6358_v52 = vrot.slane %v2417_v54, 11  ;;  %v2431_v47 = vshrl.u32 %v8721_v46, 16  ;;  %7160 = vmatpush3.bf16.msra.mxu1 %v7502_v38  ;;  %7207 = vmatprep.subr.bf16.mxu0 %v7503_v29  ;;  %v2406_v21 = vsel %vm7949_vm2, %v6357_v1, %v2405_v59  ;;  %v2434_v61 = vshll.u32 %v8721_v46, 16  ;;  %v8770_v19 = vld [vmem:[#allocation2 + $0xd8] sm:$0xf] }
 0x109   : > { %v2414_v27 = vor.u32 %v2412_v12, %v2411_v8  ;;  %v6398_v62 = vcombine.low %v8719_v58, %v8721_v46  ;;  %7161 = vmatprep.subr.bf16.mxu1 %v7506_v11  ;;  %v2424_v31 = vrot.slane %v2422_v22, 7  ;;  %v2439_v18 = vshrl.u32 %v2200_v28, 16  ;;  %v2209_v25 = vld [vmem:[#allocation2 + $0xe0] sm:$0x8]  ;;  %v8805_v46 = vld [vmem:[#allocation2 + $0xf4] sm:$0xf] }
 0x10a   : > { %v2433_v30 = vrot.slane %v2431_v47, 7  ;;  %v2444_v39 = vshrl.u32 %v8734_v23, 16  ;;  %v2447_v16 = vshll.u32 %v8734_v23, 16  ;;  %v2453_v9 = vshrl.u32 %v8739_v17, 16  ;;  %v8789_v47 = vld [vmem:[#allocation2 + $0xe8] sm:$0xf] }
 0x10b   : > { %7082 = vmatmul.mubr.bf16.gmra.mxu1 %v6372_v14  ;;  %v2415_v15 = vsel %vm7949_vm2, %v2407_v40, %v2414_v27  ;;  %v2456_v35 = vshll.u32 %v8739_v17, 16  ;;  %7208 = vmatpush3.bf16.msra.mxu0 %v7503_v29  ;;  %v2427_v7 = vor.u32 %v2425_v5, %v2424_v31  ;;  %v2429_v41 = vrot.slane %v2424_v31, 4  ;;  %v8761_v29 = vld [vmem:[#allocation6 + $0x1f8] sm:$0xff]   ;;  %v8783_v14 = vld [vmem:[#allocation2 + $0xe4] sm:$0xf] }
 0x10c   : > { %v6373_v32 = vcombine.low %v2406_v21, %v2415_v15  ;;  %v2436_v51 = vor.u32 %v2434_v61, %v2433_v30  ;;  %7162 = vmatpush3.bf16.msra.mxu1 %v7506_v11  ;;  %7209 = vmatprep.subr.bf16.mxu0 %v7507_v55  ;;  %v6359_v38 = vrot.slane %v2439_v18, 11  ;;  %v2446_v10 = vrot.slane %v2444_v39, 7  ;;  %v8772_v11 = vld [vmem:[#allocation6 + $0x238] sm:$0xff]  }
 0x10d   : > { %7130 = vmatmul.mubr.bf16.gmra.mxu0 %v6396_v48  ;;  %v2455_v24 = vrot.slane %v2453_v9, 7  ;;  %v6399_v36 = vcombine.low %v8734_v23, %v8739_v17  ;;  %7163 = vmatprep.subr.bf16.mxu1 %v7510_v45  ;;  %v2428_v34 = vsel %vm7949_vm2, %v6358_v52, %v2427_v7  ;;  %v2461_v57 = vshrl.u32 %v2203_v13, 16  ;;  %v2212_v9 = vld [vmem:[#allocation2 + $0xf0] sm:$0x8] }
 0x10e   : > { %7085 = vmatprep.mubr.bf16.mxu1 %v6373_v32  ;;  %7133 = vmatprep.mubr.bf16.mxu0 %v6397_v20  ;;  %v2437_v43 = vsel %vm7949_vm2, %v2429_v41, %v2436_v51  ;;  %v2466_v48 = vshrl.u32 %v8746_v3, 16  ;;  %v2449_v6 = vor.u32 %v2447_v16, %v2446_v10  ;;  %v2451_v44 = vrot.slane %v2446_v10, 4 }
 0x10f   : > { %v6374_v26 = vcombine.low %v2428_v34, %v2437_v43  ;;  %v2458_v60 = vor.u32 %v2456_v35, %v2455_v24  ;;  %7210 = vmatpush3.bf16.msra.mxu0 %v7507_v55  ;;  %v6360_v1 = vrot.slane %v2461_v57, 11  ;;  %v2469_v4 = vshll.u32 %v8746_v3, 16  ;;  %v349_v43 = vld [vmem:[#allocation2 + $0x100] sm:$0x8] }
 0x110   : > { %v2468_v53 = vrot.slane %v2466_v48, 7  ;;  %v2475_v12 = vshrl.u32 %v8759_v50, 16  ;;  %7164 = vmatpush3.bf16.msra.mxu1 %v7510_v45  ;;  %7211 = vmatprep.subr.bf16.mxu0 %v7511_v49  ;;  %v2450_v2 = vsel %vm7949_vm2, %v6359_v38, %v2449_v6  ;;  %v2478_v54 = vshll.u32 %v8759_v50, 16  ;;  %v8808_v38 = vld [vmem:[#allocation2 + $0xf8] sm:$0xf] }
 0x111   : > { %v2459_v20 = vsel %vm7949_vm2, %v2451_v44, %v2458_v60  ;;  %v6400_v55 = vcombine.low %v8746_v3, %v8759_v50  ;;  %7245 = vmatprep.subr.bf16.mxu1 %v8761_v29  ;;  %v2483_v23 = vshrl.u32 %v2206_v0, 16  ;;  %v2488_v52 = vshrl.u32 %v8768_v33, 16  ;;  %v8816_v6 = vld [vmem:[#allocation2 + $0x104] sm:$0xf]  ;;  %v8818_v44 = vld [vmem:[#allocation2 + $0x108] sm:$0xf] }
 0x112   : > { %v6375_v59 = vcombine.low %v2450_v2, %v2459_v20  ;;  %v2471_v40 = vor.u32 %v2469_v4, %v2468_v53  ;;  %v2473_v8 = vrot.slane %v2468_v53, 4  ;;  %v2477_v28 = vrot.slane %v2475_v12, 7  ;;  %v3246_v53 = vld [vmem:[#allocation2 + $0x14] sm:$0xf] }
 0x113   : > { %7086 = vmatmul.mubr.bf16.gmra.mxu1 %v6374_v26  ;;  %v2491_v22 = vshll.u32 %v8768_v33, 16  ;;  %v2497_v5 = vshrl.u32 %v8770_v19, 16  ;;  %7212 = vmatpush3.bf16.msra.mxu0 %v7511_v49  ;;  %v2500_v27 = vshll.u32 %v8770_v19, 16  ;;  %v6401_v61 = vcombine.low %v8768_v33, %v8770_v19 }
 0x114   : > { %7089 = vmatprep.mubr.bf16.mxu1 %v6375_v59  ;;  %v2472_v17 = vsel %vm7949_vm2, %v6360_v1, %v2471_v40  ;;  %v2480_v21 = vor.u32 %v2478_v54, %v2477_v28  ;;  %7293 = vmatprep.subr.bf16.mxu0 %v8772_v11  ;;  %v6361_v13 = vrot.slane %v2483_v23, 11  ;;  %v2490_v45 = vrot.slane %v2488_v52, 7  ;;  %v3247_v52 = vld [vmem:[#allocation2 + $0x18] sm:$0xf] }
 0x115   : > { %7134 = vmatmul.mubr.bf16.gmra.mxu0 %v6398_v62  ;;  %v2499_v31 = vrot.slane %v2497_v5, 7  ;;  %v2505_v30 = vshrl.u32 %v2209_v25, 16  ;;  %v2510_v39 = vshrl.u32 %v8783_v14, 16  ;;  %v2513_v15 = vshll.u32 %v8783_v14, 16 }
 0x116   : > { %7137 = vmatprep.mubr.bf16.mxu0 %v6399_v36  ;;  %v2481_v18 = vsel %vm7949_vm2, %v2473_v8, %v2480_v21  ;;  %v2519_v16 = vshrl.u32 %v8789_v47, 16  ;;  %v2493_v32 = vor.u32 %v2491_v22, %v2490_v45  ;;  %v2495_v7 = vrot.slane %v2490_v45, 4 }
 0x117   : > { %v6376_v35 = vcombine.low %v2472_v17, %v2481_v18  ;;  %v2502_v58 = vor.u32 %v2500_v27, %v2499_v31  ;;  %v6362_v62 = vrot.slane %v2505_v30, 11  ;;  %v2512_v41 = vrot.slane %v2510_v39, 7  ;;  %v3248_v17 = vld [vmem:[#allocation2 + $0x1c] sm:$0x1]  ;;  %v4001_v30 = vld [vmem:[#allocation2 + $0x20] sm:$0x8] }
 0x118   : > { %v2521_v51 = vrot.slane %v2519_v16, 7  ;;  %v2522_v49 = vshll.u32 %v8789_v47, 16  ;;  %v2494_v10 = vsel %vm7949_vm2, %v6361_v13, %v2493_v32  ;;  %v6402_v36 = vcombine.low %v8783_v14, %v8789_v47  ;;  %v4002_v18 = vld [vmem:[#allocation2 + $0x24] sm:$0xf] }
 0x119   : > { %v2503_v24 = vsel %vm7949_vm2, %v2495_v7, %v2502_v58  ;;  %v2527_v34 = vshrl.u32 %v2212_v9, 16  ;;  %v2515_v48 = vor.u32 %v2513_v15, %v2512_v41  ;;  %v2517_v0 = vrot.slane %v2512_v41, 4 }
 0x11a   : > { %v6377_v57 = vcombine.low %v2494_v10, %v2503_v24  ;;  %v2524_v26 = vor.u32 %v2522_v49, %v2521_v51  ;;  %v2532_v33 = vshrl.u32 %v8805_v46, 16  ;;  %v2535_v19 = vshll.u32 %v8805_v46, 16 }
 0x11b   : > { %7090 = vmatmul.mubr.bf16.gmra.mxu1 %v6376_v35  ;;  %v6363_v60 = vrot.slane %v2527_v34, 11  ;;  %v2541_v1 = vshrl.u32 %v8808_v38, 16  ;;  %v2516_v4 = vsel %vm7949_vm2, %v6362_v62, %v2515_v48  ;;  %v2544_v25 = vshll.u32 %v8808_v38, 16  ;;  %v4003_v35 = vld [vmem:[#allocation2 + $0x28] sm:$0xf] }
 0x11c   : > { %7093 = vmatprep.mubr.bf16.mxu1 %v6377_v57  ;;  %v2525_v12 = vsel %vm7949_vm2, %v2517_v0, %v2524_v26  ;;  %v6403_v2 = vcombine.low %v8805_v46, %v8808_v38  ;;  %v2534_v54 = vrot.slane %v2532_v33, 7  ;;  %v350_v59 = vsel %vm8233_vm6, 0, %v349_v43  ;;  %v3249_v57 = vld [vmem:[#allocation2 + $0x24] sm:$0xf]  ;;  %v3250_v33 = vld [vmem:[#allocation2 + $0x28] sm:$0xf] }
 0x11d   : > { %7138 = vmatmul.mubr.bf16.gmra.mxu0 %v6400_v55  ;;  %v6378_v20 = vcombine.low %v2516_v4, %v2525_v12  ;;  %v2543_v14 = vrot.slane %v2541_v1, 7  ;;  %351 = vst [vmem:[#allocation2 + $0x100] sm:$0x8] %v350_v59  ;;  %v2554_v40 = vshrl.u32 %v8816_v6, 16  ;;  %v2557_v8 = vshll.u32 %v8816_v6, 16 }
 0x11e   : > { %7141 = vmatprep.mubr.bf16.mxu0 %v6401_v61  ;;  %v2563_v28 = vshrl.u32 %v8818_v44, 16  ;;  %v2566_v23 = vshll.u32 %v8818_v44, 16  ;;  %v2537_v22 = vor.u32 %v2535_v19, %v2534_v54  ;;  %v2539_v3 = vrot.slane %v2534_v54, 4  ;;  %v3251_v12 = vld [vmem:[#allocation2 + $0x2c] sm:$0x1] }
 0x11f   : > { %v2546_v50 = vor.u32 %v2544_v25, %v2543_v14  ;;  %v6404_v55 = vcombine.low %v8816_v6, %v8818_v44  ;;  %v2556_v5 = vrot.slane %v2554_v40, 7  ;;  %v3295_v21 = vshrl.u32 %v3246_v53, 16  ;;  %v4004_v25 = vld [vmem:[#allocation2 + $0x30] sm:$0x8] }
 0x120   : > { %v2565_v47 = vrot.slane %v2563_v28, 7  ;;  %v3298_v27 = vshll.u32 %v3246_v53, 16  ;;  %v2538_v61 = vsel %vm7949_vm2, %v6363_v60, %v2537_v22  ;;  %v3304_v45 = vshll.u32 %v3247_v52, 16 }
 0x121   : > { %v2547_v13 = vsel %vm7949_vm2, %v2539_v3, %v2546_v50  ;;  %v3308_v31 = vshrl.u32 %v3247_v52, 16  ;;  %v2559_v15 = vor.u32 %v2557_v8, %v2556_v5  ;;  %v2561_v16 = vrot.slane %v2556_v5, 4  ;;  %v4005_v3 = vld [vmem:[#allocation2 + $0x34] sm:$0xf] }
 0x122   : > { %v6379_v39 = vcombine.low %v2538_v61, %v2547_v13  ;;  %v2568_v9 = vor.u32 %v2566_v23, %v2565_v47  ;;  %v3297_v32 = vrot.slane %v3295_v21, 4  ;;  %v3300_v7 = vrot.slane %v3298_v27, 5  ;;  %v4006_v21 = vld [vmem:[#allocation2 + $0x38] sm:$0xf] }
 0x123   : > { %7094 = vmatmul.mubr.bf16.gmra.mxu1 %v6378_v20  ;;  %v3306_v58 = vrot.slane %v3304_v45, 5  ;;  %v3310_v46 = vrot.slane %v3308_v31, 4  ;;  %v3314_v41 = vshll.u32 %v3248_v17, 16  ;;  %v4050_v51 = vshrl.u32 %v4001_v30, 16  ;;  %v3252_v31 = vld [vmem:[#allocation2 + $0x34] sm:$0xf] }
 0x124   : > { %7097 = vmatprep.mubr.bf16.mxu1 %v6379_v39  ;;  %v2569_v62 = vsel %vm7949_vm2, %v2561_v16, %v2568_v9  ;;  %v4055_v49 = vshrl.u32 %v4002_v18, 16  ;;  %v2215_v38 = vld [vmem:[#allocation2 + $0x100] sm:$0x8]  ;;  %v3301_v10 = vor.u32 %v3300_v7, %v3297_v32  ;;  %v4058_v34 = vshll.u32 %v4002_v18, 16  ;;  %v3253_v16 = vld [vmem:[#allocation2 + $0x38] sm:$0xf] }
 0x125   : > { %7142 = vmatmul.mubr.bf16.gmra.mxu0 %v6402_v36  ;;  %v3311_v24 = vor.u32 %v3310_v46, %v3306_v58  ;;  %v4064_v43 = vshrl.u32 %v4003_v35, 16  ;;  %v2549_v48 = vshrl.u32 %v2215_v38, 16  ;;  %v3316_v0 = vrot.slane %v3314_v41, 5  ;;  %v3254_v41 = vld [vmem:[#allocation2 + $0x3c] sm:$0x1] }
 0x126   : > { %7145 = vmatprep.mubr.bf16.mxu0 %v6403_v2  ;;  %v6437_v26 = vrot.slane %v4050_v51, 11  ;;  %v4057_v60 = vrot.slane %v4055_v49, 7  ;;  %v3302_v19 = vrot.slane %v3301_v10, 4  ;;  %v4067_v4 = vshll.u32 %v4003_v35, 16 }
 0x127   : > { %v3312_v1 = vrot.slane %v3311_v24, 4  ;;  %v4066_v53 = vrot.slane %v4064_v43, 7  ;;  %v6364_v20 = vrot.slane %v2549_v48, 11  ;;  %v3319_v14 = vshrl.u32 %v3249_v57, 16 }
 0x128   : > { %v4060_v36 = vor.u32 %v4058_v34, %v4057_v60  ;;  %v4062_v54 = vrot.slane %v4057_v60, 4  ;;  %v3307_v59 = vsel %vm8315_vm10, %v3302_v19, %v3306_v58  ;;  %v3322_v8 = vshll.u32 %v3249_v57, 16 }
 0x129   : > { %v3317_v2 = vsel %vm8315_vm10, %v3312_v1, %v3316_v0  ;;  %v4069_v40 = vor.u32 %v4067_v4, %v4066_v53  ;;  %v2560_v28 = vsel %vm7949_vm2, %v6364_v20, %v2559_v15  ;;  %v3321_v22 = vrot.slane %v3319_v14, 4  ;;  %v4008_v0 = vld [vmem:[#allocation2 + $0x44] sm:$0xf]  ;;  %v4009_v1 = vld [vmem:[#allocation2 + $0x48] sm:$0xf] }
 0x12a   : > { %v6413_v23 = vcombine.low %v3307_v59, %v3317_v2  ;;  %v4061_v52 = vsel %vm7949_vm2, %v6437_v26, %v4060_v36  ;;  %v6380_v50 = vcombine.low %v2560_v28, %v2569_v62  ;;  %v3324_v47 = vrot.slane %v3322_v8, 5  ;;  %v3255_v53 = vld [vmem:[#allocation2 + $0x44] sm:$0xf] }
 0x12b   : > { %v4070_v5 = vsel %vm7949_vm2, %v4062_v54, %v4069_v40  ;;  %v3328_v17 = vshll.u32 %v3250_v33, 16  ;;  %v3332_v61 = vshrl.u32 %v3250_v33, 16  ;;  %v3338_v13 = vshll.u32 %v3251_v12, 16 }
 0x12c   : > { %v6453_v27 = vcombine.low %v4061_v52, %v4070_v5  ;;  %v4072_v45 = vshrl.u32 %v4004_v25, 16  ;;  %7098 = vmatmul.mubr.bf16.gmra.mxu1 %v6380_v50  ;;  %v3325_v30 = vor.u32 %v3324_v47, %v3321_v22  ;;  %v4077_v39 = vshrl.u32 %v4005_v3, 16  ;;  %v7514_v50 = vld [vmem:[#allocation6 + $0x1f0] sm:$0xff]  }
 0x12d   : > { %7146 = vmatmul.mubr.bf16.gmra.mxu0 %v6404_v55  ;;  %v3330_v18 = vrot.slane %v3328_v17, 5  ;;  %v4080_v15 = vshll.u32 %v4005_v3, 16  ;;  %7165 = vmatprep.mubr.bf16.mxu1 %v6413_v23  ;;  %v3334_v9 = vrot.slane %v3332_v61, 4  ;;  %v3340_v35 = vrot.slane %v3338_v13, 5  ;;  %v4007_v55 = vld [vmem:[#allocation2 + $0x40] sm:$0x8] }
 0x12e   : > { %7213 = vmatprep.mubr.bf16.mxu0 %v6453_v27  ;;  %v6438_v32 = vrot.slane %v4072_v45, 11  ;;  %v4086_v7 = vshrl.u32 %v4006_v21, 16  ;;  %v3326_v58 = vrot.slane %v3325_v30, 4  ;;  %v4079_v46 = vrot.slane %v4077_v39, 7  ;;  %v8860_v10 = vpop.f32.mrf.mxu0  ;;  %v8862_v24 = vpop.f32.mrf.mxu1  ;;  %v7515_v5 = vld [vmem:[#allocation6 + $0x230] sm:$0xff]  }
 0x12f   : > { %v4089_v62 = vshll.u32 %v4006_v21, 16  ;;  %v3343_v51 = vshrl.u32 %v3252_v31, 16  ;;  %v3335_v49 = vor.u32 %v3334_v9, %v3330_v18  ;;  %v3346_v6 = vshll.u32 %v3252_v31, 16  ;;  %10001 = vst [vmem:[#allocation15_spill] sm:$0xff] %v8862_v24  ;;  %v3256_v61 = vld [vmem:[#allocation2 + $0x48] sm:$0xf] }
 0x130   : > { %v4088_v38 = vrot.slane %v4086_v7, 7  ;;  %v3352_v44 = vshll.u32 %v3253_v16, 16  ;;  %v3331_v34 = vsel %vm8315_vm10, %v3326_v58, %v3330_v18  ;;  %v4082_v43 = vor.u32 %v4080_v15, %v4079_v46  ;;  %v8868_v4 = vpop.f32.mrf.mxu0  ;;  %v8870_v12 = vpop.f32.mrf.mxu1  ;;  %v3257_v39 = vld [vmem:[#allocation2 + $0x4c] sm:$0x1]  ;;  %v4010_v7 = vld [vmem:[#allocation2 + $0x50] sm:$0x8] }
 0x131   : > { %v4084_v57 = vrot.slane %v4079_v46, 4  ;;  %v3345_v48 = vrot.slane %v3343_v51, 4  ;;  %v3336_v26 = vrot.slane %v3335_v49, 4  ;;  %v3348_v33 = vrot.slane %v3346_v6, 5  ;;  %10002 = vst [vmem:[#allocation16_spill] sm:$0xff] %v8870_v12 }
 0x132   : > { %v4091_v60 = vor.u32 %v4089_v62, %v4088_v38  ;;  %v8866_v19 = vrot.slane %v3352_v44, 5  ;;  %v4083_v25 = vsel %vm7949_vm2, %v6438_v32, %v4082_v43  ;;  %v3356_v20 = vshrl.u32 %v3253_v16, 16  ;;  %v8878_v8 = vpop.f32.mrf.mxu0  ;;  %v8880_v28 = vpop.f32.mrf.mxu1  ;;  %v3276_v12 = vld [vmem:[#allocation2 + $0xb4] sm:$0xf] }
 0x133   : > { %v3362_v36 = vshll.u32 %v3254_v41, 16  ;;  %v4094_v54 = vshrl.u32 %v4007_v55, 16  ;;  %v3341_v14 = vsel %vm8315_vm10, %v3336_v26, %v3340_v35  ;;  %v3349_v2 = vor.u32 %v3348_v33, %v3345_v48  ;;  %10003 = vst [vmem:[#allocation19_spill] sm:$0xff] %v8880_v28  ;;  %v4030_v28 = vld [vmem:[#allocation2 + $0xb8] sm:$0xf] }
 0x134   : > { %v4092_v59 = vsel %vm7949_vm2, %v4084_v57, %v4091_v60  ;;  %v4099_v40 = vshrl.u32 %v4008_v0, 16  ;;  %v6414_v23 = vcombine.low %v3331_v34, %v3341_v14  ;;  %v3358_v22 = vrot.slane %v3356_v20, 4  ;;  %v8882_v13 = vpop.f32.mrf.mxu0  ;;  %v8884_v45 = vpop.f32.mrf.mxu1  ;;  %v4011_v34 = vld [vmem:[#allocation2 + $0x54] sm:$0xf]  ;;  %v4012_v60 = vld [vmem:[#allocation2 + $0x58] sm:$0xf] }
 0x135   : > { %v6454_v52 = vcombine.low %v4083_v25, %v4092_v59  ;;  %v3364_v3 = vrot.slane %v3362_v36, 5  ;;  %v3350_v47 = vrot.slane %v3349_v2, 4  ;;  %v6439_v17 = vrot.slane %v4094_v54, 11  ;;  %10004 = vst [vmem:[#allocation17_spill] sm:$0xff] %v8884_v45  ;;  %v3258_v20 = vld [vmem:[#allocation2 + $0x54] sm:$0xf] }
 0x136   : > { %v4101_v21 = vrot.slane %v4099_v40, 7  ;;  %v4102_v27 = vshll.u32 %v4008_v0, 16  ;;  %7166 = vmatmul.mubr.bf16.vlgmr.msra.gmra.mxu1 %v6414_v23  ;;  %v3359_v31 = vor.u32 %v3358_v22, %v8866_v19  ;;  %v4108_v30 = vshrl.u32 %v4009_v1, 16  ;;  %v8892_v58 = vpop.f32.mrf.mxu0  ;;  %v8894_v46 = vpop.f32.mrf.mxu1  ;;  %v7518_v36 = vld [vmem:[#allocation6 + $0x1e0] sm:$0xff]  }
 0x137   : > { %7214 = vmatmul.mubr.bf16.vlgmr.msra.gmra.mxu0 %v6454_v52  ;;  %v4111_v18 = vshll.u32 %v4009_v1, 16  ;;  %v3367_v15 = vshrl.u32 %v3255_v53, 16  ;;  %7246 = vmatpush3.bf16.msra.mxu1 %v8761_v29  ;;  %v3355_v16 = vsel %vm8315_vm10, %v3350_v47, %v8866_v19  ;;  %v3370_v32 = vshll.u32 %v3255_v53, 16  ;;  %10005 = vst [vmem:[#allocation18_spill] sm:$0xff] %v8894_v46  ;;  %v7516_v29 = vld [vmem:[#allocation6 + $0x1e8] sm:$0xff]   ;;  %v7519_v22 = vld [vmem:[#allocation6 + $0x220] sm:$0xff]  }
 0x138   : > { %7294 = vmatpush3.bf16.msra.mxu0 %v8772_v11  ;;  %v4104_v9 = vor.u32 %v4102_v27, %v4101_v21  ;;  %v4106_v35 = vrot.slane %v4101_v21, 4  ;;  %v3360_v62 = vrot.slane %v3359_v31, 4  ;;  %v4110_v41 = vrot.slane %v4108_v30, 7  ;;  %7247 = vmatprep.subr.bf16.mxu1 %v7514_v50  ;;  %v7517_v11 = vld [vmem:[#allocation6 + $0x228] sm:$0xff]   ;;  %v8898_v43 = vpop.f32.mrf.mxu0  ;;  %v8900_v57 = vpop.f32.mrf.mxu1  ;;  %v3259_v52 = vld [vmem:[#allocation2 + $0x58] sm:$0xf] }
 0x139   : > { %v3369_v51 = vrot.slane %v3367_v15, 4  ;;  %v3376_v49 = vshll.u32 %v3256_v61, 16  ;;  %7295 = vmatprep.subr.bf16.mxu0 %v7515_v5  ;;  %v3372_v6 = vrot.slane %v3370_v32, 5  ;;  %v3380_v44 = vshrl.u32 %v3256_v61, 16  ;;  %10006 = vst [vmem:[#allocation22_spill] sm:$0xff] %v8900_v57 }
 0x13a   : > { %v4105_v38 = vsel %vm7949_vm2, %v6439_v17, %v4104_v9  ;;  %v3386_v55 = vshll.u32 %v3257_v39, 16  ;;  %v3365_v48 = vsel %vm8315_vm10, %v3360_v62, %v3364_v3  ;;  %v4113_v0 = vor.u32 %v4111_v18, %v4110_v41  ;;  %v8904_v54 = vpop.f32.mrf.mxu0  ;;  %v8906_v14 = vpop.f32.mrf.mxu1  ;;  %v3260_v17 = vld [vmem:[#allocation2 + $0x5c] sm:$0x1]  ;;  %v4013_v39 = vld [vmem:[#allocation2 + $0x60] sm:$0x8] }
 0x13b   : > { %v3378_v26 = vrot.slane %v3376_v49, 5  ;;  %v4116_v33 = vshrl.u32 %v4010_v7, 16  ;;  %v6415_v19 = vcombine.low %v3355_v16, %v3365_v48  ;;  %v3373_v1 = vor.u32 %v3372_v6, %v3369_v51  ;;  %7248 = vmatpush3.bf16.msra.mxu1 %v7514_v50  ;;  %10007 = vst [vmem:[#allocation21_spill] sm:$0xff] %v8906_v14  ;;  %v7521_v48 = vld [vmem:[#allocation6 + $0x218] sm:$0xff]   ;;  %v4028_v57 = vld [vmem:[#allocation2 + $0xb0] sm:$0x8] }
 0x13c   : > { %v3382_v53 = vrot.slane %v3380_v44, 4  ;;  %v3388_v25 = vrot.slane %v3386_v55, 5  ;;  %7296 = vmatpush3.bf16.msra.mxu0 %v7515_v5  ;;  %v4114_v59 = vsel %vm7949_vm2, %v4106_v35, %v4113_v0  ;;  %v4121_v40 = vshrl.u32 %v4011_v34, 16  ;;  %7249 = vmatprep.subr.bf16.mxu1 %v7516_v29  ;;  %v8910_v21 = vpop.f32.mrf.mxu0  ;;  %v8912_v27 = vpop.f32.mrf.mxu1 }
 0x13d   : > { %v6440_v2 = vrot.slane %v4116_v33, 11  ;;  %v4124_v23 = vshll.u32 %v4011_v34, 16  ;;  %7297 = vmatprep.subr.bf16.mxu0 %v7517_v11  ;;  %7169 = vmatprep.mubr.bf16.mxu1 %v6415_v19  ;;  %v6455_v3 = vcombine.low %v4105_v38, %v4114_v59  ;;  %v3374_v50 = vrot.slane %v3373_v1, 4  ;;  %10008 = vst [vmem:[#allocation23_spill] sm:$0xff] %v8912_v27  ;;  %v4014_v38 = vld [vmem:[#allocation2 + $0x64] sm:$0xf] }
 0x13e   : > { %v3383_v5 = vor.u32 %v3382_v53, %v3378_v26  ;;  %v4130_v47 = vshrl.u32 %v4012_v60, 16  ;;  %v4123_v61 = vrot.slane %v4121_v40, 7  ;;  %v4133_v31 = vshll.u32 %v4012_v60, 16  ;;  %v8916_v32 = vpop.f32.mrf.mxu0  ;;  %v8918_v7 = vpop.f32.mrf.mxu1  ;;  %v4015_v1 = vld [vmem:[#allocation2 + $0x68] sm:$0xf] }
 0x13f   : > { %v3391_v30 = vshrl.u32 %v3258_v20, 16  ;;  %v3394_v18 = vshll.u32 %v3258_v20, 16  ;;  %7217 = vmatprep.mubr.bf16.mxu0 %v6455_v3  ;;  %v3379_v15 = vsel %vm8315_vm10, %v3374_v50, %v3378_v26  ;;  %v3400_v35 = vshll.u32 %v3259_v52, 16  ;;  %7250 = vmatpush3.bf16.msra.mxu1 %v7516_v29  ;;  %10009 = vst [vmem:[#allocation24_spill] sm:$0xff] %v8918_v7  ;;  %v7520_v29 = vld [vmem:[#allocation6 + $0x1d8] sm:$0xff]  }
 0x140   : > { %v3384_v16 = vrot.slane %v3383_v5, 4  ;;  %v4132_v9 = vrot.slane %v4130_v47, 7  ;;  %v4126_v62 = vor.u32 %v4124_v23, %v4123_v61  ;;  %v4128_v41 = vrot.slane %v4123_v61, 4  ;;  %7298 = vmatpush3.bf16.msra.mxu0 %v7517_v11  ;;  %7251 = vmatprep.subr.bf16.mxu1 %v7518_v36  ;;  %v8924_v0 = vpop.f32.mrf.mxu0  ;;  %v8926_v26 = vpop.f32.mrf.mxu1  ;;  %v3261_v40 = vld [vmem:[#allocation2 + $0x64] sm:$0xf] }
 0x141   : > { %v3393_v51 = vrot.slane %v3391_v30, 4  ;;  %v3396_v49 = vrot.slane %v3394_v18, 5  ;;  %v8922_v55 = vrot.slane %v3400_v35, 5  ;;  %v3404_v34 = vshrl.u32 %v3259_v52, 16  ;;  %7299 = vmatprep.subr.bf16.mxu0 %v7519_v22  ;;  %10010 = vst [vmem:[#allocation25_spill] sm:$0xff] %v8926_v26 }
 0x142   : > { %v3389_v6 = vsel %vm8315_vm10, %v3384_v16, %v3388_v25  ;;  %v4135_v44 = vor.u32 %v4133_v31, %v4132_v9  ;;  %v4127_v33 = vsel %vm7949_vm2, %v6440_v2, %v4126_v62  ;;  %v3410_v19 = vshll.u32 %v3260_v17, 16  ;;  %v8932_v23 = vpop.f32.mrf.mxu0  ;;  %v8934_v52 = vpop.f32.mrf.mxu1  ;;  %v3262_v47 = vld [vmem:[#allocation2 + $0x68] sm:$0xf]  ;;  %v7522_v17 = vld [vmem:[#allocation6 + $0x1d0] sm:$0xff]   ;;  %v3273_v27 = vld [vmem:[#allocation2 + $0xa4] sm:$0xf] }
 0x143   : > { %v6416_v60 = vcombine.low %v3379_v15, %v3389_v6  ;;  %v3397_v11 = vor.u32 %v3396_v49, %v3393_v51  ;;  %v3406_v25 = vrot.slane %v3404_v34, 4  ;;  %v4138_v20 = vshrl.u32 %v4013_v39, 16  ;;  %7252 = vmatpush3.bf16.msra.mxu1 %v7518_v36  ;;  %10011 = vst [vmem:[#allocation26_spill] sm:$0xff] %v8932_v23  ;;  %10012 = vst [vmem:[#allocation27_spill] sm:$0xff] %v8934_v52  ;;  %v3263_v39 = vld [vmem:[#allocation2 + $0x6c] sm:$0x1] }
 0x144   : > { %v4136_v53 = vsel %vm7949_vm2, %v4128_v41, %v4135_v44  ;;  %v4143_v59 = vshrl.u32 %v4014_v38, 16  ;;  %v3412_v5 = vrot.slane %v3410_v19, 5  ;;  %v4146_v2 = vshll.u32 %v4014_v38, 16  ;;  %7300 = vmatpush3.bf16.msra.mxu0 %v7519_v22  ;;  %7253 = vmatprep.subr.bf16.mxu1 %v7520_v29  ;;  %v7523_v36 = vld [vmem:[#allocation6 + $0x210] sm:$0xff]   ;;  %v8937_v15 = vpop.f32.mrf.mxu0  ;;  %v8939_v16 = vpop.f32.mrf.mxu1  ;;  %v7524_v34 = vld [vmem:[#allocation6 + $0x1c8] sm:$0xff]  }
 0x145   : > { %7170 = vmatmul.mubr.bf16.gmra.mxu1 %v6416_v60  ;;  %v6456_v3 = vcombine.low %v4127_v33, %v4136_v53  ;;  %v3398_v50 = vrot.slane %v3397_v11, 4  ;;  %v3407_v61 = vor.u32 %v3406_v25, %v8922_v55  ;;  %v6441_v31 = vrot.slane %v4138_v20, 11  ;;  %7301 = vmatprep.subr.bf16.mxu0 %v7521_v48  ;;  %10013 = vst [vmem:[#allocation28_spill] sm:$0xff] %v8937_v15  ;;  %v4016_v41 = vld [vmem:[#allocation2 + $0x70] sm:$0x8] }
 0x146   : > { %v4145_v30 = vrot.slane %v4143_v59, 7  ;;  %v4152_v18 = vshrl.u32 %v4015_v1, 16  ;;  %10014 = vst [vmem:[#allocation29_spill] sm:$0xff] %v8939_v16  ;;  %v4155_v22 = vshll.u32 %v4015_v1, 16  ;;  %v3415_v35 = vshrl.u32 %v3261_v40, 16  ;;  %v8944_v60 = vpop.f32.mrf.mxu0  ;;  %v8946_v33 = vpop.f32.mrf.mxu1 }
 0x147   : > { %7218 = vmatmul.mubr.bf16.gmra.mxu0 %v6456_v3  ;;  %v3403_v9 = vsel %vm8315_vm10, %v3398_v50, %v8922_v55  ;;  %v3418_v62 = vshll.u32 %v3261_v40, 16  ;;  %v3408_v51 = vrot.slane %v3407_v61, 4  ;;  %v4017_v44 = vld [vmem:[#allocation2 + $0x74] sm:$0xf]  ;;  %7254 = vmatpush3.bf16.msra.mxu1 %v7520_v29  ;;  %10015 = vst [vmem:[#allocation30_spill] sm:$0xff] %v8944_v60  ;;  %10016 = vst [vmem:[#allocation31_spill] sm:$0xff] %v8946_v33 }
 0x148   : > { %v4148_v49 = vor.u32 %v4146_v2, %v4145_v30  ;;  %v4150_v38 = vrot.slane %v4145_v30, 4  ;;  %v4154_v6 = vrot.slane %v4152_v18, 7  ;;  %v3417_v11 = vrot.slane %v3415_v35, 4  ;;  %v4018_v55 = vld [vmem:[#allocation2 + $0x78] sm:$0xf]  ;;  %7302 = vmatpush3.bf16.msra.mxu0 %v7521_v48  ;;  %7255 = vmatprep.subr.bf16.mxu1 %v7522_v17  ;;  %v7525_v3 = vld [vmem:[#allocation6 + $0x208] sm:$0xff]   ;;  %v8952_v50 = vpop.f32.mrf.mxu1  ;;  %v8954_v18 = vpop.f32.mrf.mxu0 }
 0x149   : > { %v3420_v19 = vrot.slane %v3418_v62, 5  ;;  %v3424_v53 = vshll.u32 %v3262_v47, 16  ;;  %v3428_v25 = vshrl.u32 %v3262_v47, 16  ;;  %v3413_v1 = vsel %vm8315_vm10, %v3408_v51, %v3412_v5  ;;  %v3264_v40 = vld [vmem:[#allocation2 + $0x74] sm:$0xf]  ;;  %7303 = vmatprep.subr.bf16.mxu0 %v7523_v36  ;;  %10017 = vst [vmem:[#allocation32_spill] sm:$0xff] %v8952_v50 }
 0x14a   : > { %v4149_v20 = vsel %vm7949_vm2, %v6441_v31, %v4148_v49  ;;  %v4157_v59 = vor.u32 %v4155_v22, %v4154_v6  ;;  %v3434_v29 = vshll.u32 %v3263_v39, 16  ;;  %v6417_v2 = vcombine.low %v3403_v9, %v3413_v1  ;;  %10018 = vst [vmem:[#allocation33_spill] sm:$0xff] %v8954_v18  ;;  %v3265_v49 = vld [vmem:[#allocation2 + $0x78] sm:$0xf]  ;;  %v7526_v9 = vld [vmem:[#allocation6 + $0x1c0] sm:$0xff]  }
 0x14b   : > { %v3421_v61 = vor.u32 %v3420_v19, %v3417_v11  ;;  %v3426_v30 = vrot.slane %v3424_v53, 5  ;;  %v3430_v47 = vrot.slane %v3428_v25, 4  ;;  %v4160_v35 = vshrl.u32 %v4016_v41, 16  ;;  %7256 = vmatpush3.bf16.msra.mxu1 %v7522_v17  ;;  %v7527_v6 = vld [vmem:[#allocation6 + $0x200] sm:$0xff]   ;;  %v3266_v1 = vld [vmem:[#allocation2 + $0x7c] sm:$0x1] }
 0x14c   : > { %v4158_v48 = vsel %vm7949_vm2, %v4150_v38, %v4157_v59  ;;  %v3436_v5 = vrot.slane %v3434_v29, 5  ;;  %v4165_v62 = vshrl.u32 %v4017_v44, 16  ;;  %7173 = vmatprep.mubr.bf16.mxu1 %v6417_v2  ;;  %v4168_v51 = vshll.u32 %v4017_v44, 16  ;;  %7304 = vmatpush3.bf16.msra.mxu0 %v7523_v36  ;;  %v8958_v38 = vpop.f32.mrf.mxu1  ;;  %v4019_v59 = vld [vmem:[#allocation2 + $0x80] sm:$0x8]  ;;  %v8962_v36 = vpop.f32.mrf.mxu0 }
 0x14d   : > { %v6457_v31 = vcombine.low %v4149_v20, %v4158_v48  ;;  %v3422_v39 = vrot.slane %v3421_v61, 4  ;;  %v3431_v22 = vor.u32 %v3430_v47, %v3426_v30  ;;  %v6442_v11 = vrot.slane %v4160_v35, 11  ;;  %7257 = vmatprep.subr.bf16.mxu1 %v7524_v34  ;;  %7305 = vmatprep.subr.bf16.mxu0 %v7525_v3  ;;  %10019 = vst [vmem:[#allocation34_spill] sm:$0xff] %v8958_v38  ;;  %v4021_v38 = vld [vmem:[#allocation2 + $0x88] sm:$0xf] }
 0x14e   : > { %v4167_v19 = vrot.slane %v4165_v62, 7  ;;  %v4174_v53 = vshrl.u32 %v4018_v55, 16  ;;  %v4177_v25 = vshll.u32 %v4018_v55, 16  ;;  %v3439_v20 = vshrl.u32 %v3264_v40, 16  ;;  %10020 = vst [vmem:[#allocation35_spill] sm:$0xff] %v8962_v36 }
 0x14f   : > { %7221 = vmatprep.mubr.bf16.mxu0 %v6457_v31  ;;  %v3427_v17 = vsel %vm8315_vm10, %v3422_v39, %v3426_v30  ;;  %v3432_v41 = vrot.slane %v3431_v22, 4  ;;  %v3442_v44 = vshll.u32 %v3264_v40, 16  ;;  %v3448_v47 = vshll.u32 %v3265_v49, 16  ;;  %v4020_v55 = vld [vmem:[#allocation2 + $0x84] sm:$0xf]  ;;  %7258 = vmatpush3.bf16.msra.mxu1 %v7524_v34 }
 0x150   : > { %v4170_v29 = vor.u32 %v4168_v51, %v4167_v19  ;;  %v4172_v2 = vrot.slane %v4167_v19, 4  ;;  %v4176_v61 = vrot.slane %v4174_v53, 7  ;;  %v3441_v35 = vrot.slane %v3439_v20, 4  ;;  %7306 = vmatpush3.bf16.msra.mxu0 %v7525_v3  ;;  %7259 = vmatprep.subr.bf16.mxu1 %v7526_v9  ;;  %v8968_v51 = vpop.f32.mrf.mxu1  ;;  %v3267_v20 = vld [vmem:[#allocation2 + $0x84] sm:$0xf] }
 0x151   : > { %v3437_v48 = vsel %vm8315_vm10, %v3432_v41, %v3436_v5  ;;  %v3444_v62 = vrot.slane %v3442_v44, 5  ;;  %v3452_v31 = vshrl.u32 %v3265_v49, 16  ;;  %v3450_v22 = vrot.slane %v3448_v47, 5  ;;  %7307 = vmatprep.subr.bf16.mxu0 %v7527_v6  ;;  %10021 = vst [vmem:[#allocation36_spill] sm:$0xff] %v8968_v51  ;;  %v8970_v5 = vpop.f32.mrf.mxu0  ;;  %v3271_v33 = vld [vmem:[#allocation2 + $0x98] sm:$0xf] }
 0x152   : > { %v6418_v30 = vcombine.low %v3427_v17, %v3437_v48  ;;  %v4171_v40 = vsel %vm7949_vm2, %v6442_v11, %v4170_v29  ;;  %v4179_v39 = vor.u32 %v4177_v25, %v4176_v61  ;;  %v3458_v53 = vshll.u32 %v3266_v1, 16  ;;  %10022 = vst [vmem:[#allocation37_spill] sm:$0xff] %v8970_v5  ;;  %v3268_v61 = vld [vmem:[#allocation2 + $0x88] sm:$0xf] }
 0x153   : > { %v3445_v19 = vor.u32 %v3444_v62, %v3441_v35  ;;  %v3454_v34 = vrot.slane %v3452_v31, 4  ;;  %v4182_v50 = vshrl.u32 %v4019_v59, 16  ;;  %v4187_v49 = vshrl.u32 %v4020_v55, 16  ;;  %7260 = vmatpush3.bf16.msra.mxu1 %v7526_v9  ;;  %v3269_v35 = vld [vmem:[#allocation2 + $0x8c] sm:$0x1]  ;;  %v8974_v62 = vpop.f32.mrf.mxu1 }
 0x154   : > { %7174 = vmatmul.mubr.bf16.gmra.mxu1 %v6418_v30  ;;  %v4180_v3 = vsel %vm7949_vm2, %v4172_v2, %v4179_v39  ;;  %v4190_v17 = vshll.u32 %v4020_v55, 16  ;;  %v4196_v41 = vshrl.u32 %v4021_v38, 16  ;;  %v3460_v29 = vrot.slane %v3458_v53, 5  ;;  %7308 = vmatpush3.bf16.msra.mxu0 %v7527_v6  ;;  %v4023_v39 = vld [vmem:[#allocation2 + $0x94] sm:$0xf] }
 0x155   : > { %v6458_v11 = vcombine.low %v4171_v40, %v4180_v3  ;;  %v3446_v25 = vrot.slane %v3445_v19, 4  ;;  %v3455_v44 = vor.u32 %v3454_v34, %v3450_v22  ;;  %v6443_v47 = vrot.slane %v4182_v50, 11  ;;  %v4022_v40 = vld [vmem:[#allocation2 + $0x90] sm:$0x8]  ;;  %v8978_v19 = vpop.f32.mrf.mxu0  ;;  %v8980_v53 = vpop.f32.mrf.mxu1  ;;  %v4033_v18 = vld [vmem:[#allocation2 + $0xc8] sm:$0xf] }
 0x156   : > { %v4189_v1 = vrot.slane %v4187_v49, 7  ;;  %v4198_v59 = vrot.slane %v4196_v41, 7  ;;  %v4199_v48 = vshll.u32 %v4021_v38, 16  ;;  %v3463_v31 = vshrl.u32 %v3267_v20, 16 }
 0x157   : > { %7222 = vmatmul.mubr.bf16.gmra.mxu0 %v6458_v11  ;;  %v3451_v2 = vsel %vm8315_vm10, %v3446_v25, %v3450_v22  ;;  %v3456_v55 = vrot.slane %v3455_v44, 4  ;;  %v3466_v30 = vshll.u32 %v3267_v20, 16  ;;  %v3472_v34 = vshll.u32 %v3268_v61, 16  ;;  %v4024_v22 = vld [vmem:[#allocation2 + $0x98] sm:$0xf]  ;;  %v8984_v11 = vpop.f32.mrf.mxu0 }
 0x158   : > { %v4192_v9 = vor.u32 %v4190_v17, %v4189_v1  ;;  %v4194_v6 = vrot.slane %v4189_v1, 4  ;;  %v4201_v50 = vor.u32 %v4199_v48, %v4198_v59  ;;  %v3465_v3 = vrot.slane %v3463_v31, 4  ;;  %v8990_v1 = vpop.f32.mrf.mxu1 }
 0x159   : > { %v3461_v38 = vsel %vm8315_vm10, %v3456_v55, %v3460_v29  ;;  %v3468_v49 = vrot.slane %v3466_v30, 5  ;;  %v3476_v41 = vshrl.u32 %v3268_v61, 16  ;;  %v3474_v44 = vrot.slane %v3472_v34, 5  ;;  %v3270_v55 = vld [vmem:[#allocation2 + $0x94] sm:$0xf]  ;;  %v8992_v31 = vpop.f32.mrf.mxu0 }
 0x15a   : > { %v6419_v20 = vcombine.low %v3451_v2, %v3461_v38  ;;  %v4193_v25 = vsel %vm7949_vm2, %v6443_v47, %v4192_v9  ;;  %v4202_v17 = vsel %vm7949_vm2, %v4194_v6, %v4201_v50  ;;  %v3482_v29 = vshll.u32 %v3269_v35, 16  ;;  %v8994_v35 = vpop.f32.mrf.mxu1 }
 0x15b   : > { %v6459_v59 = vcombine.low %v4193_v25, %v4202_v17  ;;  %v3469_v48 = vor.u32 %v3468_v49, %v3465_v3  ;;  %v3478_v51 = vrot.slane %v3476_v41, 4  ;;  %v4204_v61 = vshrl.u32 %v4022_v40, 16  ;;  %v3272_v3 = vld [vmem:[#allocation2 + $0x9c] sm:$0x1]  ;;  %v4025_v17 = vld [vmem:[#allocation2 + $0xa0] sm:$0x8]  ;;  %v8998_v52 = vpop.f32.mrf.mxu0 }
 0x15c   : > { %7177 = vmatprep.mubr.bf16.mxu1 %v6419_v20  ;;  %v4209_v30 = vshrl.u32 %v4023_v39, 16  ;;  %v4212_v2 = vshll.u32 %v4023_v39, 16  ;;  %v4218_v38 = vshrl.u32 %v4024_v22, 16  ;;  %v3484_v6 = vrot.slane %v3482_v29, 5  ;;  %v4026_v29 = vld [vmem:[#allocation2 + $0xa4] sm:$0xf] }
 0x15d   : > { %7225 = vmatprep.mubr.bf16.mxu0 %v6459_v59  ;;  %v3470_v47 = vrot.slane %v3469_v48, 4  ;;  %v3479_v9 = vor.u32 %v3478_v51, %v3474_v44  ;;  %v4221_v50 = vshll.u32 %v4024_v22, 16  ;;  %v6444_v34 = vrot.slane %v4204_v61, 11  ;;  %v4027_v61 = vld [vmem:[#allocation2 + $0xa8] sm:$0xf] }
 0x15e   : > { %v4211_v16 = vrot.slane %v4209_v30, 7  ;;  %v4220_v25 = vrot.slane %v4218_v38, 7  ;;  %v3487_v49 = vshrl.u32 %v3270_v55, 16  ;;  %v3490_v20 = vshll.u32 %v3270_v55, 16 }
 0x15f   : > { %v3475_v41 = vsel %vm8315_vm10, %v3470_v47, %v3474_v44  ;;  %v3480_v40 = vrot.slane %v3479_v9, 4  ;;  %v3496_v39 = vshll.u32 %v3271_v33, 16  ;;  %v3500_v7 = vshrl.u32 %v3271_v33, 16 }
 0x160   : > { %v4214_v59 = vor.u32 %v4212_v2, %v4211_v16  ;;  %v4216_v51 = vrot.slane %v4211_v16, 4  ;;  %v4223_v48 = vor.u32 %v4221_v50, %v4220_v25  ;;  %v3489_v22 = vrot.slane %v3487_v49, 4  ;;  %v9006_v16 = vpop.f32.mrf.mxu1 }
 0x161   : > { %v3485_v30 = vsel %vm8315_vm10, %v3480_v40, %v3484_v6  ;;  %v3492_v38 = vrot.slane %v3490_v20, 5  ;;  %v3498_v26 = vrot.slane %v3496_v39, 5  ;;  %v3506_v2 = vshll.u32 %v3272_v3, 16  ;;  %v9008_v14 = vpop.f32.mrf.mxu0  ;;  %v3274_v20 = vld [vmem:[#allocation2 + $0xa8] sm:$0xf] }
 0x162   : > { %v6420_v44 = vcombine.low %v3475_v41, %v3485_v30  ;;  %v4215_v55 = vsel %vm7949_vm2, %v6444_v34, %v4214_v59  ;;  %v4224_v47 = vsel %vm7949_vm2, %v4216_v51, %v4223_v48  ;;  %v3502_v25 = vrot.slane %v3500_v7, 4  ;;  %v9010_v39 = vpop.f32.mrf.mxu1 }
 0x163   : > { %v6460_v9 = vcombine.low %v4215_v55, %v4224_v47  ;;  %v3493_v50 = vor.u32 %v3492_v38, %v3489_v22  ;;  %v4226_v49 = vshrl.u32 %v4025_v17, 16  ;;  %v3508_v6 = vrot.slane %v3506_v2, 5  ;;  %v9012_v48 = vpop.f32.mrf.mxu0  ;;  %v3275_v55 = vld [vmem:[#allocation2 + $0xac] sm:$0x1] }
 0x164   : > { %7178 = vmatmul.mubr.bf16.gmra.mxu1 %v6420_v44  ;;  %v4231_v33 = vshrl.u32 %v4026_v29, 16  ;;  %v4234_v40 = vshll.u32 %v4026_v29, 16  ;;  %v4240_v41 = vshrl.u32 %v4027_v61, 16  ;;  %v3503_v59 = vor.u32 %v3502_v25, %v3498_v26  ;;  %v9014_v38 = vpop.f32.mrf.mxu1 }
 0x165   : > { %7226 = vmatmul.mubr.bf16.gmra.mxu0 %v6460_v9  ;;  %v3494_v34 = vrot.slane %v3493_v50, 4  ;;  %v6445_v3 = vrot.slane %v4226_v49, 11  ;;  %v4243_v51 = vshll.u32 %v4027_v61, 16  ;;  %v3511_v17 = vshrl.u32 %v3273_v27, 16  ;;  %v9018_v9 = vpop.f32.mrf.mxu0 }
 0x166   : > { %v4233_v22 = vrot.slane %v4231_v33, 7  ;;  %v4242_v7 = vrot.slane %v4240_v41, 7  ;;  %v3514_v30 = vshll.u32 %v3273_v27, 16  ;;  %v3504_v44 = vrot.slane %v3503_v59, 4  ;;  %v4029_v33 = vld [vmem:[#allocation2 + $0xb4] sm:$0xf]  ;;  %v9026_v59 = vpop.f32.mrf.mxu1 }
 0x167   : > { %v3499_v29 = vsel %vm8315_vm10, %v3494_v34, %v3498_v26  ;;  %v3520_v47 = vshll.u32 %v3274_v20, 16  ;;  %v3524_v2 = vshrl.u32 %v3274_v20, 16  ;;  %v3513_v49 = vrot.slane %v3511_v17, 4 }
 0x168   : > { %v4236_v50 = vor.u32 %v4234_v40, %v4233_v22  ;;  %v4238_v25 = vrot.slane %v4233_v22, 4  ;;  %v4245_v61 = vor.u32 %v4243_v51, %v4242_v7  ;;  %v3509_v27 = vsel %vm8315_vm10, %v3504_v44, %v3508_v6  ;;  %v9028_v6 = vpop.f32.mrf.mxu0 }
 0x169   : > { %v3516_v41 = vrot.slane %v3514_v30, 5  ;;  %v3522_v46 = vrot.slane %v3520_v47, 5  ;;  %v3526_v45 = vrot.slane %v3524_v2, 4  ;;  %v6421_v26 = vcombine.low %v3499_v29, %v3509_v27  ;;  %v3277_v2 = vld [vmem:[#allocation2 + $0xb8] sm:$0xf] }
 0x16a   : > { %v4237_v34 = vsel %vm7949_vm2, %v6445_v3, %v4236_v50  ;;  %v4246_v20 = vsel %vm7949_vm2, %v4238_v25, %v4245_v61  ;;  %v3530_v40 = vshll.u32 %v3275_v55, 16  ;;  %v4248_v17 = vshrl.u32 %v4028_v57, 16  ;;  %v3278_v61 = vld [vmem:[#allocation2 + $0xbc] sm:$0x1]  ;;  %v4031_v27 = vld [vmem:[#allocation2 + $0xc0] sm:$0x8] }
 0x16b   : > { %v6461_v51 = vcombine.low %v4237_v34, %v4246_v20  ;;  %v3517_v22 = vor.u32 %v3516_v41, %v3513_v49  ;;  %v3527_v7 = vor.u32 %v3526_v45, %v3522_v46  ;;  %7181 = vmatprep.mubr.bf16.mxu1 %v6421_v26  ;;  %v4253_v44 = vshrl.u32 %v4029_v33, 16 }
 0x16c   : > { %v3532_v30 = vrot.slane %v3530_v40, 5  ;;  %v4256_v29 = vshll.u32 %v4029_v33, 16  ;;  %v4262_v47 = vshrl.u32 %v4030_v28, 16  ;;  %v6446_v25 = vrot.slane %v4248_v17, 11 }
 0x16d   : > { %7229 = vmatprep.mubr.bf16.mxu0 %v6461_v51  ;;  %v3518_v3 = vrot.slane %v3517_v22, 4  ;;  %v3528_v50 = vrot.slane %v3527_v7, 4  ;;  %v4265_v55 = vshll.u32 %v4030_v28, 16  ;;  %v4255_v34 = vrot.slane %v4253_v44, 7  ;;  %v9030_v41 = vpop.f32.mrf.mxu1  ;;  %v4032_v44 = vld [vmem:[#allocation2 + $0xc4] sm:$0xf] }
 0x16e   : > { %v4264_v49 = vrot.slane %v4262_v47, 7  ;;  %v3535_v45 = vshrl.u32 %v3276_v12, 16  ;;  %v3538_v57 = vshll.u32 %v3276_v12, 16  ;;  %v3544_v20 = vshll.u32 %v3277_v2, 16  ;;  %v9036_v51 = vpop.f32.mrf.mxu0 }
 0x16f   : > { %v3523_v26 = vsel %vm8315_vm10, %v3518_v3, %v3522_v46  ;;  %v3533_v33 = vsel %vm8315_vm10, %v3528_v50, %v3532_v30  ;;  %v3548_v40 = vshrl.u32 %v3277_v2, 16  ;;  %v4258_v28 = vor.u32 %v4256_v29, %v4255_v34  ;;  %v9038_v47 = vpop.f32.mrf.mxu1 }
 0x170   : > { %v6422_v22 = vcombine.low %v3523_v26, %v3533_v33  ;;  %v4260_v7 = vrot.slane %v4255_v34, 4  ;;  %v4267_v17 = vor.u32 %v4265_v55, %v4264_v49  ;;  %v3537_v12 = vrot.slane %v3535_v45, 4  ;;  %v9040_v46 = vpop.f32.mrf.mxu0  ;;  %v3280_v26 = vld [vmem:[#allocation2 + $0xc8] sm:$0xf] }
 0x171   : > { %v3540_v24 = vrot.slane %v3538_v57, 5  ;;  %v3546_v5 = vrot.slane %v3544_v20, 5  ;;  %v3550_v36 = vrot.slane %v3548_v40, 4  ;;  %v4259_v30 = vsel %vm7949_vm2, %v6446_v25, %v4258_v28  ;;  %v9046_v50 = vpop.f32.mrf.mxu1  ;;  %v3279_v57 = vld [vmem:[#allocation2 + $0xc4] sm:$0xf] }
 0x172   : > { %7182 = vmatmul.mubr.bf16.gmra.mxu1 %v6422_v22  ;;  %v4268_v2 = vsel %vm7949_vm2, %v4260_v7, %v4267_v17  ;;  %v3554_v29 = vshll.u32 %v3278_v61, 16  ;;  %v4270_v3 = vshrl.u32 %v4031_v27, 16  ;;  %10023 = vst [vmem:[#allocation38_spill] sm:$0xff] %v9046_v50  ;;  %v4275_v45 = vshrl.u32 %v4032_v44, 16  ;;  %v9048_v33 = vpop.f32.mrf.mxu0  ;;  %v3281_v17 = vld [vmem:[#allocation2 + $0xcc] sm:$0x1] }
 0x173   : > { %v6462_v55 = vcombine.low %v4259_v30, %v4268_v2  ;;  %v3541_v34 = vor.u32 %v3540_v24, %v3537_v12  ;;  %v3551_v49 = vor.u32 %v3550_v36, %v3546_v5  ;;  %10024 = vst [vmem:[#allocation39_spill] sm:$0xff] %v9048_v33  ;;  %v4278_v22 = vshll.u32 %v4032_v44, 16  ;;  %v9050_v36 = vpop.f32.mrf.mxu1 }
 0x174   : > { %v3556_v20 = vrot.slane %v3554_v29, 5  ;;  %v6447_v40 = vrot.slane %v4270_v3, 11  ;;  %v4284_v60 = vshrl.u32 %v4033_v18, 16  ;;  %v4277_v7 = vrot.slane %v4275_v45, 7  ;;  %10025 = vst [vmem:[#allocation40_spill] sm:$0xff] %v9050_v36 }
 0x175   : > { %7230 = vmatmul.mubr.bf16.gmra.mxu0 %v6462_v55  ;;  %v3542_v25 = vrot.slane %v3541_v34, 4  ;;  %v3552_v28 = vrot.slane %v3551_v49, 4  ;;  %v4287_v61 = vshll.u32 %v4033_v18, 16  ;;  %v3559_v15 = vshrl.u32 %v3279_v57, 16  ;;  %v4034_v3 = vld [vmem:[#allocation2 + $0xd0] sm:$0x8]  ;;  %v9056_v34 = vpop.f32.mrf.mxu0 }
 0x176   : > { %v4286_v27 = vrot.slane %v4284_v60, 7  ;;  %v3562_v30 = vshll.u32 %v3279_v57, 16  ;;  %v3568_v24 = vshll.u32 %v3280_v26, 16  ;;  %v4280_v44 = vor.u32 %v4278_v22, %v4277_v7  ;;  %v4035_v55 = vld [vmem:[#allocation2 + $0xd4] sm:$0xf]  ;;  %10026 = vst [vmem:[#allocation41_spill] sm:$0xff] %v9056_v34 }
 0x177   : > { %v3547_v12 = vsel %vm8315_vm10, %v3542_v25, %v3546_v5  ;;  %v3557_v2 = vsel %vm8315_vm10, %v3552_v28, %v3556_v20  ;;  %v4282_v29 = vrot.slane %v4277_v7, 4  ;;  %v3561_v49 = vrot.slane %v3559_v15, 4  ;;  %v4036_v5 = vld [vmem:[#allocation2 + $0xd8] sm:$0xf]  ;;  %v3282_v7 = vld [vmem:[#allocation2 + $0xd4] sm:$0xf] }
 0x178   : > { %v6423_v18 = vcombine.low %v3547_v12, %v3557_v2  ;;  %v4289_v60 = vor.u32 %v4287_v61, %v4286_v27  ;;  %v3564_v45 = vrot.slane %v3562_v30, 5  ;;  %v4281_v57 = vsel %vm7949_vm2, %v6447_v40, %v4280_v44  ;;  %v9062_v34 = vpop.f32.mrf.mxu1  ;;  %v3283_v2 = vld [vmem:[#allocation2 + $0xd8] sm:$0xf] }
 0x179   : > { %v3570_v33 = vrot.slane %v3568_v24, 5  ;;  %v3572_v36 = vshrl.u32 %v3280_v26, 16  ;;  %v3578_v50 = vshll.u32 %v3281_v17, 16  ;;  %v4292_v25 = vshrl.u32 %v4034_v3, 16  ;;  %10027 = vst [vmem:[#allocation42_spill] sm:$0xff] %v9062_v34 }
 0x17a   : > { %7185 = vmatprep.mubr.bf16.mxu1 %v6423_v18  ;;  %v4290_v20 = vsel %vm7949_vm2, %v4282_v29, %v4289_v60  ;;  %v3565_v22 = vor.u32 %v3564_v45, %v3561_v49  ;;  %v4297_v28 = vshrl.u32 %v4035_v55, 16  ;;  %v4300_v30 = vshll.u32 %v4035_v55, 16  ;;  %v9064_v12 = vpop.f32.mrf.mxu0  ;;  %v9066_v44 = vpop.f32.mrf.mxu1  ;;  %v3284_v18 = vld [vmem:[#allocation2 + $0xdc] sm:$0x1]  ;;  %v4038_v34 = vld [vmem:[#allocation2 + $0xe4] sm:$0xf] }
 0x17b   : > { %v6463_v61 = vcombine.low %v4281_v57, %v4290_v20  ;;  %v3574_v15 = vrot.slane %v3572_v36, 4  ;;  %v3580_v27 = vrot.slane %v3578_v50, 5  ;;  %10028 = vst [vmem:[#allocation43_spill] sm:$0xff] %v9064_v12  ;;  %v6448_v26 = vrot.slane %v4292_v25, 11  ;;  %10029 = vst [vmem:[#allocation44_spill] sm:$0xff] %v9066_v44 }
 0x17c   : > { %v3566_v40 = vrot.slane %v3565_v22, 4  ;;  %v4299_v17 = vrot.slane %v4297_v28, 7  ;;  %v4306_v24 = vshrl.u32 %v4036_v5, 16  ;;  %v4309_v3 = vshll.u32 %v4036_v5, 16  ;;  %v9068_v45 = vpop.f32.mrf.mxu0  ;;  %v4037_v20 = vld [vmem:[#allocation2 + $0xe0] sm:$0x8]  ;;  %v9072_v22 = vpop.f32.mrf.mxu1 }
 0x17d   : > { %7233 = vmatprep.mubr.bf16.mxu0 %v6463_v61  ;;  %v3575_v29 = vor.u32 %v3574_v15, %v3570_v33  ;;  %v3583_v60 = vshrl.u32 %v3282_v7, 16  ;;  %v3586_v49 = vshll.u32 %v3282_v7, 16  ;;  %10030 = vst [vmem:[#allocation45_spill] sm:$0xff] %v9068_v45  ;;  %10031 = vst [vmem:[#allocation46_spill] sm:$0xff] %v9072_v22  ;;  %v3592_v61 = vshll.u32 %v3283_v2, 16 }
 0x17e   : > { %v3571_v50 = vsel %vm8315_vm10, %v3566_v40, %v3570_v33  ;;  %v4302_v36 = vor.u32 %v4300_v30, %v4299_v17  ;;  %v4304_v55 = vrot.slane %v4299_v17, 4  ;;  %v4308_v57 = vrot.slane %v4306_v24, 7  ;;  %v9074_v15 = vpop.f32.mrf.mxu0  ;;  %v4039_v17 = vld [vmem:[#allocation2 + $0xe8] sm:$0xf]  ;;  %v3285_v22 = vld [vmem:[#allocation2 + $0xe4] sm:$0xf]  ;;  %v9082_v23 = vpop.f32.mrf.mxu1 }
 0x17f   : > { %v3576_v25 = vrot.slane %v3575_v29, 4  ;;  %v3585_v28 = vrot.slane %v3583_v60, 4  ;;  %v3588_v44 = vrot.slane %v3586_v49, 5  ;;  %10032 = vst [vmem:[#allocation47_spill] sm:$0xff] %v9074_v15  ;;  %v3596_v45 = vshrl.u32 %v3283_v2, 16 }
 0x180   : > { %v4303_v5 = vsel %vm7949_vm2, %v6448_v26, %v4302_v36  ;;  %v4311_v7 = vor.u32 %v4309_v3, %v4308_v57  ;;  %v3602_v12 = vshll.u32 %v3284_v18, 16  ;;  %v3594_v40 = vrot.slane %v3592_v61, 5  ;;  %v3286_v36 = vld [vmem:[#allocation2 + $0xe8] sm:$0xf]  ;;  %v9084_v57 = vpop.f32.mrf.mxu0 }
 0x181   : > { %v3581_v33 = vsel %vm8315_vm10, %v3576_v25, %v3580_v27  ;;  %v3589_v30 = vor.u32 %v3588_v44, %v3585_v28  ;;  %v4314_v24 = vshrl.u32 %v4037_v20, 16  ;;  %v3598_v49 = vrot.slane %v3596_v45, 4  ;;  %10033 = vst [vmem:[#allocation48_spill] sm:$0xff] %v9084_v57 }
 0x182   : > { %v6424_v29 = vcombine.low %v3571_v50, %v3581_v33  ;;  %v4312_v60 = vsel %vm7949_vm2, %v4304_v55, %v4311_v7  ;;  %v3604_v15 = vrot.slane %v3602_v12, 5  ;;  %v4319_v18 = vshrl.u32 %v4038_v34, 16  ;;  %v3287_v55 = vld [vmem:[#allocation2 + $0xec] sm:$0x1] }
 0x183   : > { %v6464_v26 = vcombine.low %v4303_v5, %v4312_v60  ;;  %v3590_v2 = vrot.slane %v3589_v30, 4  ;;  %v6449_v3 = vrot.slane %v4314_v24, 11  ;;  %v3599_v27 = vor.u32 %v3598_v49, %v3594_v40  ;;  %v4040_v30 = vld [vmem:[#allocation2 + $0xf0] sm:$0x8] }
 0x184   : > { %7186 = vmatmul.mubr.bf16.gmra.mxu1 %v6424_v29  ;;  %v4322_v44 = vshll.u32 %v4038_v34, 16  ;;  %v4328_v20 = vshrl.u32 %v4039_v17, 16  ;;  %v4331_v50 = vshll.u32 %v4039_v17, 16  ;;  %v4321_v12 = vrot.slane %v4319_v18, 7  ;;  %v4041_v17 = vld [vmem:[#allocation2 + $0xf4] sm:$0xf] }
 0x185   : > { %7234 = vmatmul.mubr.bf16.gmra.mxu0 %v6464_v26  ;;  %v3595_v45 = vsel %vm8315_vm10, %v3590_v2, %v3594_v40  ;;  %v3607_v25 = vshrl.u32 %v3285_v22, 16  ;;  %v3610_v28 = vshll.u32 %v3285_v22, 16  ;;  %v3600_v61 = vrot.slane %v3599_v27, 4  ;;  %v9088_v24 = vpop.f32.mrf.mxu1 }
 0x186   : > { %v4330_v5 = vrot.slane %v4328_v20, 7  ;;  %v3616_v7 = vshll.u32 %v3286_v36, 16  ;;  %v3620_v33 = vshrl.u32 %v3286_v36, 16  ;;  %10034 = vst [vmem:[#allocation49_spill] sm:$0xff] %v9088_v24  ;;  %v4324_v29 = vor.u32 %v4322_v44, %v4321_v12  ;;  %v9090_v26 = vpop.f32.mrf.mxu0 }
 0x187   : > { %v4326_v60 = vrot.slane %v4321_v12, 4  ;;  %v3609_v34 = vrot.slane %v3607_v25, 4  ;;  %v3612_v49 = vrot.slane %v3610_v28, 5  ;;  %10035 = vst [vmem:[#allocation50_spill] sm:$0xff] %v9090_v26  ;;  %v3605_v40 = vsel %vm8315_vm10, %v3600_v61, %v3604_v15  ;;  %v9094_v27 = vpop.f32.mrf.mxu1  ;;  %v4042_v12 = vld [vmem:[#allocation2 + $0xf8] sm:$0xf] }
 0x188   : > { %v4333_v2 = vor.u32 %v4331_v50, %v4330_v5  ;;  %v3618_v18 = vrot.slane %v3616_v7, 5  ;;  %v3622_v22 = vrot.slane %v3620_v33, 4  ;;  %10036 = vst [vmem:[#allocation51_spill] sm:$0xff] %v9094_v27  ;;  %v6425_v20 = vcombine.low %v3595_v45, %v3605_v40  ;;  %v9098_v25 = vpop.f32.mrf.mxu0  ;;  %v3288_v50 = vld [vmem:[#allocation2 + $0xf4] sm:$0xf] }
 0x189   : > { %v4325_v36 = vsel %vm7949_vm2, %v6449_v3, %v4324_v29  ;;  %v3613_v24 = vor.u32 %v3612_v49, %v3609_v34  ;;  %v3626_v44 = vshll.u32 %v3287_v55, 16  ;;  %10037 = vst [vmem:[#allocation52_spill] sm:$0xff] %v9098_v25  ;;  %v4336_v57 = vshrl.u32 %v4040_v30, 16  ;;  %v9102_v61 = vpop.f32.mrf.mxu1  ;;  %v3289_v49 = vld [vmem:[#allocation2 + $0xf8] sm:$0xf] }
 0x18a   : > { %v4334_v28 = vsel %vm7949_vm2, %v4326_v60, %v4333_v2  ;;  %v3623_v26 = vor.u32 %v3622_v22, %v3618_v18  ;;  %v4341_v15 = vshrl.u32 %v4041_v17, 16  ;;  %10038 = vst [vmem:[#allocation53_spill] sm:$0xff] %v9102_v61  ;;  %7189 = vmatprep.mubr.bf16.mxu1 %v6425_v20  ;;  %v4344_v33 = vshll.u32 %v4041_v17, 16  ;;  %v9104_v40 = vpop.f32.mrf.mxu0  ;;  %v3290_v2 = vld [vmem:[#allocation2 + $0xfc] sm:$0x1] }
 0x18b   : > { %v6465_v5 = vcombine.low %v4325_v36, %v4334_v28  ;;  %v3614_v45 = vrot.slane %v3613_v24, 4  ;;  %v3628_v7 = vrot.slane %v3626_v44, 5  ;;  %v6450_v29 = vrot.slane %v4336_v57, 11  ;;  %10039 = vst [vmem:[#allocation54_spill] sm:$0xff] %v9104_v40  ;;  %v4043_v57 = vld [vmem:[#allocation2 + $0x100] sm:$0x8]  ;;  %v9110_v44 = vpop.f32.mrf.mxu1 }
 0x18c   : > { %v3624_v3 = vrot.slane %v3623_v26, 4  ;;  %v4343_v55 = vrot.slane %v4341_v15, 7  ;;  %v4350_v34 = vshrl.u32 %v4042_v12, 16  ;;  %v4353_v60 = vshll.u32 %v4042_v12, 16  ;;  %v4044_v36 = vld [vmem:[#allocation2 + $0x104] sm:$0xf]  ;;  %v9114_v27 = vpop.f32.mrf.mxu0 }
 0x18d   : > { %7237 = vmatprep.mubr.bf16.mxu0 %v6465_v5  ;;  %v3619_v30 = vsel %vm8315_vm10, %v3614_v45, %v3618_v18  ;;  %v3631_v22 = vshrl.u32 %v3288_v50, 16  ;;  %v3634_v61 = vshll.u32 %v3288_v50, 16  ;;  %10040 = vst [vmem:[#allocation55_spill] sm:$0xff] %v9110_v44  ;;  %v3640_v40 = vshll.u32 %v3289_v49, 16  ;;  %v4045_v25 = vld [vmem:[#allocation2 + $0x108] sm:$0xf] }
 0x18e   : > { %v3629_v24 = vsel %vm8315_vm10, %v3624_v3, %v3628_v7  ;;  %v4346_v20 = vor.u32 %v4344_v33, %v4343_v55  ;;  %v4348_v17 = vrot.slane %v4343_v55, 4  ;;  %v4352_v26 = vrot.slane %v4350_v34, 7  ;;  %10041 = vst [vmem:[#allocation56_spill] sm:$0xff] %v9114_v27  ;;  %v397_v34 = vld [vmem:[#allocation2 + $0x10c] sm:$0x1] }
 0x18f   : > { %v6426_v28 = vcombine.low %v3619_v30, %v3629_v24  ;;  %v3633_v15 = vrot.slane %v3631_v22, 4  ;;  %v3636_v5 = vrot.slane %v3634_v61, 5  ;;  %v3644_v45 = vshrl.u32 %v3289_v49, 16  ;;  %v3291_v44 = vld [vmem:[#allocation2 + $0x104] sm:$0xf] }
 0x190   : > { %v4347_v18 = vsel %vm7949_vm2, %v6450_v29, %v4346_v20  ;;  %v4355_v12 = vor.u32 %v4353_v60, %v4352_v26  ;;  %v3650_v50 = vshll.u32 %v3290_v2, 16  ;;  %v3642_v33 = vrot.slane %v3640_v40, 5  ;;  %v3292_v26 = vld [vmem:[#allocation2 + $0x108] sm:$0xf] }
 0x191   : > { %7190 = vmatmul.mubr.bf16.gmra.mxu1 %v6426_v28  ;;  %v3637_v7 = vor.u32 %v3636_v5, %v3633_v15  ;;  %v4358_v3 = vshrl.u32 %v4043_v57, 16  ;;  %v4363_v55 = vshrl.u32 %v4044_v36, 16  ;;  %v3646_v61 = vrot.slane %v3644_v45, 4  ;;  %v9118_v29 = vpop.f32.mrf.mxu1  ;;  %v296_v5 = vld [vmem:[#allocation2 + $0x110] sm:$0x8] }
 0x192   : > { %v4356_v30 = vsel %vm7949_vm2, %v4348_v17, %v4355_v12  ;;  %v3652_v22 = vrot.slane %v3650_v50, 5  ;;  %v4366_v24 = vshll.u32 %v4044_v36, 16  ;;  %v4372_v15 = vshrl.u32 %v4045_v25, 16 }
 0x193   : > { %v6466_v49 = vcombine.low %v4347_v18, %v4356_v30  ;;  %v3638_v60 = vrot.slane %v3637_v7, 4  ;;  %v6451_v2 = vrot.slane %v4358_v3, 11  ;;  %v4365_v20 = vrot.slane %v4363_v55, 7  ;;  %v9122_v27 = vpop.f32.mrf.mxu0  ;;  %v9124_v17 = vpop.f32.mrf.mxu1  ;;  %v4047_v55 = vld [vmem:[#allocation2 + $0x114] sm:$0xf] }
 0x194   : > { %v3647_v28 = vor.u32 %v3646_v61, %v3642_v33  ;;  %v4375_v40 = vshll.u32 %v4045_v25, 16  ;;  %v398_v57 = vsel %vm8255_vm9, 0, %v397_v34  ;;  %10042 = vst [vmem:[#allocation57_spill] sm:$0xff] %v9122_v27  ;;  %10043 = vst [vmem:[#allocation58_spill] sm:$0xff] %v9124_v17  ;;  %v3655_v45 = vshrl.u32 %v3291_v44, 16 }
 0x195   : > { %7238 = vmatmul.mubr.bf16.gmra.mxu0 %v6466_v49  ;;  %v3643_v36 = vsel %vm8315_vm10, %v3638_v60, %v3642_v33  ;;  %v4368_v18 = vor.u32 %v4366_v24, %v4365_v20  ;;  %v4370_v12 = vrot.slane %v4365_v20, 4  ;;  %399 = vst [vmem:[#allocation2 + $0x10c] sm:$0x1] %v398_v57  ;;  %v4374_v7 = vrot.slane %v4372_v15, 7  ;;  %v9128_v30 = vpop.f32.mrf.mxu0  ;;  %v4048_v33 = vld [vmem:[#allocation2 + $0x118] sm:$0xf]  ;;  %v9134_v24 = vpop.f32.mrf.mxu1 }
 0x196   : > { %v3648_v50 = vrot.slane %v3647_v28, 4  ;;  %v3658_v3 = vshll.u32 %v3291_v44, 16  ;;  %v3664_v25 = vshll.u32 %v3292_v26, 16  ;;  %10044 = vst [vmem:[#allocation59_spill] sm:$0xff] %v9128_v30  ;;  %v3657_v61 = vrot.slane %v3655_v45, 4  ;;  %10045 = vst [vmem:[#allocation60_spill] sm:$0xff] %v9134_v24 }
 0x197   : > { %v4369_v34 = vsel %vm7949_vm2, %v6451_v2, %v4368_v18  ;;  %v3668_v37 = vshrl.u32 %v3292_v26, 16  ;;  %v297_v49 = vsel %vm8233_vm6, 0, %v296_v5  ;;  %v4377_v20 = vor.u32 %v4375_v40, %v4374_v7  ;;  %v5077_v2 = vld [vmem:[#allocation2 + $0x24] sm:$0xf]  ;;  %v9138_v18 = vpop.f32.mrf.mxu0  ;;  %v7544_v7 = vld [vmem:[#allocation2 + $0x28] sm:$0xf] }
 0x198   : > { %v3653_v60 = vsel %vm8315_vm10, %v3648_v50, %v3652_v22  ;;  %v3660_v44 = vrot.slane %v3658_v3, 5  ;;  %v3666_v28 = vrot.slane %v3664_v25, 5  ;;  %298 = vst [vmem:[#allocation2 + $0x110] sm:$0x8] %v297_v49  ;;  %v4385_v30 = vshrl.u32 %v4047_v55, 16  ;;  %10046 = vst [vmem:[#allocation61_spill] sm:$0xff] %v9138_v18  ;;  %v9142_v25 = vpop.f32.mrf.mxu1 }
 0x199   : > { %v6427_v15 = vcombine.low %v3643_v36, %v3653_v60  ;;  %v3670_v57 = vrot.slane %v3668_v37, 4  ;;  %v4388_v17 = vshll.u32 %v4047_v55, 16  ;;  %v4378_v63 = vsel %vm7949_vm2, %v4370_v12, %v4377_v20  ;;  %v7543_v50 = vld [vmem:[#allocation2 + $0x24] sm:$0xf]  ;;  %v5078_v36 = vld [vmem:[#allocation2 + $0x28] sm:$0xf] }
 0x19a   : > { %v3661_v26 = vor.u32 %v3660_v44, %v3657_v61  ;;  %v4394_v5 = vshrl.u32 %v4048_v33, 16  ;;  %v4397_v45 = vshll.u32 %v4048_v33, 16  ;;  %v6467_v24 = vcombine.low %v4369_v34, %v4378_v63  ;;  %v5079_v37 = vld [vmem:[#allocation2 + $0x2c] sm:$0x1]  ;;  %10047 = vst [vmem:[#allocation62_spill] sm:$0xff] %v9142_v25  ;;  %v9144_v34 = vpop.f32.mrf.mxu0 }
 0x19b   : > { %7193 = vmatprep.mubr.bf16.mxu1 %v6427_v15  ;;  %v3671_v22 = vor.u32 %v3670_v57, %v3666_v28  ;;  %v4387_v40 = vrot.slane %v4385_v30, 7  ;;  %v6477_v3 = vcombine.low %v7543_v50, %v7544_v7  ;;  %v5126_v18 = vshrl.u32 %v5077_v2, 16 }
 0x19c   : > { %v3293_v55 = vld [vmem:[#allocation2 + $0x10c] sm:$0x1]  ;;  %v3662_v49 = vrot.slane %v3661_v26, 4  ;;  %v4396_v60 = vrot.slane %v4394_v5, 7  ;;  %v5129_v27 = vshll.u32 %v5077_v2, 16  ;;  %7241 = vmatprep.mubr.bf16.mxu0 %v6467_v24  ;;  %v5135_v7 = vshll.u32 %v5078_v36, 16 }
 0x19d   : > { %v3672_v12 = vrot.slane %v3671_v22, 4  ;;  %v3674_v61 = vshll.u32 %v3293_v55, 16  ;;  %v4390_v33 = vor.u32 %v4388_v17, %v4387_v40  ;;  %v4392_v20 = vrot.slane %v4387_v40, 4  ;;  %v5080_v40 = vld [vmem:[#allocation2 + $0x34] sm:$0xf] }
 0x19e   : > { %v3667_v30 = vsel %vm8315_vm10, %v3662_v49, %v3666_v28  ;;  %v4399_v44 = vor.u32 %v4397_v45, %v4396_v60  ;;  %v5128_v15 = vrot.slane %v5126_v18, 4  ;;  %v5131_v57 = vrot.slane %v5129_v27, 5  ;;  %v9148_v25 = vpop.f32.mrf.mxu1  ;;  %v5081_v55 = vld [vmem:[#allocation2 + $0x38] sm:$0xf] }
 0x19f   : > { %v3676_v63 = vrot.slane %v3674_v61, 5  ;;  %v4046_v50 = vld [vmem:[#allocation2 + $0x110] sm:$0x8]  ;;  %v5139_v26 = vshrl.u32 %v5078_v36, 16  ;;  %v5145_v5 = vshll.u32 %v5079_v37, 16  ;;  %v1295_v22 = vadd.f32 %v8974_v62, %v8860_v10 }
 0x1a0   : > { %v4380_v24 = vshrl.u32 %v4046_v50, 16  ;;  %v4400_v17 = vsel %vm7949_vm2, %v4392_v20, %v4399_v44  ;;  %v5132_v2 = vor.u32 %v5131_v57, %v5128_v15  ;;  %v5137_v27 = vrot.slane %v5135_v7, 5  ;;  %v9156_v36 = vpop.f32.mrf.mxu0  ;;  %v9158_v37 = vpop.f32.mrf.mxu1  ;;  %v7545_v10 = vld [vmem:[#allocation2 + $0x34] sm:$0xf]  ;;  %v7546_v62 = vld [vmem:[#allocation2 + $0x38] sm:$0xf] }
 0x1a1   : > { %v3677_v28 = vsel %vm8315_vm10, %v3672_v12, %v3676_v63  ;;  %v5141_v18 = vrot.slane %v5139_v26, 4  ;;  %v5147_v45 = vrot.slane %v5145_v5, 5  ;;  %v9161_v20 = vadd.f32 %v8978_v19, %v1295_v22  ;;  %v5082_v57 = vld [vmem:[#allocation2 + $0x3c] sm:$0x1] }
 0x1a2   : > { %v6428_v49 = vcombine.low %v3667_v30, %v3677_v28  ;;  %v6452_v60 = vrot.slane %v4380_v24, 11  ;;  %v5133_v61 = vrot.slane %v5132_v2, 4  ;;  %v6478_v15 = vcombine.low %v7545_v10, %v7546_v62  ;;  %v9163_v50 = vpop.f32.mrf.mxu0  ;;  %v9165_v7 = vpop.f32.mrf.mxu1 }
 0x1a3   : > { %v5142_v44 = vor.u32 %v5141_v18, %v5137_v27  ;;  %v5150_v12 = vshrl.u32 %v5080_v40, 16  ;;  %v5153_v63 = vshll.u32 %v5080_v40, 16  ;;  %v5159_v19 = vshll.u32 %v5081_v55, 16 }
 0x1a4   : > { %7194 = vmatmul.mubr.bf16.gmra.mxu1 %v6428_v49  ;;  %v4391_v30 = vsel %vm7949_vm2, %v6452_v60, %v4390_v33  ;;  %v5138_v26 = vsel %vm8315_vm10, %v5133_v61, %v5137_v27  ;;  %v5163_v5 = vshrl.u32 %v5081_v55, 16  ;;  %v9171_v18 = vpop.f32.mrf.mxu0  ;;  %v5169_v62 = vshll.u32 %v5082_v57, 16  ;;  %v5083_v27 = vld [vmem:[#allocation2 + $0x44] sm:$0xf]  ;;  %v5084_v55 = vld [vmem:[#allocation2 + $0x48] sm:$0xf]  ;;  %v9181_v60 = vpop.f32.mrf.mxu1 }
 0x1a5   : > { %v6468_v24 = vcombine.low %v4391_v30, %v4400_v17  ;;  %7261 = vmatprep.mubr.bf16.mxu1 %v6477_v3  ;;  %v5143_v2 = vrot.slane %v5142_v44, 4  ;;  %v5152_v22 = vrot.slane %v5150_v12, 4  ;;  %v5155_v28 = vrot.slane %v5153_v63, 5 }
 0x1a6   : > { %v5161_v40 = vrot.slane %v5159_v19, 5  ;;  %v5165_v10 = vrot.slane %v5163_v5, 4  ;;  %v1287_v49 = vadd.f32 %v8980_v53, %v8868_v4  ;;  %v1298_v17 = vadd.f32 %v8990_v1, %v8878_v8  ;;  %v5085_v53 = vld [vmem:[#allocation2 + $0x4c] sm:$0x1]  ;;  %v7547_v1 = vld [vmem:[#allocation2 + $0x44] sm:$0xf]  ;;  %v9192_v63 = vpop.f32.mrf.mxu0 }
 0x1a7   : > { %7242 = vmatmul.mubr.bf16.gmra.mxu0 %v6468_v24  ;;  %v5148_v56 = vsel %vm8315_vm10, %v5143_v2, %v5147_v45  ;;  %v5156_v33 = vor.u32 %v5155_v28, %v5152_v22  ;;  %v1290_v3 = vadd.f32 %v8994_v35, %v8882_v13  ;;  %v5171_v57 = vrot.slane %v5169_v62, 5  ;;  %v7548_v13 = vld [vmem:[#allocation2 + $0x48] sm:$0xf]  ;;  %v5087_v22 = vld [vmem:[#allocation2 + $0x58] sm:$0xf] }
 0x1a8   : > { %v6501_v61 = vcombine.low %v5138_v26, %v5148_v56  ;;  %v5166_v44 = vor.u32 %v5165_v10, %v5161_v40  ;;  %v9184_v4 = vadd.f32 %v8984_v11, %v1287_v49  ;;  %v9187_v45 = vadd.f32 %v8992_v31, %v1298_v17 }
 0x1a9   : > { %v5157_v12 = vrot.slane %v5156_v33, 4  ;;  %v9190_v8 = vadd.f32 %v8998_v52, %v1290_v3  ;;  %v6479_v35 = vcombine.low %v7547_v1, %v7548_v13  ;;  %v5174_v26 = vshrl.u32 %v5083_v27, 16  ;;  %v5086_v52 = vld [vmem:[#allocation2 + $0x54] sm:$0xf]  ;;  %v5088_v33 = vld [vmem:[#allocation2 + $0x5c] sm:$0x1] }
 0x1aa   : > { %7309 = vmatprep.mubr.bf16.mxu0 %v6501_v61  ;;  %v5167_v30 = vrot.slane %v5166_v44, 4  ;;  %v5177_v19 = vshll.u32 %v5083_v27, 16  ;;  %v5183_v5 = vshll.u32 %v5084_v55, 16  ;;  %v5187_v24 = vshrl.u32 %v5084_v55, 16  ;;  %v9198_v28 = vpop.f32.mrf.mxu1  ;;  %v7550_v61 = vld [vmem:[#allocation2 + $0x58] sm:$0xf] }
 0x1ab   : > { %v5162_v11 = vsel %vm8315_vm10, %v5157_v12, %v5161_v40  ;;  %v5193_v2 = vshll.u32 %v5085_v53, 16  ;;  %v1311_v31 = vadd.f32 %v9006_v16, %v8892_v58  ;;  %v5176_v62 = vrot.slane %v5174_v26, 4 }
 0x1ac   : > { %7262 = vmatmul.mubr.bf16.vlgmr.msra.gmra.mxu1 %v6478_v15  ;;  %v5172_v10 = vsel %vm8315_vm10, %v5167_v30, %v5171_v57  ;;  %v5179_v49 = vrot.slane %v5177_v19, 5  ;;  %v5185_v56 = vrot.slane %v5183_v5, 5  ;;  %v5189_v40 = vrot.slane %v5187_v24, 4  ;;  %v9207_v16 = vpop.f32.mrf.mxu1  ;;  %v7549_v15 = vld [vmem:[#allocation2 + $0x54] sm:$0xf] }
 0x1ad   : > { %v6502_v17 = vcombine.low %v5162_v11, %v5172_v10  ;;  %7265 = vmatprep.mubr.bf16.mxu1 %v6479_v35  ;;  %v5195_v3 = vrot.slane %v5193_v2, 5  ;;  %v9203_v27 = vadd.f32 %v9008_v14, %v1311_v31  ;;  %v9205_v58 = vpop.f32.mrf.mxu0  ;;  %v6480_v44 = vcombine.low %v7549_v15, %v7550_v61  ;;  %v7551_v61 = vld [vmem:[#allocation2 + $0x64] sm:$0xf] }
 0x1ae   : > { %v5180_v55 = vor.u32 %v5179_v49, %v5176_v62  ;;  %v5198_v57 = vshrl.u32 %v5086_v52, 16  ;;  %v5201_v53 = vshll.u32 %v5086_v52, 16  ;;  %v5190_v12 = vor.u32 %v5189_v40, %v5185_v56  ;;  %v9211_v26 = vpop.f32.mrf.mxu1  ;;  %v5089_v52 = vld [vmem:[#allocation2 + $0x64] sm:$0xf] }
 0x1af   : > { %7310 = vmatmul.mubr.bf16.vlgmr.msra.gmra.mxu0 %v6502_v17  ;;  %v5207_v1 = vshll.u32 %v5087_v22, 16  ;;  %v5211_v13 = vshrl.u32 %v5087_v22, 16  ;;  %v5217_v35 = vshll.u32 %v5088_v33, 16  ;;  %v9209_v30 = vpop.f32.mrf.mxu0  ;;  %v1303_v11 = vadd.f32 %v9010_v39, %v8898_v43  ;;  %v5090_v43 = vld [vmem:[#allocation2 + $0x68] sm:$0xf] }
 0x1b0   : > { %v5181_v14 = vrot.slane %v5180_v55, 4  ;;  %v5200_v19 = vrot.slane %v5198_v57, 4  ;;  %v5203_v5 = vrot.slane %v5201_v53, 5  ;;  %v5191_v24 = vrot.slane %v5190_v12, 4  ;;  %v9217_v49 = vpop.f32.mrf.mxu1  ;;  %v7552_v57 = vld [vmem:[#allocation2 + $0x68] sm:$0xf] }
 0x1b1   : > { %v5209_v2 = vrot.slane %v5207_v1, 5  ;;  %v5213_v31 = vrot.slane %v5211_v13, 4  ;;  %v5219_v10 = vrot.slane %v5217_v35, 5  ;;  %v9215_v62 = vpop.f32.mrf.mxu0  ;;  %v9222_v17 = vadd.f32 %v9012_v48, %v1303_v11  ;;  %v5091_v12 = vld [vmem:[#allocation2 + $0x6c] sm:$0x1] }
 0x1b2   : > { %v5186_v22 = vsel %vm8315_vm10, %v5181_v14, %v5185_v56  ;;  %v5204_v33 = vor.u32 %v5203_v5, %v5200_v19  ;;  %v1314_v40 = vadd.f32 %v9014_v38, %v8904_v54  ;;  %v5196_v39 = vsel %vm8315_vm10, %v5191_v24, %v5195_v3  ;;  %v5092_v24 = vld [vmem:[#allocation2 + $0x74] sm:$0xf] }
 0x1b3   : > { %v5214_v55 = vor.u32 %v5213_v31, %v5209_v2  ;;  %v1306_v15 = vadd.f32 %v9026_v59, %v8910_v21  ;;  %v6481_v53 = vcombine.low %v7551_v61, %v7552_v57  ;;  %v9230_v56 = vpop.f32.mrf.mxu0  ;;  %v9232_v1 = vpop.f32.mrf.mxu1  ;;  %v6503_v48 = vcombine.low %v5186_v22, %v5196_v39  ;;  %v7554_v57 = vld [vmem:[#allocation2 + $0x78] sm:$0xf] }
 0x1b4   : > { %7266 = vmatmul.mubr.bf16.gmra.mxu1 %v6480_v44  ;;  %v5205_v13 = vrot.slane %v5204_v33, 4  ;;  %v9235_v54 = vadd.f32 %v9018_v9, %v1314_v40  ;;  %v5222_v38 = vshrl.u32 %v5089_v52, 16  ;;  %v5225_v21 = vshll.u32 %v5089_v52, 16  ;;  %v5093_v33 = vld [vmem:[#allocation2 + $0x78] sm:$0xf] }
 0x1b5   : > { %v5215_v3 = vrot.slane %v5214_v55, 4  ;;  %v9238_v35 = vadd.f32 %v9028_v6, %v1306_v15  ;;  %7269 = vmatprep.mubr.bf16.mxu1 %v6481_v53  ;;  %v5231_v59 = vshll.u32 %v5090_v43, 16  ;;  %v9240_v14 = vpop.f32.mrf.mxu0  ;;  %v9242_v19 = vpop.f32.mrf.mxu1  ;;  %7313 = vmatprep.mubr.bf16.mxu0 %v6503_v48  ;;  %v5235_v11 = vshrl.u32 %v5090_v43, 16  ;;  %v5094_v40 = vld [vmem:[#allocation2 + $0x7c] sm:$0x1] }
 0x1b6   : > { %v5210_v44 = vsel %vm8315_vm10, %v5205_v13, %v5209_v2  ;;  %v5224_v5 = vrot.slane %v5222_v38, 4  ;;  %v5241_v9 = vshll.u32 %v5091_v12, 16  ;;  %v5227_v6 = vrot.slane %v5225_v21, 5  ;;  %v7553_v43 = vld [vmem:[#allocation2 + $0x74] sm:$0xf] }
 0x1b7   : > { %10048 = vst [vmem:[#allocation63_spill] sm:$0xff] %v9238_v35  ;;  %v5220_v31 = vsel %vm8315_vm10, %v5215_v3, %v5219_v10  ;;  %v5233_v22 = vrot.slane %v5231_v59, 5  ;;  %v1327_v52 = vadd.f32 %v9030_v41, %v8916_v32  ;;  %v9250_v39 = vpop.f32.mrf.mxu0  ;;  %v9252_v55 = vpop.f32.mrf.mxu1  ;;  %v5237_v2 = vrot.slane %v5235_v11, 4 }
 0x1b8   : > { %v6504_v15 = vcombine.low %v5210_v44, %v5220_v31  ;;  %v5243_v61 = vrot.slane %v5241_v9, 5  ;;  %v6482_v53 = vcombine.low %v7553_v43, %v7554_v57  ;;  %v5228_v12 = vor.u32 %v5227_v6, %v5224_v5  ;;  %v10051_v57 = vld [vmem:[#allocation26_spill] sm:$0xff] }
 0x1b9   : > { %v9255_v10 = vadd.f32 %v9036_v51, %v1327_v52  ;;  %v5246_v48 = vshrl.u32 %v5092_v24, 16  ;;  %v5249_v13 = vshll.u32 %v5092_v24, 16  ;;  %v9257_v38 = vpop.f32.mrf.mxu0  ;;  %v9259_v32 = vpop.f32.mrf.mxu1  ;;  %v5238_v41 = vor.u32 %v5237_v2, %v5233_v22 }
 0x1ba   : > { %7314 = vmatmul.mubr.bf16.gmra.mxu0 %v6504_v15  ;;  %v5255_v3 = vshll.u32 %v5093_v33, 16  ;;  %v5259_v21 = vshrl.u32 %v5093_v33, 16  ;;  %v5265_v59 = vshll.u32 %v5094_v40, 16  ;;  %v5229_v44 = vrot.slane %v5228_v12, 4  ;;  %v5095_v15 = vld [vmem:[#allocation2 + $0x84] sm:$0xf] }
 0x1bb   : > { %10049 = vst [vmem:[#allocation64_spill] sm:$0xff] %v9255_v10  ;;  %v5248_v11 = vrot.slane %v5246_v48, 4  ;;  %v5251_v9 = vrot.slane %v5249_v13, 5  ;;  %v1319_v5 = vadd.f32 %v9038_v47, %v8924_v0  ;;  %v9263_v31 = vpop.f32.mrf.mxu0  ;;  %v9265_v51 = vpop.f32.mrf.mxu1  ;;  %v5239_v24 = vrot.slane %v5238_v41, 4  ;;  %v10052_v12 = vld [vmem:[#allocation38_spill] sm:$0xff] }
 0x1bc   : > { %7270 = vmatmul.mubr.bf16.gmra.mxu1 %v6482_v53  ;;  %v5257_v6 = vrot.slane %v5255_v3, 5  ;;  %v5261_v52 = vrot.slane %v5259_v21, 4  ;;  %v5267_v43 = vrot.slane %v5265_v59, 5  ;;  %v5234_v33 = vsel %vm8315_vm10, %v5229_v44, %v5233_v22  ;;  %v5096_v47 = vld [vmem:[#allocation2 + $0x88] sm:$0xf]  ;;  %v10054_v3 = vld [vmem:[#allocation28_spill] sm:$0xff] }
 0x1bd   : > { %v5252_v40 = vor.u32 %v5251_v9, %v5248_v11  ;;  %v9270_v2 = vadd.f32 %v9040_v46, %v1319_v5  ;;  %v1330_v0 = vadd.f32 %v10052_v12, %v10051_v57  ;;  %v9274_v48 = vpop.f32.mrf.mxu0  ;;  %v9276_v13 = vpop.f32.mrf.mxu1  ;;  %v5244_v53 = vsel %vm8315_vm10, %v5239_v24, %v5243_v61  ;;  %v10055_v21 = vld [vmem:[#allocation40_spill] sm:$0xff]  ;;  %v7555_v22 = vld [vmem:[#allocation2 + $0x84] sm:$0xf]  ;;  %v7556_v44 = vld [vmem:[#allocation2 + $0x88] sm:$0xf] }
 0x1be   : > { %10053 = vst [vmem:[#allocation26_spill] sm:$0xff] %v9274_v48  ;;  %v5262_v41 = vor.u32 %v5261_v52, %v5257_v6  ;;  %v1322_v59 = vadd.f32 %v10055_v21, %v10054_v3  ;;  %v6483_v11 = vcombine.low %v7555_v22, %v7556_v44  ;;  %v5097_v46 = vld [vmem:[#allocation2 + $0x8c] sm:$0x1]  ;;  %v6505_v9 = vcombine.low %v5234_v33, %v5244_v53  ;;  %v10060_v61 = vld [vmem:[#allocation41_spill] sm:$0xff] }
 0x1bf   : > { %10050 = vst [vmem:[#allocation65_spill] sm:$0xff] %v9270_v2  ;;  %v5253_v5 = vrot.slane %v5252_v40, 4  ;;  %v10056_v2 = vld [vmem:[#allocation39_spill] sm:$0xff]  ;;  %v5270_v12 = vshrl.u32 %v5095_v15, 16  ;;  %v9285_v10 = vpop.f32.mrf.mxu0  ;;  %v9287_v35 = vpop.f32.mrf.mxu1  ;;  %v5273_v52 = vshll.u32 %v5095_v15, 16  ;;  %v5279_v3 = vshll.u32 %v5096_v47, 16 }
 0x1c0   : > { %v9283_v57 = vadd.f32 %v10056_v2, %v1330_v0  ;;  %10058 = vst [vmem:[#allocation28_spill] sm:$0xff] %v9285_v10  ;;  %10059 = vst [vmem:[#allocation40_spill] sm:$0xff] %v9287_v35  ;;  %v5263_v48 = vrot.slane %v5262_v41, 4  ;;  %v9290_v24 = vadd.f32 %v10060_v61, %v1322_v59  ;;  %7273 = vmatprep.mubr.bf16.mxu1 %v6483_v11  ;;  %7317 = vmatprep.mubr.bf16.mxu0 %v6505_v9  ;;  %v5098_v0 = vld [vmem:[#allocation2 + $0x94] sm:$0xf]  ;;  %v10064_v11 = vld [vmem:[#allocation30_spill] sm:$0xff] }
 0x1c1   : > { %v5258_v33 = vsel %vm8315_vm10, %v5253_v5, %v5257_v6  ;;  %v5272_v40 = vrot.slane %v5270_v12, 4  ;;  %v5283_v53 = vshrl.u32 %v5096_v47, 16  ;;  %v5289_v2 = vshll.u32 %v5097_v46, 16  ;;  %v9294_v21 = vpop.f32.mrf.mxu0  ;;  %v9296_v22 = vpop.f32.mrf.mxu1  ;;  %v10065_v15 = vld [vmem:[#allocation42_spill] sm:$0xff]  ;;  %v5099_v9 = vld [vmem:[#allocation2 + $0x98] sm:$0xf] }
 0x1c2   : > { %10057 = vst [vmem:[#allocation38_spill] sm:$0xff] %v9283_v57  ;;  %10061 = vst [vmem:[#allocation39_spill] sm:$0xff] %v9290_v24  ;;  %v5268_v41 = vsel %vm8315_vm10, %v5263_v48, %v5267_v43  ;;  %v5275_v59 = vrot.slane %v5273_v52, 5  ;;  %v5281_v44 = vrot.slane %v5279_v3, 5  ;;  %v1343_v61 = vadd.f32 %v10065_v15, %v10064_v11  ;;  %v5100_v24 = vld [vmem:[#allocation2 + $0x9c] sm:$0x1] }
 0x1c3   : > { %10062 = vst [vmem:[#allocation41_spill] sm:$0xff] %v9294_v21  ;;  %10063 = vst [vmem:[#allocation66_spill] sm:$0xff] %v9296_v22  ;;  %v6506_v57 = vcombine.low %v5258_v33, %v5268_v41  ;;  %v5285_v6 = vrot.slane %v5283_v53, 4  ;;  %v5291_v5 = vrot.slane %v5289_v2, 5  ;;  %v7557_v47 = vld [vmem:[#allocation2 + $0x94] sm:$0xf]  ;;  %v9302_v10 = vpop.f32.mrf.mxu0  ;;  %v9304_v21 = vpop.f32.mrf.mxu1 }
 0x1c4   : > { %v7558_v46 = vld [vmem:[#allocation2 + $0x98] sm:$0xf]  ;;  %10066 = vst [vmem:[#allocation30_spill] sm:$0xff] %v9302_v10  ;;  %10067 = vst [vmem:[#allocation42_spill] sm:$0xff] %v9304_v21  ;;  %v5276_v22 = vor.u32 %v5275_v59, %v5272_v40  ;;  %v10068_v35 = vld [vmem:[#allocation43_spill] sm:$0xff]  ;;  %v5294_v48 = vshrl.u32 %v5098_v0, 16 }
 0x1c5   : > { %v6484_v12 = vcombine.low %v7557_v47, %v7558_v46  ;;  %v9307_v43 = vadd.f32 %v10068_v35, %v1343_v61  ;;  %v5297_v52 = vshll.u32 %v5098_v0, 16  ;;  %7318 = vmatmul.mubr.bf16.gmra.mxu0 %v6506_v57  ;;  %v5286_v3 = vor.u32 %v5285_v6, %v5281_v44  ;;  %v9309_v2 = vpop.f32.mrf.mxu0  ;;  %v9311_v41 = vpop.f32.mrf.mxu1  ;;  %v10072_v10 = vld [vmem:[#allocation33_spill] sm:$0xff]  ;;  %v10073_v40 = vld [vmem:[#allocation44_spill] sm:$0xff]  ;;  %v5101_v57 = vld [vmem:[#allocation2 + $0xa4] sm:$0xf] }
 0x1c6   : > { %v5303_v11 = vshll.u32 %v5099_v9, 16  ;;  %v5307_v33 = vshrl.u32 %v5099_v9, 16  ;;  %v5313_v53 = vshll.u32 %v5100_v24, 16  ;;  %10070 = vst [vmem:[#allocation67_spill] sm:$0xff] %v9309_v2  ;;  %10071 = vst [vmem:[#allocation68_spill] sm:$0xff] %v9311_v41  ;;  %v5277_v15 = vrot.slane %v5276_v22, 4 }
 0x1c7   : > { %10069 = vst [vmem:[#allocation43_spill] sm:$0xff] %v9307_v43  ;;  %7274 = vmatmul.mubr.bf16.gmra.mxu1 %v6484_v12  ;;  %v5296_v47 = vrot.slane %v5294_v48, 4  ;;  %v5299_v46 = vrot.slane %v5297_v52, 5  ;;  %v1335_v59 = vadd.f32 %v10073_v40, %v10072_v10  ;;  %v5287_v35 = vrot.slane %v5286_v3, 4  ;;  %v9315_v6 = vpop.f32.mrf.mxu0  ;;  %v9317_v12 = vpop.f32.mrf.mxu1  ;;  %v10076_v2 = vld [vmem:[#allocation45_spill] sm:$0xff]  ;;  %v10078_v48 = vld [vmem:[#allocation35_spill] sm:$0xff] }
 0x1c8   : > { %v5305_v61 = vrot.slane %v5303_v11, 5  ;;  %v5309_v43 = vrot.slane %v5307_v33, 4  ;;  %v5315_v0 = vrot.slane %v5313_v53, 5  ;;  %10074 = vst [vmem:[#allocation33_spill] sm:$0xff] %v9315_v6  ;;  %10075 = vst [vmem:[#allocation44_spill] sm:$0xff] %v9317_v12  ;;  %v5282_v24 = vsel %vm8315_vm10, %v5277_v15, %v5281_v44  ;;  %v10079_v52 = vld [vmem:[#allocation46_spill] sm:$0xff] }
 0x1c9   : > { %v5300_v9 = vor.u32 %v5299_v46, %v5296_v47  ;;  %v9322_v22 = vadd.f32 %v10076_v2, %v1335_v59  ;;  %v1346_v41 = vadd.f32 %v10079_v52, %v10078_v48  ;;  %v5102_v10 = vld [vmem:[#allocation2 + $0xa8] sm:$0xf]  ;;  %v5292_v3 = vsel %vm8315_vm10, %v5287_v35, %v5291_v5  ;;  %v10080_v33 = vld [vmem:[#allocation37_spill] sm:$0xff]  ;;  %v7559_v40 = vld [vmem:[#allocation2 + $0xa4] sm:$0xf]  ;;  %v9330_v44 = vpop.f32.mrf.mxu0  ;;  %v9332_v15 = vpop.f32.mrf.mxu1 }
 0x1ca   : > { %v5310_v11 = vor.u32 %v5309_v43, %v5305_v61  ;;  %v1338_v53 = vadd.f32 %v9082_v23, %v10080_v33  ;;  %v7560_v6 = vld [vmem:[#allocation2 + $0xa8] sm:$0xf]  ;;  %v5103_v21 = vld [vmem:[#allocation2 + $0xac] sm:$0x1]  ;;  %10081 = vst [vmem:[#allocation35_spill] sm:$0xff] %v9330_v44  ;;  %v6507_v2 = vcombine.low %v5282_v24, %v5292_v3  ;;  %v5318_v48 = vshrl.u32 %v5101_v57, 16 }
 0x1cb   : > { %10077 = vst [vmem:[#allocation45_spill] sm:$0xff] %v9322_v22  ;;  %v6485_v12 = vcombine.low %v7559_v40, %v7560_v6  ;;  %v5301_v47 = vrot.slane %v5300_v9, 4  ;;  %v10082_v46 = vld [vmem:[#allocation47_spill] sm:$0xff]  ;;  %v10084_v5 = vld [vmem:[#allocation48_spill] sm:$0xff]  ;;  %v5321_v23 = vshll.u32 %v5101_v57, 16  ;;  %v5327_v35 = vshll.u32 %v5102_v10, 16  ;;  %v9340_v33 = vpop.f32.mrf.mxu0  ;;  %v9342_v6 = vpop.f32.mrf.mxu1 }
 0x1cc   : > { %v9335_v59 = vadd.f32 %v10082_v46, %v1346_v41  ;;  %v5311_v52 = vrot.slane %v5310_v11, 4  ;;  %v9338_v43 = vadd.f32 %v10084_v5, %v1338_v53  ;;  %10086 = vst [vmem:[#allocation47_spill] sm:$0xff] %v9340_v33  ;;  %10087 = vst [vmem:[#allocation48_spill] sm:$0xff] %v9342_v6  ;;  %7321 = vmatprep.mubr.bf16.mxu0 %v6507_v2  ;;  %v5320_v9 = vrot.slane %v5318_v48, 4  ;;  %v5104_v40 = vld [vmem:[#allocation2 + $0xb4] sm:$0xf] }
 0x1cd   : > { %7277 = vmatprep.mubr.bf16.mxu1 %v6485_v12  ;;  %v5306_v24 = vsel %vm8315_vm10, %v5301_v47, %v5305_v61  ;;  %v5331_v3 = vshrl.u32 %v5102_v10, 16  ;;  %v5337_v41 = vshll.u32 %v5103_v21, 16  ;;  %v5323_v53 = vrot.slane %v5321_v23, 5  ;;  %v10088_v12 = vld [vmem:[#allocation15_spill] sm:$0xff]  ;;  %v10089_v57 = vld [vmem:[#allocation49_spill] sm:$0xff]  ;;  %v9350_v33 = vpop.f32.mrf.mxu0  ;;  %v9352_v2 = vpop.f32.mrf.mxu1  ;;  %v10092_v6 = vld [vmem:[#allocation50_spill] sm:$0xff] }
 0x1ce   : > { %10083 = vst [vmem:[#allocation46_spill] sm:$0xff] %v9335_v59  ;;  %10085 = vst [vmem:[#allocation37_spill] sm:$0xff] %v9338_v43  ;;  %v5316_v11 = vsel %vm8315_vm10, %v5311_v52, %v5315_v0  ;;  %v5329_v46 = vrot.slane %v5327_v35, 5  ;;  %v1359_v5 = vadd.f32 %v10089_v57, %v10088_v12  ;;  %v5105_v43 = vld [vmem:[#allocation2 + $0xb8] sm:$0xf]  ;;  %v5342_v52 = vshrl.u32 %v5104_v40, 16 }
 0x1cf   : > { %v5106_v59 = vld [vmem:[#allocation2 + $0xbc] sm:$0x1]  ;;  %10090 = vst [vmem:[#allocation15_spill] sm:$0xff] %v9350_v33  ;;  %10091 = vst [vmem:[#allocation49_spill] sm:$0xff] %v9352_v2  ;;  %v6508_v22 = vcombine.low %v5306_v24, %v5316_v11  ;;  %v5333_v61 = vrot.slane %v5331_v3, 4  ;;  %v5339_v47 = vrot.slane %v5337_v41, 5  ;;  %v5324_v44 = vor.u32 %v5323_v53, %v5320_v9  ;;  %v9357_v35 = vpop.f32.mrf.mxu0  ;;  %v9359_v12 = vpop.f32.mrf.mxu1 }
 0x1d0   : > { %v7561_v10 = vld [vmem:[#allocation2 + $0xb4] sm:$0xf]  ;;  %v7562_v21 = vld [vmem:[#allocation2 + $0xb8] sm:$0xf]  ;;  %v9355_v0 = vadd.f32 %v10092_v6, %v1359_v5  ;;  %v5345_v23 = vshll.u32 %v5104_v40, 16  ;;  %10094 = vst [vmem:[#allocation69_spill] sm:$0xff] %v9357_v35 }
 0x1d1   : > { %v6486_v48 = vcombine.low %v7561_v10, %v7562_v21  ;;  %10095 = vst [vmem:[#allocation70_spill] sm:$0xff] %v9359_v12  ;;  %7322 = vmatmul.mubr.bf16.gmra.mxu0 %v6508_v22  ;;  %v5334_v57 = vor.u32 %v5333_v61, %v5329_v46  ;;  %v5351_v33 = vshll.u32 %v5105_v43, 16  ;;  %v5355_v24 = vshrl.u32 %v5105_v43, 16  ;;  %v10096_v10 = vld [vmem:[#allocation16_spill] sm:$0xff]  ;;  %v10097_v9 = vld [vmem:[#allocation51_spill] sm:$0xff]  ;;  %v9363_v6 = vpop.f32.mrf.mxu0  ;;  %v9365_v5 = vpop.f32.mrf.mxu1 }
 0x1d2   : > { %10093 = vst [vmem:[#allocation50_spill] sm:$0xff] %v9355_v0  ;;  %v5361_v3 = vshll.u32 %v5106_v59, 16  ;;  %v5325_v41 = vrot.slane %v5324_v44, 4  ;;  %v5344_v11 = vrot.slane %v5342_v52, 4  ;;  %v5347_v2 = vrot.slane %v5345_v23, 5  ;;  %10098 = vst [vmem:[#allocation16_spill] sm:$0xff] %v9363_v6 }
 0x1d3   : > { %7278 = vmatmul.mubr.bf16.gmra.mxu1 %v6486_v48  ;;  %v1351_v53 = vadd.f32 %v10097_v9, %v10096_v10  ;;  %10099 = vst [vmem:[#allocation51_spill] sm:$0xff] %v9365_v5  ;;  %v5335_v40 = vrot.slane %v5334_v57, 4  ;;  %v5353_v21 = vrot.slane %v5351_v33, 5  ;;  %v5357_v0 = vrot.slane %v5355_v24, 4  ;;  %v5107_v22 = vld [vmem:[#allocation2 + $0xc4] sm:$0xf]  ;;  %v9374_v9 = vpop.f32.mrf.mxu0  ;;  %v9376_v6 = vpop.f32.mrf.mxu1 }
 0x1d4   : > { %v5363_v35 = vrot.slane %v5361_v3, 5  ;;  %v5330_v61 = vsel %vm8315_vm10, %v5325_v41, %v5329_v46  ;;  %v5348_v43 = vor.u32 %v5347_v2, %v5344_v11  ;;  %v10100_v59 = vld [vmem:[#allocation52_spill] sm:$0xff]  ;;  %v10102_v48 = vld [vmem:[#allocation19_spill] sm:$0xff]  ;;  %v10103_v52 = vld [vmem:[#allocation53_spill] sm:$0xff] }
 0x1d5   : > { %v9370_v44 = vadd.f32 %v10100_v59, %v1351_v53  ;;  %v1362_v23 = vadd.f32 %v10103_v52, %v10102_v48  ;;  %v5108_v10 = vld [vmem:[#allocation2 + $0xc8] sm:$0xf]  ;;  %10104 = vst [vmem:[#allocation19_spill] sm:$0xff] %v9374_v9  ;;  %10105 = vst [vmem:[#allocation53_spill] sm:$0xff] %v9376_v6  ;;  %v5340_v33 = vsel %vm8315_vm10, %v5335_v40, %v5339_v47  ;;  %v10106_v24 = vld [vmem:[#allocation17_spill] sm:$0xff]  ;;  %v5366_v52 = vshrl.u32 %v5107_v22, 16  ;;  %v9385_v9 = vpop.f32.mrf.mxu0  ;;  %v9387_v6 = vpop.f32.mrf.mxu1 }
 0x1d6   : > { %v5358_v57 = vor.u32 %v5357_v0, %v5353_v21  ;;  %v10107_v3 = vld [vmem:[#allocation55_spill] sm:$0xff]  ;;  %v5109_v11 = vld [vmem:[#allocation2 + $0xcc] sm:$0x1]  ;;  %v6509_v53 = vcombine.low %v5330_v61, %v5340_v33  ;;  %v5349_v59 = vrot.slane %v5348_v43, 4  ;;  %v5369_v40 = vshll.u32 %v5107_v22, 16  ;;  %v10176_v42 = vld [vmem:[#allocation46_spill] sm:$0xff] }
 0x1d7   : > { %10101 = vst [vmem:[#allocation52_spill] sm:$0xff] %v9370_v44  ;;  %v1354_v5 = vadd.f32 %v10107_v3, %v10106_v24  ;;  %v7563_v46 = vld [vmem:[#allocation2 + $0xc4] sm:$0xf]  ;;  %v7564_v2 = vld [vmem:[#allocation2 + $0xc8] sm:$0xf]  ;;  %v10108_v44 = vld [vmem:[#allocation54_spill] sm:$0xff]  ;;  %v9394_v3 = vpop.f32.mrf.mxu0 }
 0x1d8   : > { %v6487_v41 = vcombine.low %v7563_v46, %v7564_v2  ;;  %v9383_v48 = vadd.f32 %v10108_v44, %v1362_v23  ;;  %10110 = vst [vmem:[#allocation55_spill] sm:$0xff] %v9385_v9  ;;  %10111 = vst [vmem:[#allocation54_spill] sm:$0xff] %v9387_v6  ;;  %v5359_v12 = vrot.slane %v5358_v57, 4  ;;  %v10112_v47 = vld [vmem:[#allocation56_spill] sm:$0xff]  ;;  %v5375_v24 = vshll.u32 %v5108_v10, 16  ;;  %7325 = vmatprep.mubr.bf16.mxu0 %v6509_v53  ;;  %v9396_v46 = vpop.f32.mrf.mxu1 }
 0x1d9   : > { %v9390_v0 = vadd.f32 %v10112_v47, %v1354_v5  ;;  %v5354_v61 = vsel %vm8315_vm10, %v5349_v59, %v5353_v21  ;;  %v5368_v43 = vrot.slane %v5366_v52, 4  ;;  %v5379_v33 = vshrl.u32 %v5108_v10, 16  ;;  %v5110_v23 = vld [vmem:[#allocation2 + $0xd4] sm:$0xf]  ;;  %10114 = vst [vmem:[#allocation71_spill] sm:$0xff] %v9394_v3  ;;  %10115 = vst [vmem:[#allocation72_spill] sm:$0xff] %v9396_v46 }
 0x1da   : > { %10109 = vst [vmem:[#allocation17_spill] sm:$0xff] %v9383_v48  ;;  %7281 = vmatprep.mubr.bf16.mxu1 %v6487_v41  ;;  %v5385_v44 = vshll.u32 %v5109_v11, 16  ;;  %v5364_v57 = vsel %vm8315_vm10, %v5359_v12, %v5363_v35  ;;  %v5371_v5 = vrot.slane %v5369_v40, 5  ;;  %v5377_v2 = vrot.slane %v5375_v24, 5  ;;  %v10116_v41 = vld [vmem:[#allocation18_spill] sm:$0xff]  ;;  %v9404_v3 = vpop.f32.mrf.mxu1  ;;  %v10119_v48 = vld [vmem:[#allocation57_spill] sm:$0xff] }
 0x1db   : > { %10113 = vst [vmem:[#allocation56_spill] sm:$0xff] %v9390_v0  ;;  %v1375_v22 = vadd.f32 %v9118_v29, %v10116_v41  ;;  %v5111_v53 = vld [vmem:[#allocation2 + $0xd8] sm:$0xf]  ;;  %v5112_v47 = vld [vmem:[#allocation2 + $0xdc] sm:$0x1]  ;;  %v6510_v9 = vcombine.low %v5354_v61, %v5364_v57  ;;  %v5381_v21 = vrot.slane %v5379_v33, 4  ;;  %v9402_v0 = vpop.f32.mrf.mxu0 }
 0x1dc   : > { %v5387_v59 = vrot.slane %v5385_v44, 5  ;;  %v7565_v10 = vld [vmem:[#allocation2 + $0xd4] sm:$0xf]  ;;  %v7566_v11 = vld [vmem:[#allocation2 + $0xd8] sm:$0xf]  ;;  %10117 = vst [vmem:[#allocation18_spill] sm:$0xff] %v9402_v0  ;;  %v5372_v46 = vor.u32 %v5371_v5, %v5368_v43  ;;  %v9411_v57 = vpop.f32.mrf.mxu1 }
 0x1dd   : > { %v6488_v52 = vcombine.low %v7565_v10, %v7566_v11  ;;  %10118 = vst [vmem:[#allocation73_spill] sm:$0xff] %v9404_v3  ;;  %v9407_v35 = vadd.f32 %v10119_v48, %v1375_v22  ;;  %v5390_v12 = vshrl.u32 %v5110_v23, 16  ;;  %v5393_v40 = vshll.u32 %v5110_v23, 16  ;;  %7326 = vmatmul.mubr.bf16.gmra.mxu0 %v6510_v9  ;;  %v9409_v44 = vpop.f32.mrf.mxu0  ;;  %10122 = vst [vmem:[#allocation75_spill] sm:$0xff] %v9411_v57  ;;  %v10123_v0 = vld [vmem:[#allocation22_spill] sm:$0xff] }
 0x1de   : > { %v5382_v29 = vor.u32 %v5381_v21, %v5377_v2  ;;  %v5399_v24 = vshll.u32 %v5111_v53, 16  ;;  %v5403_v61 = vshrl.u32 %v5111_v53, 16  ;;  %v5409_v33 = vshll.u32 %v5112_v47, 16  ;;  %10121 = vst [vmem:[#allocation74_spill] sm:$0xff] %v9409_v44  ;;  %v10124_v43 = vld [vmem:[#allocation58_spill] sm:$0xff]  ;;  %v10127_v44 = vld [vmem:[#allocation59_spill] sm:$0xff] }
 0x1df   : > { %10120 = vst [vmem:[#allocation57_spill] sm:$0xff] %v9407_v35  ;;  %7282 = vmatmul.mubr.bf16.gmra.mxu1 %v6488_v52  ;;  %v5373_v41 = vrot.slane %v5372_v46, 4  ;;  %v5392_v10 = vrot.slane %v5390_v12, 4  ;;  %v5395_v11 = vrot.slane %v5393_v40, 5  ;;  %v1367_v5 = vadd.f32 %v10124_v43, %v10123_v0  ;;  %v5113_v9 = vld [vmem:[#allocation2 + $0xe4] sm:$0xf]  ;;  %v9415_v21 = vpop.f32.mrf.mxu0  ;;  %v9417_v52 = vpop.f32.mrf.mxu1 }
 0x1e0   : > { %v5383_v48 = vrot.slane %v5382_v29, 4  ;;  %v5401_v22 = vrot.slane %v5399_v24, 5  ;;  %v5405_v35 = vrot.slane %v5403_v61, 4  ;;  %v5411_v23 = vrot.slane %v5409_v33, 5  ;;  %10125 = vst [vmem:[#allocation22_spill] sm:$0xff] %v9415_v21  ;;  %10126 = vst [vmem:[#allocation58_spill] sm:$0xff] %v9417_v52 }
 0x1e1   : > { %v5378_v53 = vsel %vm8315_vm10, %v5373_v41, %v5377_v2  ;;  %v5396_v47 = vor.u32 %v5395_v11, %v5392_v10  ;;  %v9422_v46 = vadd.f32 %v10127_v44, %v1367_v5  ;;  %v10128_v12 = vld [vmem:[#allocation21_spill] sm:$0xff]  ;;  %v10129_v40 = vld [vmem:[#allocation60_spill] sm:$0xff]  ;;  %v5114_v0 = vld [vmem:[#allocation2 + $0xe8] sm:$0xf]  ;;  %v9430_v2 = vpop.f32.mrf.mxu0  ;;  %v9432_v41 = vpop.f32.mrf.mxu1 }
 0x1e2   : > { %v1378_v57 = vadd.f32 %v10129_v40, %v10128_v12  ;;  %v5388_v29 = vsel %vm8315_vm10, %v5383_v48, %v5387_v59  ;;  %v5406_v24 = vor.u32 %v5405_v35, %v5401_v22  ;;  %v10130_v61 = vld [vmem:[#allocation23_spill] sm:$0xff]  ;;  %v10131_v33 = vld [vmem:[#allocation62_spill] sm:$0xff]  ;;  %v5115_v6 = vld [vmem:[#allocation2 + $0xec] sm:$0x1]  ;;  %v5414_v12 = vshrl.u32 %v5113_v9, 16 }
 0x1e3   : > { %v1370_v43 = vadd.f32 %v10131_v33, %v10130_v61  ;;  %v7567_v21 = vld [vmem:[#allocation2 + $0xe4] sm:$0xf]  ;;  %v7568_v52 = vld [vmem:[#allocation2 + $0xe8] sm:$0xf]  ;;  %v6511_v44 = vcombine.low %v5378_v53, %v5388_v29  ;;  %v5397_v10 = vrot.slane %v5396_v47, 4  ;;  %v10132_v11 = vld [vmem:[#allocation61_spill] sm:$0xff]  ;;  %v9440_v61 = vpop.f32.mrf.mxu0 }
 0x1e4   : > { %v6489_v3 = vcombine.low %v7567_v21, %v7568_v52  ;;  %v9435_v5 = vadd.f32 %v10132_v11, %v1378_v57  ;;  %v5407_v40 = vrot.slane %v5406_v24, 4  ;;  %v5417_v35 = vshll.u32 %v5113_v9, 16  ;;  %10134 = vst [vmem:[#allocation21_spill] sm:$0xff] %v9440_v61  ;;  %v9442_v21 = vpop.f32.mrf.mxu1  ;;  %v5116_v29 = vld [vmem:[#allocation2 + $0xf4] sm:$0xf] }
 0x1e5   : > { %v9438_v59 = vadd.f32 %v9144_v34, %v1370_v43  ;;  %v5423_v48 = vshll.u32 %v5114_v0, 16  ;;  %10135 = vst [vmem:[#allocation60_spill] sm:$0xff] %v9442_v21  ;;  %7329 = vmatprep.mubr.bf16.mxu0 %v6511_v44  ;;  %v5402_v52 = vsel %vm8315_vm10, %v5397_v10, %v5401_v22  ;;  %v5416_v53 = vrot.slane %v5414_v12, 4  ;;  %v5117_v43 = vld [vmem:[#allocation2 + $0xf8] sm:$0xf]  ;;  %v9450_v61 = vpop.f32.mrf.mxu0 }
 0x1e6   : > { %7285 = vmatprep.mubr.bf16.mxu1 %v6489_v3  ;;  %v5427_v47 = vshrl.u32 %v5114_v0, 16  ;;  %v5433_v57 = vshll.u32 %v5115_v6, 16  ;;  %v5412_v24 = vsel %vm8315_vm10, %v5407_v40, %v5411_v23  ;;  %v5419_v34 = vrot.slane %v5417_v35, 5  ;;  %v10136_v3 = vld [vmem:[#allocation24_spill] sm:$0xff]  ;;  %v5118_v11 = vld [vmem:[#allocation2 + $0xfc] sm:$0x1]  ;;  %v9452_v44 = vpop.f32.mrf.mxu1 }
 0x1e7   : > { %10133 = vst [vmem:[#allocation59_spill] sm:$0xff] %v9438_v59  ;;  %v5425_v33 = vrot.slane %v5423_v48, 5  ;;  %v1391_v9 = vadd.f32 %v9148_v25, %v10136_v3  ;;  %10137 = vst [vmem:[#allocation23_spill] sm:$0xff] %v9450_v61  ;;  %v6512_v21 = vcombine.low %v5402_v52, %v5412_v24  ;;  %v7569_v0 = vld [vmem:[#allocation2 + $0xf4] sm:$0xf]  ;;  %v5438_v40 = vshrl.u32 %v5116_v29, 16  ;;  %v9457_v48 = vpop.f32.mrf.mxu0 }
 0x1e8   : > { %10138 = vst [vmem:[#allocation62_spill] sm:$0xff] %v9452_v44  ;;  %v5429_v22 = vrot.slane %v5427_v47, 4  ;;  %v5435_v10 = vrot.slane %v5433_v57, 5  ;;  %v7570_v6 = vld [vmem:[#allocation2 + $0xf8] sm:$0xf]  ;;  %v5420_v59 = vor.u32 %v5419_v34, %v5416_v53  ;;  %v5441_v35 = vshll.u32 %v5116_v29, 16  ;;  %v9459_v25 = vpop.f32.mrf.mxu1 }
 0x1e9   : > { %v6490_v12 = vcombine.low %v7569_v0, %v7570_v6  ;;  %v9455_v23 = vadd.f32 %v9156_v36, %v1391_v9  ;;  %10139 = vst [vmem:[#allocation61_spill] sm:$0xff] %v9457_v48  ;;  %7330 = vmatmul.mubr.bf16.gmra.mxu0 %v6512_v21  ;;  %v5447_v61 = vshll.u32 %v5117_v43, 16  ;;  %v5451_v52 = vshrl.u32 %v5117_v43, 16  ;;  %v10140_v0 = vld [vmem:[#allocation25_spill] sm:$0xff]  ;;  %v9463_v36 = vpop.f32.mrf.mxu0  ;;  %v5119_v21 = vld [vmem:[#allocation2 + $0x104] sm:$0xf] }
 0x1ea   : > { %v5430_v3 = vor.u32 %v5429_v22, %v5425_v33  ;;  %v5457_v47 = vshll.u32 %v5118_v11, 16  ;;  %v5421_v57 = vrot.slane %v5420_v59, 4  ;;  %v5440_v24 = vrot.slane %v5438_v40, 4  ;;  %10141 = vst [vmem:[#allocation24_spill] sm:$0xff] %v9463_v36  ;;  %v9465_v34 = vpop.f32.mrf.mxu1  ;;  %v10142_v11 = vld [vmem:[#allocation27_spill] sm:$0xff] }
 0x1eb   : > { %7286 = vmatmul.mubr.bf16.gmra.mxu1 %v6490_v12  ;;  %v5443_v44 = vrot.slane %v5441_v35, 5  ;;  %v1383_v53 = vadd.f32 %v9158_v37, %v10140_v0  ;;  %v5449_v9 = vrot.slane %v5447_v61, 5  ;;  %v5453_v6 = vrot.slane %v5451_v52, 4  ;;  %v5120_v37 = vld [vmem:[#allocation2 + $0x108] sm:$0xf]  ;;  %v9474_v40 = vpop.f32.mrf.mxu0  ;;  %v10144_v52 = vld [vmem:[#allocation29_spill] sm:$0xff] }
 0x1ec   : > { %v5431_v29 = vrot.slane %v5430_v3, 4  ;;  %v5459_v48 = vrot.slane %v5457_v47, 5  ;;  %v5426_v22 = vsel %vm8315_vm10, %v5421_v57, %v5425_v33  ;;  %v1394_v12 = vadd.f32 %v9165_v7, %v10142_v11  ;;  %10143 = vst [vmem:[#allocation25_spill] sm:$0xff] %v9474_v40  ;;  %v9476_v35 = vpop.f32.mrf.mxu1  ;;  %v7571_v33 = vld [vmem:[#allocation2 + $0x104] sm:$0xf] }
 0x1ed   : > { %v5444_v43 = vor.u32 %v5443_v44, %v5440_v24  ;;  %v9470_v59 = vadd.f32 %v9163_v50, %v1383_v53  ;;  %v5454_v3 = vor.u32 %v5453_v6, %v5449_v9  ;;  %v1386_v47 = vadd.f32 %v9181_v60, %v10144_v52  ;;  %v7572_v44 = vld [vmem:[#allocation2 + $0x108] sm:$0xf]  ;;  %v5121_v50 = vld [vmem:[#allocation2 + $0x10c] sm:$0x1]  ;;  %v9485_v11 = vpop.f32.mrf.mxu0  ;;  %v301_v60 = vld [vmem:[#allocation2 + $0x11c] sm:$0x1] }
 0x1ee   : > { %v5436_v61 = vsel %vm8315_vm10, %v5431_v29, %v5435_v10  ;;  %v6491_v57 = vcombine.low %v7571_v33, %v7572_v44  ;;  %v9483_v7 = vadd.f32 %v9171_v18, %v1394_v12  ;;  %v5462_v53 = vshrl.u32 %v5119_v21, 16  ;;  %10145 = vst [vmem:[#allocation27_spill] sm:$0xff] %v9485_v11  ;;  %v5122_v18 = vld [vmem:[#allocation2 + $0x114] sm:$0xf]  ;;  %v9492_v12 = vpop.f32.mrf.mxu1  ;;  %v5123_v44 = vld [vmem:[#allocation2 + $0x118] sm:$0xf] }
 0x1ef   : > { %v6513_v24 = vcombine.low %v5426_v22, %v5436_v61  ;;  %v5445_v0 = vrot.slane %v5444_v43, 4  ;;  %v5455_v40 = vrot.slane %v5454_v3, 4  ;;  %v9488_v36 = vadd.f32 %v9192_v63, %v1386_v47  ;;  %10146 = vst [vmem:[#allocation29_spill] sm:$0xff] %v9492_v12  ;;  %v9494_v52 = vpop.f32.mrf.mxu0 }
 0x1f0   : > { %7289 = vmatprep.mubr.bf16.mxu1 %v6491_v57  ;;  %v5465_v10 = vshll.u32 %v5119_v21, 16  ;;  %v5471_v29 = vshll.u32 %v5120_v37, 16  ;;  %v5464_v22 = vrot.slane %v5462_v53, 4  ;;  %v5475_v43 = vshrl.u32 %v5120_v37, 16  ;;  %10147 = vst [vmem:[#allocation76_spill] sm:$0xff] %v9494_v52  ;;  %v10148_v21 = vld [vmem:[#allocation31_spill] sm:$0xff]  ;;  %v9500_v53 = vpop.f32.mrf.mxu1 }
 0x1f1   : > { %7333 = vmatprep.mubr.bf16.mxu0 %v6513_v24  ;;  %v5450_v6 = vsel %vm8315_vm10, %v5445_v0, %v5449_v9  ;;  %v5481_v61 = vshll.u32 %v5121_v50, 16  ;;  %v5460_v63 = vsel %vm8315_vm10, %v5455_v40, %v5459_v48  ;;  %v1407_v33 = vadd.f32 %v9198_v28, %v10148_v21  ;;  %v7573_v0 = vld [vmem:[#allocation2 + $0x114] sm:$0xf]  ;;  %v7574_v37 = vld [vmem:[#allocation2 + $0x118] sm:$0xf]  ;;  %v9502_v11 = vpop.f32.mrf.mxu0 }
 0x1f2   : > { %v5467_v3 = vrot.slane %v5465_v10, 5  ;;  %v5473_v47 = vrot.slane %v5471_v29, 5  ;;  %v6514_v57 = vcombine.low %v5450_v6, %v5460_v63  ;;  %v5477_v24 = vrot.slane %v5475_v43, 4 }
 0x1f3   : > { %v5483_v9 = vrot.slane %v5481_v61, 5  ;;  %v6492_v50 = vcombine.low %v7573_v0, %v7574_v37  ;;  %v9505_v12 = vadd.f32 %v9205_v58, %v1407_v33  ;;  %v302_v40 = vsel %vm8255_vm9, 0, %v301_v60  ;;  %v9509_v61 = vpop.f32.mrf.mxu1  ;;  %v9511_v63 = vpop.f32.mrf.mxu0  ;;  %v10151_v33 = vld [vmem:[#allocation34_spill] sm:$0xff] }
 0x1f4   : > { %v5468_v52 = vor.u32 %v5467_v3, %v5464_v22  ;;  %v5486_v10 = vshrl.u32 %v5122_v18, 16  ;;  %7334 = vmatmul.mubr.bf16.gmra.mxu0 %v6514_v57  ;;  %v5478_v28 = vor.u32 %v5477_v24, %v5473_v47  ;;  %303 = vst [vmem:[#allocation2 + $0x11c] sm:$0x1] %v302_v40  ;;  %v5489_v29 = vshll.u32 %v5122_v18, 16  ;;  %v10150_v3 = vld [vmem:[#allocation32_spill] sm:$0xff] }
 0x1f5   : > { %7290 = vmatmul.mubr.bf16.gmra.mxu1 %v6492_v50  ;;  %v5495_v6 = vshll.u32 %v5123_v44, 16  ;;  %v5499_v43 = vshrl.u32 %v5123_v44, 16  ;;  %v1399_v58 = vadd.f32 %v9207_v16, %v10150_v3  ;;  %v1410_v60 = vadd.f32 %v9211_v26, %v10151_v33  ;;  %v9517_v50 = vpop.f32.mrf.mxu1  ;;  %v9519_v18 = vpop.f32.mrf.mxu0  ;;  %v10152_v16 = vld [vmem:[#allocation36_spill] sm:$0xff] }
 0x1f6   : > { %v5469_v21 = vrot.slane %v5468_v52, 4  ;;  %v5488_v22 = vrot.slane %v5486_v10, 4  ;;  %v5479_v0 = vrot.slane %v5478_v28, 4  ;;  %v5491_v57 = vrot.slane %v5489_v29, 5  ;;  %v10155_v33 = vld [vmem:[#allocation28_spill] sm:$0xff] }
 0x1f7   : > { %v5497_v24 = vrot.slane %v5495_v6, 5  ;;  %v5501_v37 = vrot.slane %v5499_v43, 4  ;;  %v9524_v52 = vadd.f32 %v9209_v30, %v1399_v58  ;;  %v9527_v48 = vadd.f32 %v9215_v62, %v1410_v60  ;;  %v10158_v60 = vld [vmem:[#allocation64_spill] sm:$0xff] }
 0x1f8   : > { %v5474_v44 = vsel %vm8315_vm10, %v5469_v21, %v5473_v47  ;;  %v1402_v26 = vadd.f32 %v9217_v49, %v10152_v16  ;;  %v5484_v40 = vsel %vm8315_vm10, %v5479_v0, %v5483_v9  ;;  %v5492_v10 = vor.u32 %v5491_v57, %v5488_v22  ;;  %v9547_v22 = vpop.f32.mrf.mxu1  ;;  %v10159_v0 = vld [vmem:[#allocation42_spill] sm:$0xff] }
 0x1f9   : > { %v5502_v28 = vor.u32 %v5501_v37, %v5497_v24  ;;  %v2862_v29 = vadd.f32 %v9232_v1, %v9161_v20  ;;  %v6515_v6 = vcombine.low %v5474_v44, %v5484_v40  ;;  %v2860_v30 = vadd.f32 %v9242_v19, %v9184_v4  ;;  %v9549_v20 = vpop.f32.mrf.mxu0  ;;  %v10161_v44 = vld [vmem:[#allocation65_spill] sm:$0xff]  ;;  %v10164_v40 = vld [vmem:[#allocation44_spill] sm:$0xff] }
 0x1fa   : > { %v9536_v47 = vadd.f32 %v9230_v56, %v1402_v26  ;;  %v2863_v62 = vadd.f32 %v9252_v55, %v9187_v45  ;;  %v5493_v43 = vrot.slane %v5492_v10, 4  ;;  %v2861_v9 = vadd.f32 %v9259_v32, %v9190_v8  ;;  %v10153_v32 = vld [vmem:[#allocation40_spill] sm:$0xff]  ;;  %v9568_v3 = vpop.f32.mrf.mxu1  ;;  %v10163_v26 = vld [vmem:[#allocation38_spill] sm:$0xff] }
 0x1fb   : > { %v5503_v49 = vrot.slane %v5502_v28, 4  ;;  %v9543_v21 = vadd.f32 %v9240_v14, %v2862_v29  ;;  %7337 = vmatprep.mubr.bf16.mxu0 %v6515_v6  ;;  %v5124_v56 = vld [vmem:[#allocation2 + $0x11c] sm:$0x1]  ;;  %v9552_v1 = vadd.f32 %v9250_v39, %v2860_v30  ;;  %v2866_v45 = vadd.f32 %v9265_v51, %v9203_v27  ;;  %v10156_v51 = vld [vmem:[#allocation63_spill] sm:$0xff]  ;;  %v4564_v28 = vpop.f32.mrf.mxu0 }
 0x1fc   : > { %v9555_v4 = vadd.f32 %v9257_v38, %v2863_v62  ;;  %v2864_v14 = vadd.f32 %v9276_v13, %v9222_v17  ;;  %v5498_v8 = vsel %vm8315_vm10, %v5493_v43, %v5497_v24  ;;  %v5505_v19 = vshll.u32 %v5124_v56, 16  ;;  %v10154_v38 = vld [vmem:[#allocation26_spill] sm:$0xff]  ;;  %v10166_v30 = vld [vmem:[#allocation67_spill] sm:$0xff] }
 0x1fd   : > { %v9564_v55 = vadd.f32 %v9263_v31, %v2861_v9  ;;  %v2867_v39 = vadd.f32 %v10153_v32, %v9235_v54  ;;  %v9571_v58 = vadd.f32 %v10154_v38, %v2866_v45  ;;  %v10157_v17 = vld [vmem:[#allocation66_spill] sm:$0xff]  ;;  %v2870_v57 = vadd.f32 %v10159_v0, %v10158_v60  ;;  %v10160_v31 = vld [vmem:[#allocation41_spill] sm:$0xff]  ;;  %v10162_v54 = vld [vmem:[#allocation68_spill] sm:$0xff]  ;;  %v9607_v60 = vpop.f32.mrf.mxu1 }
 0x1fe   : > { %v9574_v27 = vadd.f32 %v10155_v33, %v2864_v14  ;;  %v2865_v13 = vadd.f32 %v10157_v17, %v10156_v51  ;;  %v5507_v24 = vrot.slane %v5505_v19, 5  ;;  %v2868_v16 = vadd.f32 %v10162_v54, %v10161_v44  ;;  %v10165_v29 = vld [vmem:[#allocation30_spill] sm:$0xff]  ;;  %v10167_v43 = vld [vmem:[#allocation39_spill] sm:$0xff]  ;;  %v10169_v45 = vld [vmem:[#allocation48_spill] sm:$0xff] }
 0x1ff   : > { %v9581_v37 = vadd.f32 %v10160_v31, %v2867_v39  ;;  %v2871_v10 = vadd.f32 %v10164_v40, %v10163_v26  ;;  %v9591_v62 = vadd.f32 %v10166_v30, %v2870_v57  ;;  %v2869_v9 = vadd.f32 %v9332_v15, %v10167_v43  ;;  %v10168_v56 = vld [vmem:[#allocation43_spill] sm:$0xff]  ;;  %v10170_v32 = vld [vmem:[#allocation33_spill] sm:$0xff] }
 0x200   : > { %v9588_v6 = vadd.f32 %v10165_v29, %v2865_v13  ;;  %v2874_v14 = vadd.f32 %v10169_v45, %v10168_v56  ;;  %v5508_v19 = vsel %vm8315_vm10, %v5503_v49, %v5507_v24  ;;  %v9600_v39 = vadd.f32 %v10170_v32, %v2868_v16  ;;  %v10171_v38 = vld [vmem:[#allocation35_spill] sm:$0xff]  ;;  %v10172_v51 = vld [vmem:[#allocation45_spill] sm:$0xff]  ;;  %v10177_v49 = vld [vmem:[#allocation70_spill] sm:$0xff] }
 0x201   : > { %v9603_v33 = vadd.f32 %v10171_v38, %v2871_v10  ;;  %v10173_v17 = vld [vmem:[#allocation49_spill] sm:$0xff]  ;;  %v6516_v0 = vcombine.low %v5498_v8, %v5508_v19  ;;  %v10174_v57 = vld [vmem:[#allocation47_spill] sm:$0xff]  ;;  %v2875_v24 = vadd.f32 %v10177_v49, %v10176_v42  ;;  %v10181_v29 = vld [vmem:[#allocation50_spill] sm:$0xff] }
 0x202   : > { %v2872_v13 = vadd.f32 %v10173_v17, %v10172_v51  ;;  %v9610_v15 = vadd.f32 %v10174_v57, %v2869_v9  ;;  %v10175_v31 = vld [vmem:[#allocation15_spill] sm:$0xff]  ;;  %v10178_v54 = vld [vmem:[#allocation69_spill] sm:$0xff]  ;;  %v10183_v56 = vld [vmem:[#allocation52_spill] sm:$0xff]  ;;  %v9626_v9 = vpop.f32.mrf.mxu0 }
 0x203   : > { %v9613_v44 = vadd.f32 %v10175_v31, %v2874_v14  ;;  %v10179_v26 = vld [vmem:[#allocation37_spill] sm:$0xff]  ;;  %v10180_v40 = vld [vmem:[#allocation51_spill] sm:$0xff]  ;;  %v10184_v8 = vld [vmem:[#allocation54_spill] sm:$0xff]  ;;  %7338 = vmatmul.mubr.bf16.gmra.mxu0 %v6516_v0 }
 0x204   : > { %v9618_v16 = vadd.f32 %v10178_v54, %v2872_v13  ;;  %v2873_v10 = vadd.f32 %v10180_v40, %v10179_v26  ;;  %v10182_v30 = vld [vmem:[#allocation53_spill] sm:$0xff]  ;;  %v2876_v45 = vadd.f32 %v10184_v8, %v10183_v56  ;;  %v10185_v14 = vld [vmem:[#allocation16_spill] sm:$0xff]  ;;  %v10191_v42 = vld [vmem:[#allocation75_spill] sm:$0xff]  ;;  %v9648_v8 = vpop.f32.mrf.mxu1 }
 0x205   : > { %v2878_v43 = vadd.f32 %v10182_v30, %v10181_v29  ;;  %v9629_v19 = vadd.f32 %v10185_v14, %v2875_v24  ;;  %v10186_v32 = vld [vmem:[#allocation17_spill] sm:$0xff]  ;;  %v10187_v38 = vld [vmem:[#allocation72_spill] sm:$0xff]  ;;  %v10192_v54 = vld [vmem:[#allocation19_spill] sm:$0xff] }
 0x206   : > { %v2879_v51 = vadd.f32 %v10187_v38, %v10186_v32  ;;  %v10188_v17 = vld [vmem:[#allocation56_spill] sm:$0xff]  ;;  %v10189_v13 = vld [vmem:[#allocation73_spill] sm:$0xff]  ;;  %v9638_v26 = vadd.f32 %v10192_v54, %v2873_v10  ;;  %v10193_v40 = vld [vmem:[#allocation55_spill] sm:$0xff] }
 0x207   : > { %v2877_v57 = vadd.f32 %v10189_v13, %v10188_v17  ;;  %v10190_v31 = vld [vmem:[#allocation57_spill] sm:$0xff]  ;;  %v9641_v29 = vadd.f32 %v10193_v40, %v2878_v43  ;;  %v10194_v30 = vld [vmem:[#allocation71_spill] sm:$0xff]  ;;  %v10195_v24 = vld [vmem:[#allocation58_spill] sm:$0xff]  ;;  %v2883_v43 = vadd.f32 %v9432_v41, %v9435_v5  ;;  %v2887_v41 = vadd.f32 %v9465_v34, %v9483_v7 }
 0x208   : > { %v2882_v49 = vadd.f32 %v10191_v42, %v10190_v31  ;;  %v9644_v0 = vadd.f32 %v10194_v30, %v2876_v45  ;;  %v2880_v56 = vadd.f32 %v10195_v24, %v9422_v46  ;;  %v10196_v14 = vld [vmem:[#allocation18_spill] sm:$0xff]  ;;  %v10199_v31 = vld [vmem:[#allocation59_spill] sm:$0xff]  ;;  %v10200_v42 = vld [vmem:[#allocation60_spill] sm:$0xff] }
 0x209   : > { %v9651_v32 = vadd.f32 %v10196_v14, %v2879_v51  ;;  %v10197_v38 = vld [vmem:[#allocation74_spill] sm:$0xff]  ;;  %v2881_v46 = vadd.f32 %v10200_v42, %v10199_v31  ;;  %v2884_v51 = vadd.f32 %v9459_v25, %v9470_v59  ;;  %v10202_v30 = vld [vmem:[#allocation21_spill] sm:$0xff]  ;;  %v10206_v25 = vld [vmem:[#allocation24_spill] sm:$0xff]  ;;  %v2891_v42 = vadd.f32 %v9509_v61, %v9527_v48 }
 0x20a   : > { %v9654_v17 = vadd.f32 %v10197_v38, %v2877_v57  ;;  %v10198_v13 = vld [vmem:[#allocation22_spill] sm:$0xff]  ;;  %v9662_v45 = vadd.f32 %v9430_v2, %v2880_v56  ;;  %v9670_v57 = vpop.f32.mrf.mxu0  ;;  %v2885_v2 = vadd.f32 %v9476_v35, %v9488_v36  ;;  %v10203_v5 = vld [vmem:[#allocation29_spill] sm:$0xff]  ;;  %v10204_v56 = vld [vmem:[#allocation23_spill] sm:$0xff] }
 0x20b   : > { %v9657_v10 = vadd.f32 %v10198_v13, %v2882_v49  ;;  %v10201_v54 = vld [vmem:[#allocation62_spill] sm:$0xff]  ;;  %v9673_v49 = vadd.f32 %v10202_v30, %v2883_v43  ;;  %v2890_v24 = vadd.f32 %v10203_v5, %v9505_v12  ;;  %v9682_v14 = vadd.f32 %v10204_v56, %v2881_v46  ;;  %v7171_v43 = vpop.f32.mrf.mxu1  ;;  %v10207_v34 = vld [vmem:[#allocation25_spill] sm:$0xff]  ;;  %v10208_v36 = vld [vmem:[#allocation27_spill] sm:$0xff] }
 0x20c   : > { %v2886_v40 = vadd.f32 %v10201_v54, %v9455_v23  ;;  %v10205_v23 = vld [vmem:[#allocation61_spill] sm:$0xff]  ;;  %v9688_v59 = vadd.f32 %v10206_v25, %v2884_v51  ;;  %v2888_v13 = vadd.f32 %v9500_v53, %v9524_v52  ;;  %v9693_v7 = vadd.f32 %v10207_v34, %v2887_v41  ;;  %v10209_v12 = vld [vmem:[#allocation76_spill] sm:$0xff] }
 0x20d   : > { %v9696_v35 = vadd.f32 %v10208_v36, %v2885_v2  ;;  %v9699_v31 = vadd.f32 %v10209_v12, %v2890_v24  ;;  %v2889_v54 = vadd.f32 %v9517_v50, %v9536_v47  ;;  %v3970_v53 = vadd.f32 %v9547_v22, %v9543_v21  ;;  %v3857_v51 = vpop.f32.mrf.mxu1 }
 0x20e   : > { %v9685_v38 = vadd.f32 %v10205_v23, %v2886_v40  ;;  %v9704_v46 = vadd.f32 %v9502_v11, %v2888_v13  ;;  %v3968_v52 = vadd.f32 %v9568_v3, %v9552_v1  ;;  %v7219_v40 = vpop.f32.mrf.mxu0  ;;  %v9713_v30 = vadd.f32 %v9511_v63, %v2891_v42 }
 0x20f   : > { %v3974_v41 = vadd.f32 %v7171_v43, %v9571_v58  ;;  %v9717_v61 = vadd.f32 %v9519_v18, %v2889_v54  ;;  %v9720_v11 = vadd.f32 %v9549_v20, %v3970_v53  ;;  %v3972_v48 = vadd.f32 %v3857_v51, %v9574_v27  ;;  %v9729_v1 = vpop.f32.mrf.mxu1 }
 0x210   : > { %v9722_v50 = vadd.f32 %v4564_v28, %v3968_v52  ;;  %v4580_v21 = vpop.f32.mrf.mxu0 }
 0x211   : > { %v9725_v47 = vadd.f32 %v7219_v40, %v3974_v41  ;;  %v9727_v22 = vadd.f32 %v4580_v21, %v3972_v48  ;;  %v9733_v3 = vpop.f32.mrf.mxu1 }
 0x212   : > { %v9731_v63 = vpop.f32.mrf.mxu0 }
 0x214   : > { %v9735_v18 = vpop.f32.mrf.mxu0  ;;  %v7175_v58 = vpop.f32.mrf.mxu1 }
 0x215   : > { %v3978_v20 = vadd.f32 %v7175_v58, %v9591_v62 }
 0x216   : > { %v3873_v28 = vpop.f32.mrf.mxu1 }
 0x217   : > { %v7223_v2 = vpop.f32.mrf.mxu0  ;;  %v3976_v27 = vadd.f32 %v3873_v28, %v9600_v39 }
 0x218   : > { %v9739_v5 = vadd.f32 %v7223_v2, %v3978_v20  ;;  %v7176_v24 = vpop.f32.mrf.mxu1 }
 0x219   : > { %v4596_v56 = vpop.f32.mrf.mxu0  ;;  %v3979_v23 = vadd.f32 %v7176_v24, %v9603_v33 }
 0x21a   : > { %v9742_v25 = vadd.f32 %v4596_v56, %v3976_v27  ;;  %v3876_v13 = vpop.f32.mrf.mxu1 }
 0x21b   : > { %v7224_v43 = vpop.f32.mrf.mxu0  ;;  %v3977_v34 = vadd.f32 %v3876_v13, %v9610_v15 }
 0x21c   : > { %v9745_v36 = vadd.f32 %v7224_v43, %v3979_v23 }
 0x21d   : > { %v4599_v12 = vpop.f32.mrf.mxu0 }
 0x21e   : > { %v9747_v62 = vadd.f32 %v4599_v12, %v3977_v34 }
 0x224   : > { %v7179_v42 = vpop.f32.mrf.mxu1 }
 0x225   : > { %v3982_v39 = vadd.f32 %v7179_v42, %v9613_v44  ;;  %v7227_v54 = vpop.f32.mrf.mxu0 }
 0x226   : > { %v3889_v53 = vpop.f32.mrf.mxu1 }
 0x227   : > { %v9750_v52 = vadd.f32 %v7227_v54, %v3982_v39  ;;  %v3980_v33 = vadd.f32 %v3889_v53, %v9618_v16  ;;  %v4612_v40 = vpop.f32.mrf.mxu0 }
 0x228   : > { %v7180_v51 = vpop.f32.mrf.mxu1 }
 0x229   : > { %v9753_v41 = vadd.f32 %v4612_v40, %v3980_v33  ;;  %v3983_v15 = vadd.f32 %v7180_v51, %v9629_v19  ;;  %v7228_v48 = vpop.f32.mrf.mxu0 }
 0x22a   : > { %v3892_v21 = vpop.f32.mrf.mxu1 }
 0x22b   : > { %v9756_v58 = vadd.f32 %v7228_v48, %v3983_v15  ;;  %v3981_v20 = vadd.f32 %v3892_v21, %v9638_v26  ;;  %v4615_v28 = vpop.f32.mrf.mxu0 }
 0x22d   : > { %v9759_v44 = vadd.f32 %v4615_v28, %v3981_v20 }
 0x232   : > { %v7183_v2 = vpop.f32.mrf.mxu1 }
 0x233   : > { %v3986_v27 = vadd.f32 %v7183_v2, %v9641_v29 }
 0x234   : > { %v3905_v24 = vpop.f32.mrf.mxu1 }
 0x235   : > { %v7231_v16 = vpop.f32.mrf.mxu0  ;;  %v3984_v56 = vadd.f32 %v3905_v24, %v9644_v0 }
 0x236   : > { %v9763_v23 = vadd.f32 %v7231_v16, %v3986_v27  ;;  %v7184_v13 = vpop.f32.mrf.mxu1 }
 0x237   : > { %v4628_v19 = vpop.f32.mrf.mxu0  ;;  %v3987_v43 = vadd.f32 %v7184_v13, %v9651_v32 }
 0x238   : > { %v9766_v34 = vadd.f32 %v4628_v19, %v3984_v56  ;;  %v3908_v12 = vpop.f32.mrf.mxu1 }
 0x239   : > { %v7232_v26 = vpop.f32.mrf.mxu0  ;;  %v3985_v42 = vadd.f32 %v3908_v12, %v9654_v17 }
 0x23a   : > { %v9769_v39 = vadd.f32 %v7232_v26, %v3987_v43 }
 0x23b   : > { %v4631_v54 = vpop.f32.mrf.mxu0 }
 0x23c   : > { %v9771_v29 = vadd.f32 %v4631_v54, %v3985_v42 }
 0x244   : > { %v7187_v53 = vpop.f32.mrf.mxu1 }
 0x245   : > { %v3990_v0 = vadd.f32 %v7187_v53, %v9657_v10  ;;  %v7235_v33 = vpop.f32.mrf.mxu0 }
 0x246   : > { %v3921_v40 = vpop.f32.mrf.mxu1 }
 0x247   : > { %v9774_v51 = vadd.f32 %v7235_v33, %v3990_v0  ;;  %v3988_v32 = vadd.f32 %v3921_v40, %v9662_v45  ;;  %v4644_v15 = vpop.f32.mrf.mxu0 }
 0x248   : > { %v7188_v48 = vpop.f32.mrf.mxu1 }
 0x249   : > { %v9777_v21 = vadd.f32 %v4644_v15, %v3988_v32  ;;  %v3991_v17 = vadd.f32 %v7188_v48, %v9673_v49  ;;  %v7236_v20 = vpop.f32.mrf.mxu0 }
 0x24a   : > { %v3924_v28 = vpop.f32.mrf.mxu1 }
 0x24b   : > { %v9780_v2 = vadd.f32 %v7236_v20, %v3991_v17  ;;  %v3989_v27 = vadd.f32 %v3924_v28, %v9682_v14  ;;  %v4647_v24 = vpop.f32.mrf.mxu0 }
 0x24d   : > { %v9783_v10 = vadd.f32 %v4647_v24, %v3989_v27  ;;  %v3971_v24 = vadd.f32 %v9607_v60, %v9555_v4 }
 0x251   : > { %v7191_v16 = vpop.f32.mrf.mxu1 }
 0x252   : > { %v3994_v56 = vadd.f32 %v7191_v16, %v9685_v38 }
 0x253   : > { %v3937_v13 = vpop.f32.mrf.mxu1 }
 0x254   : > { %v3992_v45 = vadd.f32 %v3937_v13, %v9688_v59 }
 0x255   : > { %v7239_v19 = vpop.f32.mrf.mxu0  ;;  %v7192_v43 = vpop.f32.mrf.mxu1 }
 0x256   : > { %v9787_v12 = vadd.f32 %v7239_v19, %v3994_v56  ;;  %v3995_v49 = vadd.f32 %v7192_v43, %v9693_v7 }
 0x257   : > { %v4660_v26 = vpop.f32.mrf.mxu0  ;;  %v3940_v42 = vpop.f32.mrf.mxu1 }
 0x258   : > { %v9790_v54 = vadd.f32 %v4660_v26, %v3992_v45  ;;  %v3993_v14 = vadd.f32 %v3940_v42, %v9696_v35 }
 0x259   : > { %v7240_v53 = vpop.f32.mrf.mxu0 }
 0x25a   : > { %v9793_v0 = vadd.f32 %v7240_v53, %v3995_v49 }
 0x25b   : > { %v4663_v33 = vpop.f32.mrf.mxu0 }
 0x25c   : > { %v9795_v38 = vadd.f32 %v4663_v33, %v3993_v14 }
 0x264   : > { %v7195_v40 = vpop.f32.mrf.mxu1 }
 0x265   : > { %v3998_v59 = vadd.f32 %v7195_v40, %v9699_v31 }
 0x266   : > { %v3953_v32 = vpop.f32.mrf.mxu1 }
 0x267   : > { %v7243_v15 = vpop.f32.mrf.mxu0  ;;  %v3996_v48 = vadd.f32 %v3953_v32, %v9704_v46  ;;  %v3969_v46 = vadd.f32 %v9648_v8, %v9564_v55 }
 0x268   : > { %v9799_v7 = vadd.f32 %v7243_v15, %v3998_v59  ;;  %v7196_v17 = vpop.f32.mrf.mxu1 }
 0x269   : > { %v4676_v20 = vpop.f32.mrf.mxu0  ;;  %v3999_v28 = vadd.f32 %v7196_v17, %v9713_v30  ;;  %v4694_v30 = vadd.f32 %v9626_v9, %v3971_v24  ;;  %v3975_v9 = vadd.f32 %v9729_v1, %v9581_v37 }
 0x26a   : > { %v9802_v35 = vadd.f32 %v4676_v20, %v3996_v48  ;;  %v3956_v27 = vpop.f32.mrf.mxu1 }
 0x26b   : > { %v7244_v16 = vpop.f32.mrf.mxu0  ;;  %v3997_v56 = vadd.f32 %v3956_v27, %v9717_v61  ;;  %v4692_v61 = vadd.f32 %v9670_v57, %v3969_v46  ;;  %v3973_v57 = vadd.f32 %v9733_v3, %v9588_v6  ;;  %v4698_v37 = vadd.f32 %v9731_v63, %v3975_v9 }
 0x26c   : > { %v9807_v31 = vadd.f32 %v7244_v16, %v3999_v28  ;;  %v7263_v13 = vpop.f32.mrf.mxu1 }
 0x26d   : > { %v4679_v45 = vpop.f32.mrf.mxu0  ;;  %v5047_v26 = vadd.f32 %v7263_v13, %v9720_v11  ;;  %v4696_v46 = vadd.f32 %v9735_v18, %v3973_v57 }
 0x26e   : > { %v9811_v19 = vadd.f32 %v4679_v45, %v3997_v56  ;;  %v4918_v43 = vpop.f32.mrf.mxu1 }
 0x26f   : > { %v7311_v49 = vpop.f32.mrf.mxu0  ;;  %v5045_v4 = vadd.f32 %v4918_v43, %v9722_v50 }
 0x270   : > { %v7264_v60 = vpop.f32.mrf.mxu1  ;;  %v5801_v8 = vadd.f32 %v7311_v49, %v5047_v26 }
 0x271   : > { %v5672_v42 = vpop.f32.mrf.mxu0  ;;  %v5048_v14 = vadd.f32 %v7264_v60, %v4694_v30 }
 0x272   : > { %v4921_v53 = vpop.f32.mrf.mxu1  ;;  %v5799_v40 = vadd.f32 %v5672_v42, %v5045_v4  ;;  %v6031_v16 = vmul.f32 %v5801_v8, %v5801_v8 }
 0x273   : > { %v7312_v33 = vpop.f32.mrf.mxu0  ;;  %v5046_v55 = vadd.f32 %v4921_v53, %v4692_v61 }
 0x274   : > { %v5802_v59 = vadd.f32 %v7312_v33, %v5048_v14  ;;  %v7267_v32 = vpop.f32.mrf.mxu1  ;;  %v6029_v17 = vmul.f32 %v5799_v40, %v5799_v40 }
 0x275   : > { %v5675_v15 = vpop.f32.mrf.mxu0  ;;  %v5051_v45 = vadd.f32 %v7267_v32, %v9725_v47 }
 0x276   : > { %v6606_v11 = vpack.c.bf16 %v5802_v59, %v5801_v8  ;;  %v5800_v48 = vadd.f32 %v5675_v15, %v5046_v55  ;;  %v4934_v50 = vpop.f32.mrf.mxu1  ;;  %v6032_v30 = vmul.f32 %v5802_v59, %v5802_v59 }
 0x277   : > { %v5049_v1 = vadd.f32 %v4934_v50, %v9727_v22 }
 0x278   : > { %6678 = vst [vmem:[%s9823_s18 + $0x8] sm:$0xff] %v6606_v11   ;;  %v6601_v20 = vpack.c.bf16 %v5800_v48, %v5799_v40  ;;  %v5991_v28 = vadd.f32 %v5800_v48, %v5799_v40  ;;  %v6030_v27 = vmul.f32 %v5800_v48, %v5800_v48  ;;  %v7268_v24 = vpop.f32.mrf.mxu1 }
 0x279   : > { %v5052_v43 = vadd.f32 %v7268_v24, %v4698_v37 }
 0x27a   : > { %6602 = vst [vmem:[%s9823_s18] sm:$0xff] %v6601_v20   ;;  %v5992_v56 = vadd.f32 %v5991_v28, %v5801_v8  ;;  %v6061_v13 = vadd.f32 %v6030_v27, %v6029_v17  ;;  %v7315_v6 = vpop.f32.mrf.mxu0  ;;  %v4937_v3 = vpop.f32.mrf.mxu1 }
 0x27b   : > { %v5050_v61 = vadd.f32 %v4937_v3, %v4696_v46  ;;  %v5805_v53 = vadd.f32 %v7315_v6, %v5051_v45 }
 0x27c   : > { %v6062_v49 = vadd.f32 %v6061_v13, %v6031_v16  ;;  %v5688_v26 = vpop.f32.mrf.mxu0  ;;  %v5993_v4 = vadd.f32 %v5992_v56, %v5802_v59  ;;  %v7271_v60 = vpop.f32.mrf.mxu1 }
 0x27d   : > { %v5803_v63 = vadd.f32 %v5688_v26, %v5049_v1  ;;  %v6035_v57 = vmul.f32 %v5805_v53, %v5805_v53  ;;  %v5055_v24 = vadd.f32 %v7271_v60, %v9739_v5 }
 0x27e   : > { %v6063_v22 = vadd.f32 %v6062_v49, %v6032_v30  ;;  %v7316_v42 = vpop.f32.mrf.mxu0  ;;  %v4950_v14 = vpop.f32.mrf.mxu1 }
 0x27f   : > { %v5994_v33 = vadd.f32 %v5993_v4, %v5803_v63  ;;  %v6033_v55 = vmul.f32 %v5803_v63, %v5803_v63  ;;  %v5806_v8 = vadd.f32 %v7316_v42, %v5052_v43  ;;  %v5053_v50 = vadd.f32 %v4950_v14, %v9742_v25 }
 0x280   : > { %v5691_v18 = vpop.f32.mrf.mxu0  ;;  %v7272_v40 = vpop.f32.mrf.mxu1 }
 0x281   : > { %v6064_v47 = vadd.f32 %v6063_v22, %v6033_v55  ;;  %v6616_v32 = vpack.c.bf16 %v5806_v8, %v5805_v53  ;;  %v5804_v9 = vadd.f32 %v5691_v18, %v5050_v61  ;;  %v5056_v37 = vadd.f32 %v7272_v40, %v9745_v36 }
 0x282   : > { %v4953_v15 = vpop.f32.mrf.mxu1  ;;  %v6036_v1 = vmul.f32 %v5806_v8, %v5806_v8 }
 0x283   : > { %6680 = vst [vmem:[%s9823_s18 + $0x18] sm:$0xff] %v6616_v32   ;;  %v6611_v59 = vpack.c.bf16 %v5804_v9, %v5803_v63  ;;  %v5995_v11 = vadd.f32 %v5994_v33, %v5804_v9  ;;  %v6034_v48 = vmul.f32 %v5804_v9, %v5804_v9  ;;  %v5054_v46 = vadd.f32 %v4953_v15, %v9747_v62 }
 0x285   : > { %6679 = vst [vmem:[%s9823_s18 + $0x10] sm:$0xff] %v6611_v59   ;;  %v5996_v17 = vadd.f32 %v5995_v11, %v5805_v53  ;;  %v6065_v20 = vadd.f32 %v6064_v47, %v6034_v48  ;;  %v7319_v28 = vpop.f32.mrf.mxu0 }
 0x286   : > { %v5809_v30 = vadd.f32 %v7319_v28, %v5055_v24 }
 0x287   : > { %v7275_v27 = vpop.f32.mrf.mxu1  ;;  %v6066_v16 = vadd.f32 %v6065_v20, %v6035_v57  ;;  %v5704_v56 = vpop.f32.mrf.mxu0  ;;  %v5997_v13 = vadd.f32 %v5996_v17, %v5806_v8 }
 0x288   : > { %v5807_v3 = vadd.f32 %v5704_v56, %v5053_v50  ;;  %v6039_v62 = vmul.f32 %v5809_v30, %v5809_v30  ;;  %v5059_v40 = vadd.f32 %v7275_v27, %v9750_v52 }
 0x289   : > { %v4966_v6 = vpop.f32.mrf.mxu1  ;;  %v6067_v25 = vadd.f32 %v6066_v16, %v6036_v1  ;;  %v7320_v45 = vpop.f32.mrf.mxu0 }
 0x28a   : > { %v5998_v49 = vadd.f32 %v5997_v13, %v5807_v3  ;;  %v6037_v26 = vmul.f32 %v5807_v3, %v5807_v3  ;;  %v5810_v4 = vadd.f32 %v7320_v45, %v5056_v37  ;;  %v5057_v53 = vadd.f32 %v4966_v6, %v9753_v41 }
 0x28b   : > { %v7276_v43 = vpop.f32.mrf.mxu1  ;;  %v5707_v5 = vpop.f32.mrf.mxu0 }
 0x28c   : > { %v6068_v60 = vadd.f32 %v6067_v25, %v6037_v26  ;;  %v6626_v36 = vpack.c.bf16 %v5810_v4, %v5809_v30  ;;  %v5808_v63 = vadd.f32 %v5707_v5, %v5054_v46  ;;  %v5060_v47 = vadd.f32 %v7276_v43, %v9756_v58 }
 0x28d   : > { %v4969_v61 = vpop.f32.mrf.mxu1  ;;  %v6040_v32 = vmul.f32 %v5810_v4, %v5810_v4 }
 0x28e   : > { %6682 = vst [vmem:[%s9823_s18 + $0x28] sm:$0xff] %v6626_v36   ;;  %v6621_v22 = vpack.c.bf16 %v5808_v63, %v5807_v3  ;;  %v5999_v42 = vadd.f32 %v5998_v49, %v5808_v63  ;;  %v6038_v14 = vmul.f32 %v5808_v63, %v5808_v63  ;;  %v5058_v50 = vadd.f32 %v4969_v61, %v9759_v44 }
 0x290   : > { %6681 = vst [vmem:[%s9823_s18 + $0x20] sm:$0xff] %v6621_v22   ;;  %v6000_v33 = vadd.f32 %v5999_v42, %v5809_v30  ;;  %v6069_v55 = vadd.f32 %v6068_v60, %v6038_v14 }
 0x291   : > { %v7323_v8 = vpop.f32.mrf.mxu0 }
 0x292   : > { %v6070_v9 = vadd.f32 %v6069_v55, %v6039_v62  ;;  %v6001_v59 = vadd.f32 %v6000_v33, %v5810_v4  ;;  %v5813_v20 = vadd.f32 %v7323_v8, %v5059_v40 }
 0x293   : > { %v7279_v18 = vpop.f32.mrf.mxu1  ;;  %v5720_v15 = vpop.f32.mrf.mxu0 }
 0x294   : > { %v5811_v48 = vadd.f32 %v5720_v15, %v5057_v53  ;;  %v6071_v41 = vadd.f32 %v6070_v9, %v6040_v32  ;;  %v6043_v44 = vmul.f32 %v5813_v20, %v5813_v20  ;;  %v5063_v30 = vadd.f32 %v7279_v18, %v9763_v23 }
 0x295   : > { %v4982_v11 = vpop.f32.mrf.mxu1  ;;  %v7324_v57 = vpop.f32.mrf.mxu0 }
 0x296   : > { %v6002_v28 = vadd.f32 %v6001_v59, %v5811_v48  ;;  %v6041_v24 = vmul.f32 %v5811_v48, %v5811_v48  ;;  %v5814_v37 = vadd.f32 %v7324_v57, %v5060_v47  ;;  %v5061_v3 = vadd.f32 %v4982_v11, %v9766_v34 }
 0x297   : > { %v7280_v17 = vpop.f32.mrf.mxu1  ;;  %v5723_v52 = vpop.f32.mrf.mxu0 }
 0x298   : > { %v6072_v27 = vadd.f32 %v6071_v41, %v6041_v24  ;;  %v6636_v58 = vpack.c.bf16 %v5814_v37, %v5813_v20  ;;  %v5812_v1 = vadd.f32 %v5723_v52, %v5058_v50  ;;  %v5064_v49 = vadd.f32 %v7280_v17, %v9769_v39 }
 0x299   : > { %v4985_v16 = vpop.f32.mrf.mxu1  ;;  %v6044_v26 = vmul.f32 %v5814_v37, %v5814_v37 }
 0x29a   : > { %6684 = vst [vmem:[%s9823_s18 + $0x38] sm:$0xff] %v6636_v58   ;;  %v6631_v56 = vpack.c.bf16 %v5812_v1, %v5811_v48  ;;  %v6003_v13 = vadd.f32 %v6002_v28, %v5812_v1  ;;  %v6042_v6 = vmul.f32 %v5812_v1, %v5812_v1  ;;  %v5062_v61 = vadd.f32 %v4985_v16, %v9771_v29 }
 0x29c   : > { %6683 = vst [vmem:[%s9823_s18 + $0x30] sm:$0xff] %v6631_v56   ;;  %v6004_v46 = vadd.f32 %v6003_v13, %v5813_v20  ;;  %v6073_v25 = vadd.f32 %v6072_v27, %v6042_v6 }
 0x29d   : > { %v7327_v45 = vpop.f32.mrf.mxu0 }
 0x29e   : > { %v6074_v4 = vadd.f32 %v6073_v25, %v6043_v44  ;;  %v6005_v60 = vadd.f32 %v6004_v46, %v5814_v37  ;;  %v5817_v14 = vadd.f32 %v7327_v45, %v5063_v30 }
 0x29f   : > { %v7283_v43 = vpop.f32.mrf.mxu1  ;;  %v5736_v5 = vpop.f32.mrf.mxu0 }
 0x2a0   : > { %v5815_v63 = vadd.f32 %v5736_v5, %v5061_v3  ;;  %v6075_v34 = vadd.f32 %v6074_v4, %v6044_v26  ;;  %v6047_v29 = vmul.f32 %v5817_v14, %v5817_v14  ;;  %v5067_v50 = vadd.f32 %v7283_v43, %v9774_v51 }
 0x2a1   : > { %v4998_v36 = vpop.f32.mrf.mxu1  ;;  %v7328_v22 = vpop.f32.mrf.mxu0 }
 0x2a2   : > { %v6006_v53 = vadd.f32 %v6005_v60, %v5815_v63  ;;  %v6045_v62 = vmul.f32 %v5815_v63, %v5815_v63  ;;  %v5818_v33 = vadd.f32 %v7328_v22, %v5064_v49  ;;  %v5065_v9 = vadd.f32 %v4998_v36, %v9777_v21 }
 0x2a3   : > { %v7284_v42 = vpop.f32.mrf.mxu1  ;;  %v5739_v23 = vpop.f32.mrf.mxu0 }
 0x2a4   : > { %v6076_v55 = vadd.f32 %v6075_v34, %v6045_v62  ;;  %v6646_v39 = vpack.c.bf16 %v5818_v33, %v5817_v14  ;;  %v5816_v8 = vadd.f32 %v5739_v23, %v5062_v61  ;;  %v5068_v41 = vadd.f32 %v7284_v42, %v9780_v2 }
 0x2a5   : > { %v5001_v18 = vpop.f32.mrf.mxu1  ;;  %v6048_v57 = vmul.f32 %v5818_v33, %v5818_v33 }
 0x2a6   : > { %6686 = vst [vmem:[%s9823_s18 + $0x48] sm:$0xff] %v6646_v39   ;;  %v6641_v40 = vpack.c.bf16 %v5816_v8, %v5815_v63  ;;  %v6007_v47 = vadd.f32 %v6006_v53, %v5816_v8  ;;  %v6046_v32 = vmul.f32 %v5816_v8, %v5816_v8  ;;  %v5066_v52 = vadd.f32 %v5001_v18, %v9783_v10 }
 0x2a8   : > { %6685 = vst [vmem:[%s9823_s18 + $0x40] sm:$0xff] %v6641_v40   ;;  %v6008_v15 = vadd.f32 %v6007_v47, %v5817_v14  ;;  %v6077_v59 = vadd.f32 %v6076_v55, %v6046_v32 }
 0x2a9   : > { %v7331_v11 = vpop.f32.mrf.mxu0 }
 0x2aa   : > { %v6078_v17 = vadd.f32 %v6077_v59, %v6047_v29  ;;  %v6009_v28 = vadd.f32 %v6008_v15, %v5818_v33  ;;  %v5821_v58 = vadd.f32 %v7331_v11, %v5067_v50 }
 0x2ab   : > { %v7287_v48 = vpop.f32.mrf.mxu1  ;;  %v5752_v20 = vpop.f32.mrf.mxu0 }
 0x2ac   : > { %v5819_v37 = vadd.f32 %v5752_v20, %v5065_v9  ;;  %v6079_v21 = vadd.f32 %v6078_v17, %v6048_v57  ;;  %v6051_v10 = vmul.f32 %v5821_v58, %v5821_v58  ;;  %v5071_v4 = vadd.f32 %v7287_v48, %v9787_v12 }
 0x2ad   : > { %v5014_v24 = vpop.f32.mrf.mxu1  ;;  %v7332_v27 = vpop.f32.mrf.mxu0 }
 0x2ae   : > { %v6010_v1 = vadd.f32 %v6009_v28, %v5819_v37  ;;  %v6049_v16 = vmul.f32 %v5819_v37, %v5819_v37  ;;  %v5822_v56 = vadd.f32 %v7332_v27, %v5068_v41  ;;  %v5069_v45 = vadd.f32 %v5014_v24, %v9790_v54 }
 0x2af   : > { %v5755_v13 = vpop.f32.mrf.mxu0  ;;  %v7288_v51 = vpop.f32.mrf.mxu1 }
 0x2b0   : > { %v6080_v6 = vadd.f32 %v6079_v21, %v6049_v16  ;;  %v6656_v2 = vpack.c.bf16 %v5822_v56, %v5821_v58  ;;  %v5820_v3 = vadd.f32 %v5755_v13, %v5066_v52  ;;  %v5072_v5 = vadd.f32 %v7288_v51, %v9793_v0 }
 0x2b1   : > { %v5017_v43 = vpop.f32.mrf.mxu1  ;;  %v6052_v60 = vmul.f32 %v5822_v56, %v5822_v56 }
 0x2b2   : > { %6688 = vst [vmem:[%s9823_s18 + $0x58] sm:$0xff] %v6656_v2   ;;  %v6651_v44 = vpack.c.bf16 %v5820_v3, %v5819_v37  ;;  %v6011_v46 = vadd.f32 %v6010_v1, %v5820_v3  ;;  %v6050_v25 = vmul.f32 %v5820_v3, %v5820_v3  ;;  %v5070_v22 = vadd.f32 %v5017_v43, %v9795_v38 }
 0x2b4   : > { %6687 = vst [vmem:[%s9823_s18 + $0x50] sm:$0xff] %v6651_v44   ;;  %v6012_v30 = vadd.f32 %v6011_v46, %v5821_v58  ;;  %v6081_v49 = vadd.f32 %v6080_v6, %v6050_v25  ;;  %v7335_v26 = vpop.f32.mrf.mxu0 }
 0x2b5   : > { %v7291_v42 = vpop.f32.mrf.mxu1  ;;  %v5825_v53 = vadd.f32 %v7335_v26, %v5071_v4 }
 0x2b6   : > { %v6082_v36 = vadd.f32 %v6081_v49, %v6051_v10  ;;  %v5768_v63 = vpop.f32.mrf.mxu0  ;;  %v6013_v61 = vadd.f32 %v6012_v30, %v5822_v56  ;;  %v5075_v17 = vadd.f32 %v7291_v42, %v9799_v7 }
 0x2b7   : > { %v5823_v34 = vadd.f32 %v5768_v63, %v5069_v45  ;;  %v5030_v8 = vpop.f32.mrf.mxu1  ;;  %v6055_v32 = vmul.f32 %v5825_v53, %v5825_v53 }
 0x2b8   : > { %v6083_v54 = vadd.f32 %v6082_v36, %v6052_v60  ;;  %v7336_v14 = vpop.f32.mrf.mxu0  ;;  %v5073_v48 = vadd.f32 %v5030_v8, %v9802_v35 }
 0x2b9   : > { %v6014_v62 = vadd.f32 %v6013_v61, %v5823_v34  ;;  %v6053_v33 = vmul.f32 %v5823_v34, %v5823_v34  ;;  %v5826_v23 = vadd.f32 %v7336_v14, %v5072_v5  ;;  %v7292_v29 = vpop.f32.mrf.mxu1 }
 0x2ba   : > { %v5771_v55 = vpop.f32.mrf.mxu0  ;;  %v5076_v20 = vadd.f32 %v7292_v29, %v9807_v31 }
 0x2bb   : > { %v6084_v12 = vadd.f32 %v6083_v54, %v6053_v33  ;;  %v6666_v39 = vpack.c.bf16 %v5826_v23, %v5825_v53  ;;  %v5824_v0 = vadd.f32 %v5771_v55, %v5070_v22  ;;  %v6056_v15 = vmul.f32 %v5826_v23, %v5826_v23  ;;  %v5033_v57 = vpop.f32.mrf.mxu1 }
 0x2bc   : > { %v5074_v37 = vadd.f32 %v5033_v57, %v9811_v19 }
 0x2bd   : > { %6690 = vst [vmem:[%s9823_s18 + $0x68] sm:$0xff] %v6666_v39   ;;  %v6661_v18 = vpack.c.bf16 %v5824_v0, %v5823_v34  ;;  %v6015_v40 = vadd.f32 %v6014_v62, %v5824_v0  ;;  %v6054_v47 = vmul.f32 %v5824_v0, %v5824_v0 }
 0x2bf   : > { %6689 = vst [vmem:[%s9823_s18 + $0x60] sm:$0xff] %v6661_v18   ;;  %v6016_v38 = vadd.f32 %v6015_v40, %v5825_v53  ;;  %v6085_v9 = vadd.f32 %v6084_v12, %v6054_v47 }
 0x2c1   : > { %v6086_v59 = vadd.f32 %v6085_v9, %v6055_v32  ;;  %v6017_v11 = vadd.f32 %v6016_v38, %v5826_v23 }
 0x2c3   : > { %v7339_v50 = vpop.f32.mrf.mxu0  ;;  %v6087_v41 = vadd.f32 %v6086_v59, %v6056_v15 }
 0x2c4   : > { %v5829_v21 = vadd.f32 %v7339_v50, %v5075_v17 }
 0x2c5   : > { %v5784_v28 = vpop.f32.mrf.mxu0 }
 0x2c6   : > { %v5827_v24 = vadd.f32 %v5784_v28, %v5073_v48  ;;  %v6059_v51 = vmul.f32 %v5829_v21, %v5829_v21 }
 0x2c7   : > { %v7340_v52 = vpop.f32.mrf.mxu0 }
 0x2c8   : > { %v6018_v27 = vadd.f32 %v6017_v11, %v5827_v24  ;;  %v6057_v58 = vmul.f32 %v5827_v24, %v5827_v24  ;;  %v5830_v1 = vadd.f32 %v7340_v52, %v5076_v20 }
 0x2c9   : > { %v5787_v35 = vpop.f32.mrf.mxu0 }
 0x2ca   : > { %v6088_v16 = vadd.f32 %v6087_v41, %v6057_v58  ;;  %v6676_v7 = vpack.c.bf16 %v5830_v1, %v5829_v21  ;;  %v5828_v56 = vadd.f32 %v5787_v35, %v5074_v37 }
 0x2cc   : > { %6692 = vst [vmem:[%s9823_s18 + $0x78] sm:$0xff] %v6676_v7   ;;  %v6671_v31 = vpack.c.bf16 %v5828_v56, %v5827_v24  ;;  %v6019_v19 = vadd.f32 %v6018_v27, %v5828_v56  ;;  %v6058_v13 = vmul.f32 %v5828_v56, %v5828_v56 }
 0x2ce   : > { %6691 = vst [vmem:[%s9823_s18 + $0x70] sm:$0xff] %v6671_v31   ;;  %v6020_v6 = vadd.f32 %v6019_v19, %v5829_v21  ;;  %v6089_v2 = vadd.f32 %v6088_v16, %v6058_v13 }
 0x2cf   : > { %7642 = shalt.err (!%p7639_p0)
}
 0x2d0   : > { %s7643_s10 = scalar_lea.hbm %s9872_s22, 2048  ;;  %s7647_s27 = scalar_lea.hbm %s9946_s2, 4096 }
 0x2d1   : > { %p7644_p5 = scmp.ne.s32.totalorder %s9872_s22, %s7643_s10  ;;  %p7648_p4 = scmp.lt.s32.totalorder %s9872_s22, %s9946_s2 }
 0x2d2   : > { %p7649_p6 = scmp.lt.s32.totalorder %s7647_s27, %s7643_s10 }
 0x2d3   : > { %p7645_p2 = pnand %p7644_p5, %p10210_p11 }
 0x2d4   : > { %p7650_p8 = por %p7649_p6, %p7648_p4 }
 0x2d5   : > { %p7646_p1 = pneg %p7645_p2 }
 0x2d7   : > { %p7651_p3 = pnand %p7650_p8, %p7646_p1 }
 0x2d9   : > { %7654 = shalt.err (!%p7651_p3)
}
 0x2da   : > { %s7735_s18 = smov 64   ;;  %s7736_s20 = smov 4   ;;  %v6060_v3 = vmul.f32 %v5830_v1, %v5830_v1  ;;  %v6021_v44 = vadd.f32 %v6020_v6, %v5830_v1  ;;  %v6090_v46 = vadd.f32 %v6089_v2, %v6059_v51 }
 0x2db   : > { %7363 = dma.vmem_to_hbm [thread:$0]  (%p10210_p11), %s9874_s28, 2048, %s9872_s22, %s6103_s25, %s7735_s18, %s7735_s18, %s7736_s20  }
 0x2dc   : > { %v6022_v25 = vrot.slane %v6021_v44, 4  ;;  %v6091_v45 = vadd.f32 %v6090_v46, %v6060_v3  ;;  %s6260_s29 = sshll.u32 %s7880_s26, 1  ;;  %s6561_s17 = sshll.u32 %s7779_s16, 5 }
 0x2dd   : > { %s214_s28 = scalar_lea.vmem [#allocation9], %s6260_s29  ;;  %s9906_s8 = scalar_lea.hbm %s9947_s3, %s6561_s17 }
 0x2de   : > { %v6023_v43 = vadd.f32 %v6022_v25, %v6021_v44  ;;  %v6092_v10 = vrot.slane %v6091_v45, 4  ;;  %s6137_s22 = sshll.u32 %s214_s28, 4  ;;  %s6108_s9 = scalar_lea.sflag [#allocation10], %s7880_s26  ;;  %s6138_s22 = int_to_ptr.vmem [resolvable:$true] %s6137_s22 }
 0x2df   : > { %s7655_s7 = scalar_lea.vmem %s6138_s22, 32  ;;  %s7737_s16 = smov [#allocation9]  }
 0x2e0   : > { %v6024_v30 = vrot.slane %v6023_v43, 2  ;;  %v6093_v49 = vadd.f32 %v6092_v10, %v6091_v45  ;;  %p7656_p7 = scmp.ne.s32.totalorder %s6138_s22, %s7655_s7  ;;  %s7659_s10 = sshll.u32 %s7737_s16, 4  ;;  %s7660_s10 = int_to_ptr.vmem [resolvable:$false] %s7659_s10 }
 0x2e1   : > { %s7661_s11 = scalar_lea.vmem %s7660_s10, 64  ;;  %p7662_p12 = scmp.lt.s32.totalorder %s6138_s22, %s7660_s10 }
 0x2e2   : > { %v6025_v26 = vadd.f32 %v6024_v30, %v6023_v43  ;;  %v6094_v4 = vrot.slane %v6093_v49, 2  ;;  %p7657_p9 = pnand %p7656_p7, %p10210_p11  ;;  %p7663_p13 = scmp.lt.s32.totalorder %s7661_s11, %s7655_s7 }
 0x2e4   : > { %v6026_v5 = vrot.slane %v6025_v26, 1  ;;  %v6095_v60 = vadd.f32 %v6094_v4, %v6093_v49  ;;  %p7658_p10 = pneg %p7657_p9  ;;  %p7664_p0 = por %p7663_p13, %p7662_p12 }
 0x2e6   : > { %v6096_v36 = vrot.slane %v6095_v60, 1  ;;  %v6027_v63 = vadd.f32 %v6026_v5, %v6025_v26  ;;  %p7665_p5 = pnand %p7664_p0, %p7658_p10 }
 0x2e8   : > { %v6097_v61 = vadd.f32 %v6096_v36, %v6095_v60 }
 0x2ea   : > { %v6100_v34 = vsel %vm289_vm5, %v6027_v63, %v6097_v61 }
 0x2eb   : > { %6101 = vst [vmem:[%s214_s28] sm:$0x3] %v6100_v34 }
 0x2ec   : > { %7668 = shalt.err (!%p7665_p5)
}
 0x2ed   : > { %s7669_s21 = scalar_lea.hbm %s9906_s8, 32  ;;  %s7673_s30 = scalar_lea.hbm %s9947_s3, 64 }
 0x2ee   : > { %p7670_p2 = scmp.ne.s32.totalorder %s9906_s8, %s7669_s21  ;;  %p7674_p6 = scmp.lt.s32.totalorder %s9906_s8, %s9947_s3 }
 0x2ef   : > { %p7675_p8 = scmp.lt.s32.totalorder %s7673_s30, %s7669_s21 }
 0x2f0   : > { %p7671_p1 = pnand %p7670_p2, %p10210_p11 }
 0x2f1   : > { %p7676_p3 = por %p7675_p8, %p7674_p6 }
 0x2f2   : > { %p7672_p4 = pneg %p7671_p1 }
 0x2f4   : > { %p7677_p7 = pnand %p7676_p3, %p7672_p4 }
 0x2f6   : > { %7680 = shalt.err (!%p7677_p7)
}
 0x2f7   : > { %7364 = dma.vmem_to_hbm [thread:$0]  (%p10210_p11), %s6138_s22, 32, %s9906_s8, %s6108_s9  }
 0x2f8 PF: > { %s6149_s20 = sand.u32 1, %s7715_s12   ;;  %p10211_p9 = scmp.ne.s32.totalorder %s9956_s19, 0 }
 0x2f9   : > { %p10212_p10 = scmp.ge.s32.totalorder %s7727_s15, 2  ;;  %s6150_s29 = scalar_lea.sflag [#allocation5], %s6149_s20 }
 0x2fb   : > { %p7376_p12 = pnand %p10212_p10, %p10211_p9 }
 0x2fd   : > { %p7377_p13 = pneg %p7376_p12 }
 0x2ff   : > { %7706 = dma.done.wait (%p7377_p13), %s6150_s29, 2048  }
 0x300   : > { %7708 = vsyncadd (%p7377_p13), %s6150_s29, 4294965248  ;;  %s6159_s17 = scalar_lea.sflag [#allocation10], %s6149_s20 }
 0x301   : > { %7710 = dma.done.wait (%p7377_p13), %s6159_s17, 32  }
 0x302   : > { %7712 = vsyncadd (%p7377_p13), %s6159_s17, 4294967264  ;;  %p21_p11 = scmp.ge.s32.totalorder %s7812_s24, 4   ;;  %s10213_s12 = smov %s7719_s13 }
 0x303   : > { %s10214_s13 = smov %s7723_s14  ;;  %s10215_s14 = smov %s7832_s5 }
 0x304   : > { %s10216_s15 = smov %s7812_s24  ;;  %23 = sbr.rel (!%p21_p11) target bundleno = 8 (0x8), region = 105 }
 0x309   :  { %6164 = vsyncpa [#allocation4], 1 }
 0x30a   :  { %6166 = vsyncpa [#allocation4 + $0x1], 1 }
 0x30b   :  { %6167 = vsyncpa [#allocation7], 1 }
 0x30c   :  { %6168 = vsyncpa [#allocation5], 1 }
 0x30d   :  { %6170 = vsyncpa [#allocation5 + $0x1], 1 }
 0x30e   :  { %6171 = vsyncpa [#allocation10], 1 }
 0x30f   :  { %6173 = vsyncpa [#allocation10 + $0x1], 1 }

</bundles_post_ra>
